<compile_context>
chip_gen: v5e
topology: v5e:2x2
jax: 0.10.0
libtpu: 0.0.40
codegen_flags: <defaults>
</compile_context>

<pallas_src>
import jax
import jax.numpy as jnp
from jax import lax
from jax.experimental import pallas as pl
from jax.experimental.pallas import tpu as pltpu

LANE = 128   # TPU lane width (last dim); also used for the sublane-ish tile rounding here
f32 = jnp.float32
bf16 = jnp.bfloat16


def _round_up(x, m):
    return ((x + m - 1) // m) * m


def _pad2(x, rows, cols):
    return jnp.pad(x, ((0, rows - x.shape[0]), (0, cols - x.shape[1])))


def gnn_layer_forward(node_feat, src_idx, dst_idx, edge_feat, params, out_dim,
                      *, edge_tile=256, core_splits=2):
    """node_feat: [N, F]; src_idx/dst_idx: [E] int32; edge_feat: [E, H] -> [N, out_dim]."""
    N, F = node_feat.shape
    E, H = edge_feat.shape
    O = out_dim

    # ---- lane-aligned padded sizes (exact: padded weights/biases are zero) ----
    F_pad = _round_up(F, LANE)
    H_pad = _round_up(H, LANE)
    O_pad = _round_up(O, LANE)
    N_pad = _round_up(N, LANE)     # lane dim of indicator tiles / K of gather matmuls

    TE = _round_up(max(LANE, min(edge_tile, _round_up(E, LANE))), LANE)   # edge tile
    E_pad = _round_up(E, TE * core_splits)
    tps = E_pad // (TE * core_splits)          # edge tiles per core split
    num_tiles = E_pad // TE

    # ---- host-side glue: pad tensors, pack indices in both layouts ----
    h_p = _pad2(node_feat.astype(f32), N_pad, F_pad).astype(bf16)     # [N_pad, F_pad] bf16
    e_p = _pad2(edge_feat.astype(f32), E_pad, H).astype(bf16)         # [E_pad, H] bf16 (un-padded lanes)

    fill = jnp.full((E_pad - E,), -1, jnp.int32)      # padded edges match no node row
    src_flat = jnp.concatenate([src_idx.astype(jnp.int32), fill])
    dst_flat = jnp.concatenate([dst_idx.astype(jnp.int32), fill])
    src_col = src_flat[:, None]                                       # [E_pad, 1]
    dst_col = dst_flat[:, None]                                       # [E_pad, 1]
    dst_row = dst_flat.reshape(num_tiles, 1, TE)                      # [T, 1, TE]

    def wp(w, r, c):   # padded bf16 weight
        return _pad2(w.astype(f32), r, c).astype(bf16)

    def bp(b, c):      # padded f32 bias [1, c]
        return _pad2(b.astype(f32), 1, c)

    # fused src/dst node affine:  codes = h @ [w_src | w_dst] + [b_src | b_dst]
    w_sd = jnp.concatenate([wp(params["w_src"], F_pad, H_pad),
                            wp(params["w_dst"], F_pad, H_pad)], axis=1)   # [F_pad, 2H_pad]
    b_sd = jnp.concatenate([bp(params["b_src"], H_pad),
                            bp(params["b_dst"], H_pad)], axis=1)          # [1, 2H_pad]
    pw1 = wp(params["phi_w1"], H_pad, H_pad); pb1 = bp(params["phi_b1"], H_pad)
    pw2 = wp(params["phi_w2"], H_pad, H_pad); pb2 = bp(params["phi_b2"], H_pad)
    pw3 = wp(params["phi_w3"], H_pad, F_pad); pb3 = bp(params["phi_b3"], F_pad)
    # fused node update affine:   z = [h | updated] @ [[w_pd],[w_pu]] + (b_pd + b_pu)
    w_pdu = jnp.concatenate([wp(params["w_pd"], F_pad, H_pad),
                             wp(params["w_pu"], F_pad, H_pad)], axis=0)   # [2F_pad, H_pad]
    b_pdu = bp(params["b_pd"], H_pad) + bp(params["b_pu"], H_pad)
    tw1 = wp(params["th_w1"], H_pad, H_pad); tb1 = bp(params["th_b1"], H_pad)
    tw2 = wp(params["th_w2"], H_pad, O_pad); tb2 = bp(params["th_b2"], O_pad)

    edge_weights = [w_sd, b_sd, pw1, pb1, pw2, pb2, pw3, pb3]
    node_weights = [w_pdu, b_pdu, tw1, tb1, tw2, tb2]

    # ================= kernel 1: edge phase -> partial 'updated' sums =================
    def edge_kernel(src_ref, dstc_ref, dstr_ref, e_ref, h_ref,
                    w_sd_ref, b_sd_ref, pw1_ref, pb1_ref, pw2_ref, pb2_ref,
                    pw3_ref, pb3_ref,
                    part_ref, stab_ref, dtab_ref):
        k = pl.program_id(1)   # edge-tile step within this core split ("arbitrary" axis)

        # step 0 (per core split): zero this split's accumulator; hoist src/dst Linears to
        # node granularity with one fused [N,F]x[F,2H] matmul; keep tables resident in VMEM.
        @pl.when(k == 0)
        def _init():
            part_ref[0] = jnp.zeros((N_pad, F_pad), f32)
            h16 = h_ref[...]                                              # [N, F] bf16
            codes = jnp.dot(h16, w_sd_ref[...],
                            preferred_element_type=f32) + b_sd_ref[...]   # [N, 2H] f32
            stab_ref[...] = jnp.concatenate(
                [h16, codes[:, :H_pad].astype(bf16)], axis=1)             # [N, F+H] bf16
            dtab_ref[...] = codes[:, H_pad:].astype(bf16)                 # [N, H] bf16

        # ------------------------- per-edge-tile work -------------------------
        src = src_ref[...]                      # [TE, 1] int32 (-1 on padded edges)
        dstc = dstc_ref[...]                    # [TE, 1] int32
        dstr = dstr_ref[0]                      # [1, TE] int32 (lane layout)

        col_ids = lax.broadcasted_iota(jnp.int32, (TE, N_pad), 1)
        g_src = (col_ids == src).astype(bf16)           # [TE, N] gather(src) indicator
        g_dst = (col_ids == dstc).astype(bf16)          # [TE, N] gather(dst) indicator
        row_ids = lax.broadcasted_iota(jnp.int32, (N_pad, TE), 0)
        g_dst_t = (row_ids == dstr).astype(bf16)        # [N, TE] scatter-add indicator

        # fused gather of [h[src] | src_code[src]] with a single MXU matmul
        gathered = jnp.dot(g_src, stab_ref[...], preferred_element_type=f32)  # [TE, F+H]
        h_src_e = gathered[:, :F_pad]                   # [TE, F] f32
        src_code_e = gathered[:, F_pad:]                # [TE, H_pad] f32
        dst_code_e = jnp.dot(g_dst, dtab_ref[...], preferred_element_type=f32)

        # phi MLP (bf16 MXU feeds, f32 accumulation). Edge features are streamed un-padded
        # ([TE, H]); lanes >= H of the edge code are identically zero and would multiply
        # zero rows of pw1, so the first layer is computed on the H real lanes only.
        if H_pad > H:
            t = e_ref[...].astype(f32) + src_code_e[:, :H] + dst_code_e[:, :H]   # [TE, H]
            x0 = jnp.maximum(t, 0.0).astype(bf16)
            w1 = pw1_ref[:H, :]                                                   # [H, H_pad]
        else:
            t = e_ref[...].astype(f32) + src_code_e + dst_code_e
            x0 = jnp.maximum(t, 0.0).astype(bf16)
            w1 = pw1_ref[...]
        x = jnp.maximum(jnp.dot(x0, w1, preferred_element_type=f32)
                        + pb1_ref[...], 0.0).astype(bf16)
        x = jnp.maximum(jnp.dot(x, pw2_ref[...], preferred_element_type=f32)
                        + pb2_ref[...], 0.0).astype(bf16)
        e_emb = jnp.dot(x, pw3_ref[...], preferred_element_type=f32) + pb3_ref[...]

        # message + scatter-add into this split's resident f32 output block (plain A@B).
        # NOTE: keep `m` in f32 here if tighter-than-5e-2 tolerance is needed.
        m = (h_src_e * e_emb).astype(bf16)                                  # [TE, F]
        part_ref[0] = part_ref[0] + jnp.dot(g_dst_t, m, preferred_element_type=f32)

    edge_in_specs = [
        pl.BlockSpec((TE, 1), lambda c, k: (c * tps + k, 0)),       # src indices (column)
        pl.BlockSpec((TE, 1), lambda c, k: (c * tps + k, 0)),       # dst indices (column)
        pl.BlockSpec((1, 1, TE), lambda c, k: (c * tps + k, 0, 0)),  # dst indices (row)
        pl.BlockSpec((TE, H), lambda c, k: (c * tps + k, 0)),       # edge features (bf16, un-padded)
        pl.BlockSpec((N_pad, F_pad), lambda c, k: (0, 0)),          # node features (bf16, resident)
    ] + [pl.BlockSpec(w.shape, lambda c, k: (0, 0)) for w in edge_weights]   # resident weights (2D)

    partials = pl.pallas_call(
        edge_kernel,
        out_shape=jax.ShapeDtypeStruct((core_splits, N_pad, F_pad), f32),
        grid_spec=pltpu.PrefetchScalarGridSpec(
            num_scalar_prefetch=0,
            grid=(core_splits, tps),
            in_specs=edge_in_specs,
            # output block indexed by the parallel core-split axis, revisited across the
            # edge-tile axis -> it *is* the per-split accumulator (no extra scratch slab).
            out_specs=pl.BlockSpec((1, N_pad, F_pad), lambda c, k: (c, 0, 0)),
            scratch_shapes=[
                pltpu.VMEM((N_pad, F_pad + H_pad), bf16),   # [h | src_code] gather table
                pltpu.VMEM((N_pad, H_pad), bf16),           # dst_code gather table
            ]),
        compiler_params=pltpu.CompilerParams(
            dimension_semantics=("parallel", "arbitrary"),   # v7x: edge loop split across 2 TCs
            vmem_limit_bytes=48 * 1024 * 1024),              # fits v7x 64 MiB; > v5e/v6e defaults
    )(src_col, dst_col, dst_row, e_p, h_p, *edge_weights)

    # ============== kernel 2: node phase  out = theta(phi_dst(h)+phi_upd(upd)) ==============
    def node_kernel(h_ref, part_ref, w_pdu_ref, b_pdu_ref,
                    tw1_ref, tb1_ref, tw2_ref, tb2_ref, out_ref):
        upd = part_ref[0]
        for c in range(1, core_splits):            # static unroll over core splits
            upd = upd + part_ref[c]
        zin = jnp.concatenate([h_ref[...], upd.astype(bf16)], axis=1)       # [N, 2F] bf16
        z = jnp.dot(zin, w_pdu_ref[...], preferred_element_type=f32) + b_pdu_ref[...]
        y = jnp.maximum(z, 0.0).astype(bf16)
        y = jnp.maximum(jnp.dot(y, tw1_ref[...], preferred_element_type=f32)
                        + tb1_ref[...], 0.0).astype(bf16)
        y = jnp.dot(y, tw2_ref[...], preferred_element_type=f32) + tb2_ref[...]
        out_ref[...] = y.astype(out_ref.dtype)                               # lane-dense store

    node_in_specs = (
        [pl.BlockSpec((N_pad, F_pad), lambda i: (0, 0)),
         pl.BlockSpec((core_splits, N_pad, F_pad), lambda i: (0, 0, 0))]
        + [pl.BlockSpec(w.shape, lambda i: (0, 0)) for w in node_weights])

    out_padded = pl.pallas_call(
        node_kernel,
        out_shape=jax.ShapeDtypeStruct((N_pad, O_pad), f32),
        grid_spec=pltpu.PrefetchScalarGridSpec(
            num_scalar_prefetch=0,
            grid=(1,),
            in_specs=node_in_specs,
            out_specs=pl.BlockSpec((N_pad, O_pad), lambda i: (0, 0)),
            scratch_shapes=[]),
        compiler_params=pltpu.CompilerParams(
            dimension_semantics=("arbitrary",)),
    )(h_p, partials, *node_weights)

    return out_padded[:N, :O]


def make_params(key, in_node_feat, hidden_dim, out_node_feats):
    """Deterministic synthetic parameters. Weights stored as [in, out] (x @ W + b)."""
    ks = jax.random.split(key, 20)

    def lin(k, din, dout):
        kw, kb = jax.random.split(k)
        scale = 1.0 / jnp.sqrt(din)
        w = jax.random.uniform(kw, (din, dout), jnp.float32, -scale, scale)
        b = jax.random.uniform(kb, (1, dout), jnp.float32, -scale, scale)
        return w, b

    p = {}
    p["w_src"], p["b_src"] = lin(ks[0], in_node_feat, hidden_dim)
    p["w_dst"], p["b_dst"] = lin(ks[1], in_node_feat, hidden_dim)
    p["phi_w1"], p["phi_b1"] = lin(ks[2], hidden_dim, hidden_dim)
    p["phi_w2"], p["phi_b2"] = lin(ks[3], hidden_dim, hidden_dim)
    p["phi_w3"], p["phi_b3"] = lin(ks[4], hidden_dim, in_node_feat)
    p["w_pd"], p["b_pd"] = lin(ks[5], in_node_feat, hidden_dim)
    p["w_pu"], p["b_pu"] = lin(ks[6], in_node_feat, hidden_dim)
    p["th_w1"], p["th_b1"] = lin(ks[7], hidden_dim, hidden_dim)
    p["th_w2"], p["th_b2"] = lin(ks[8], hidden_dim, out_node_feats)
    return p


def gnn_layer_ref(node_feat, src_idx, dst_idx, edge_feat, params):
    """Pure-JAX f32 reference matching the PyTorch forward."""
    h = node_feat
    relu = lambda x: jnp.maximum(x, 0.0)
    src_code = h[src_idx] @ params["w_src"] + params["b_src"]
    dst_code = h[dst_idx] @ params["w_dst"] + params["b_dst"]
    t = edge_feat + src_code + dst_code
    x = relu(t)
    x = relu(x @ params["phi_w1"] + params["phi_b1"])
    x = relu(x @ params["phi_w2"] + params["phi_b2"])
    e_emb = x @ params["phi_w3"] + params["phi_b3"]
    m = h[src_idx] * e_emb
    updated = jnp.zeros_like(h).at[dst_idx].add(m)
    z = (h @ params["w_pd"] + params["b_pd"]) + (updated @ params["w_pu"] + params["b_pu"])
    y = relu(z)
    y = relu(y @ params["th_w1"] + params["th_b1"])
    return y @ params["th_w2"] + params["th_b2"]


if __name__ == "__main__":
    # small synthetic graph: E is not a multiple of the edge tile, so the last tiles are
    # partially padded (exercising the -1 index masking path), and N < 128 exercises the
    # padded-node-lane path. core_splits=2 exercises the v7x-style parallel split.
    N = 64           # nodes
    E = 600          # edges
    F_IN = 8         # in_node_feat
    HID = 32         # hidden_dim
    F_OUT = 8        # out_node_feats

    key = jax.random.PRNGKey(0)
    k_h, k_e, k_s, k_d, k_p = jax.random.split(key, 5)

    node_feat = jax.random.normal(k_h, (N, F_IN), jnp.float32)
    edge_feat = jax.random.normal(k_e, (E, HID), jnp.float32)   # g.edata['e']
    src_idx = jax.random.randint(k_s, (E,), 0, N, jnp.int32)
    dst_idx = jax.random.randint(k_d, (E,), 0, N, jnp.int32)
    params = make_params(k_p, F_IN, HID, F_OUT)

    out = gnn_layer_forward(node_feat, src_idx, dst_idx, edge_feat, params, F_OUT,
                            edge_tile=256, core_splits=2)
    out = jax.block_until_ready(out)

    ref = gnn_layer_ref(node_feat, src_idx, dst_idx, edge_feat, params)
    assert out.shape == (N, F_OUT)
    # bf16 MXU feeds with f32 accumulation -> small quantization error vs f32 reference
    assert jnp.allclose(out, ref, atol=5e-2, rtol=5e-2), "mismatch vs reference"

    print("KERNEL_OK")
</pallas_src>

<mosaic_0001>
module attributes {stable_mosaic.version = 11 : i64} {
  func.func @edge_kernel(%arg0: i32, %arg1: i32, %arg2: memref<256x1xi32, #tpu.memory_space<vmem>>, %arg3: memref<256x1xi32, #tpu.memory_space<vmem>>, %arg4: memref<1x1x256xi32, #tpu.memory_space<vmem>>, %arg5: memref<256x32xbf16, #tpu.memory_space<vmem>>, %arg6: memref<128x128xbf16, #tpu.memory_space<vmem>>, %arg7: memref<128x256xbf16, #tpu.memory_space<vmem>>, %arg8: memref<1x256xf32, #tpu.memory_space<vmem>>, %arg9: memref<128x128xbf16, #tpu.memory_space<vmem>>, %arg10: memref<1x128xf32, #tpu.memory_space<vmem>>, %arg11: memref<128x128xbf16, #tpu.memory_space<vmem>>, %arg12: memref<1x128xf32, #tpu.memory_space<vmem>>, %arg13: memref<128x128xbf16, #tpu.memory_space<vmem>>, %arg14: memref<1x128xf32, #tpu.memory_space<vmem>>, %arg15: memref<1x128x128xf32, #tpu.memory_space<vmem>>, %arg16: memref<128x256xbf16, #tpu.memory_space<vmem>>, %arg17: memref<128x128xbf16, #tpu.memory_space<vmem>>) attributes {dimension_semantics = [#tpu.dimension_semantics<parallel>, #tpu.dimension_semantics<arbitrary>], iteration_bounds = array<i64: 2, 2>, scalar_prefetch = 0 : i64, scratch_operands = 2 : i64, tpu.core_type = #tpu.core_type<tc>, window_params = [{transform_indices = @transform_0, window_bounds = array<i64: 256, 1>}, {transform_indices = @transform_1, window_bounds = array<i64: 256, 1>}, {transform_indices = @transform_2, window_bounds = array<i64: 1, 1, 256>}, {transform_indices = @transform_3, window_bounds = array<i64: 256, 32>}, {pipeline_mode = #tpu.pipeline_mode<synchronous>, transform_indices = @transform_4, window_bounds = array<i64: 128, 128>}, {pipeline_mode = #tpu.pipeline_mode<synchronous>, transform_indices = @transform_5, window_bounds = array<i64: 128, 256>}, {pipeline_mode = #tpu.pipeline_mode<synchronous>, transform_indices = @transform_6, window_bounds = array<i64: 1, 256>}, {pipeline_mode = #tpu.pipeline_mode<synchronous>, transform_indices = @transform_7, window_bounds = array<i64: 128, 128>}, {pipeline_mode = #tpu.pipeline_mode<synchronous>, transform_indices = @transform_8, window_bounds = array<i64: 1, 128>}, {pipeline_mode = #tpu.pipeline_mode<synchronous>, transform_indices = @transform_9, window_bounds = array<i64: 128, 128>}, {pipeline_mode = #tpu.pipeline_mode<synchronous>, transform_indices = @transform_10, window_bounds = array<i64: 1, 128>}, {pipeline_mode = #tpu.pipeline_mode<synchronous>, transform_indices = @transform_11, window_bounds = array<i64: 128, 128>}, {pipeline_mode = #tpu.pipeline_mode<synchronous>, transform_indices = @transform_12, window_bounds = array<i64: 1, 128>}, {transform_indices = @transform_13, window_bounds = array<i64: 1, 128, 128>}]} {
    %c0_i32 = arith.constant 0 : i32
    %0 = arith.cmpi eq, %arg1, %c0_i32 : i32
    %1 = arith.extui %0 : i1 to i32
    %c0_i32_0 = arith.constant 0 : i32
    %2 = arith.cmpi ne, %1, %c0_i32_0 : i32
    scf.if %2 {
      %cst_39 = arith.constant 0.000000e+00 : f32
      %69 = vector.broadcast %cst_39 : f32 to vector<128x128xf32>
      %c0_40 = arith.constant 0 : index
      %c0_41 = arith.constant 0 : index
      %c0_42 = arith.constant 0 : index
      %70 = vector.load %arg15[%c0_40, %c0_41, %c0_42] : memref<1x128x128xf32, #tpu.memory_space<vmem>>, vector<1x128x128xf32>
      %71 = vector.shape_cast %70 : vector<1x128x128xf32> to vector<128x128xf32>
      %72 = vector.shape_cast %69 : vector<128x128xf32> to vector<1x128x128xf32>
      tpu.vector_store %arg15[%c0_40, %c0_41, %c0_42], %72 {strides = array<i32>} : memref<1x128x128xf32, #tpu.memory_space<vmem>>, vector<1x128x128xf32>,
      %c0_43 = arith.constant 0 : index
      %c0_44 = arith.constant 0 : index
      %73 = vector.load %arg6[%c0_43, %c0_44] : memref<128x128xbf16, #tpu.memory_space<vmem>>, vector<128x128xbf16>
      %c0_45 = arith.constant 0 : index
      %c0_46 = arith.constant 0 : index
      %74 = vector.load %arg7[%c0_45, %c0_46] : memref<128x256xbf16, #tpu.memory_space<vmem>>, vector<128x256xbf16>
      %cst_47 = arith.constant dense<0.000000e+00> : vector<128x256xf32>
      %75 = tpu.matmul %73, %74, %cst_47 {dimension_numbers = #tpu.dot_dimension_numbers<[1], [0], [0], [1], [0, 0, 1, 1], [], []>} : vector<128x128xbf16>, vector<128x256xbf16>, vector<128x256xf32> -> vector<128x256xf32>
      %c0_48 = arith.constant 0 : index
      %c0_49 = arith.constant 0 : index
      %76 = vector.load %arg8[%c0_48, %c0_49] : memref<1x256xf32, #tpu.memory_space<vmem>>, vector<1x256xf32>
      %77 = vector.broadcast %76 : vector<1x256xf32> to vector<128x256xf32>
      %78 = arith.addf %75, %77 : vector<128x256xf32>
      %79 = vector.extract_strided_slice %78 {offsets = [0, 0], sizes = [128, 128], strides = [1, 1]} : vector<128x256xf32> to vector<128x128xf32>
      %80 = arith.truncf %79 : vector<128x128xf32> to vector<128x128xbf16>
      %81 = tpu.concatenate %73, %80 in 1 : vector<128x128xbf16>, vector<128x128xbf16> -> vector<128x256xbf16>
      %c0_50 = arith.constant 0 : index
      %c0_51 = arith.constant 0 : index
      %82 = vector.load %arg16[%c0_50, %c0_51] : memref<128x256xbf16, #tpu.memory_space<vmem>>, vector<128x256xbf16>
      tpu.vector_store %arg16[%c0_50, %c0_51], %81 {strides = array<i32>} : memref<128x256xbf16, #tpu.memory_space<vmem>>, vector<128x256xbf16>,
      %83 = vector.extract_strided_slice %78 {offsets = [0, 128], sizes = [128, 128], strides = [1, 1]} : vector<128x256xf32> to vector<128x128xf32>
      %84 = arith.truncf %83 : vector<128x128xf32> to vector<128x128xbf16>
      %c0_52 = arith.constant 0 : index
      %c0_53 = arith.constant 0 : index
      %85 = vector.load %arg17[%c0_52, %c0_53] : memref<128x128xbf16, #tpu.memory_space<vmem>>, vector<128x128xbf16>
      tpu.vector_store %arg17[%c0_52, %c0_53], %84 {strides = array<i32>} : memref<128x128xbf16, #tpu.memory_space<vmem>>, vector<128x128xbf16>,
    } else {
    }
    %c0 = arith.constant 0 : index
    %c0_1 = arith.constant 0 : index
    %3 = vector.load %arg2[%c0, %c0_1] : memref<256x1xi32, #tpu.memory_space<vmem>>, vector<256x1xi32>
    %c0_2 = arith.constant 0 : index
    %c0_3 = arith.constant 0 : index
    %4 = vector.load %arg3[%c0_2, %c0_3] : memref<256x1xi32, #tpu.memory_space<vmem>>, vector<256x1xi32>
    %c0_4 = arith.constant 0 : index
    %c0_5 = arith.constant 0 : index
    %c0_6 = arith.constant 0 : index
    %5 = vector.load %arg4[%c0_4, %c0_5, %c0_6] : memref<1x1x256xi32, #tpu.memory_space<vmem>>, vector<1x1x256xi32>
    %6 = vector.shape_cast %5 : vector<1x1x256xi32> to vector<1x256xi32>
    %7 = tpu.iota {dimensions = array<i32: 1>} : vector<256x128xi32>
    %8 = vector.broadcast %3 : vector<256x1xi32> to vector<256x128xi32>
    %9 = arith.cmpi eq, %7, %8 : vector<256x128xi32>
    %10 = arith.extui %9 : vector<256x128xi1> to vector<256x128xi32>
    %11 = arith.sitofp %10 : vector<256x128xi32> to vector<256x128xf32>
    %12 = arith.truncf %11 : vector<256x128xf32> to vector<256x128xbf16>
    %13 = vector.broadcast %4 : vector<256x1xi32> to vector<256x128xi32>
    %14 = arith.cmpi eq, %7, %13 : vector<256x128xi32>
    %15 = arith.extui %14 : vector<256x128xi1> to vector<256x128xi32>
    %16 = arith.sitofp %15 : vector<256x128xi32> to vector<256x128xf32>
    %17 = arith.truncf %16 : vector<256x128xf32> to vector<256x128xbf16>
    %18 = tpu.iota {dimensions = array<i32: 0>} : vector<128x256xi32>
    %19 = vector.broadcast %6 : vector<1x256xi32> to vector<128x256xi32>
    %20 = arith.cmpi eq, %18, %19 : vector<128x256xi32>
    %21 = arith.extui %20 : vector<128x256xi1> to vector<128x256xi32>
    %22 = arith.sitofp %21 : vector<128x256xi32> to vector<128x256xf32>
    %23 = arith.truncf %22 : vector<128x256xf32> to vector<128x256xbf16>
    %c0_7 = arith.constant 0 : index
    %c0_8 = arith.constant 0 : index
    %24 = vector.load %arg16[%c0_7, %c0_8] : memref<128x256xbf16, #tpu.memory_space<vmem>>, vector<128x256xbf16>
    %cst = arith.constant dense<0.000000e+00> : vector<256x256xf32>
    %25 = tpu.matmul %12, %24, %cst {dimension_numbers = #tpu.dot_dimension_numbers<[1], [0], [0], [1], [0, 0, 1, 1], [], []>} : vector<256x128xbf16>, vector<128x256xbf16>, vector<256x256xf32> -> vector<256x256xf32>
    %26 = vector.extract_strided_slice %25 {offsets = [0, 0], sizes = [256, 128], strides = [1, 1]} : vector<256x256xf32> to vector<256x128xf32>
    %27 = vector.extract_strided_slice %25 {offsets = [0, 128], sizes = [256, 128], strides = [1, 1]} : vector<256x256xf32> to vector<256x128xf32>
    %c0_9 = arith.constant 0 : index
    %c0_10 = arith.constant 0 : index
    %28 = vector.load %arg17[%c0_9, %c0_10] : memref<128x128xbf16, #tpu.memory_space<vmem>>, vector<128x128xbf16>
    %cst_11 = arith.constant dense<0.000000e+00> : vector<256x128xf32>
    %29 = tpu.matmul %17, %28, %cst_11 {dimension_numbers = #tpu.dot_dimension_numbers<[1], [0], [0], [1], [0, 0, 1, 1], [], []>} : vector<256x128xbf16>, vector<128x128xbf16>, vector<256x128xf32> -> vector<256x128xf32>
    %c0_12 = arith.constant 0 : index
    %c0_13 = arith.constant 0 : index
    %30 = vector.load %arg5[%c0_12, %c0_13] : memref<256x32xbf16, #tpu.memory_space<vmem>>, vector<256x32xbf16>
    %31 = arith.extf %30 : vector<256x32xbf16> to vector<256x32xf32>
    %32 = vector.extract_strided_slice %27 {offsets = [0, 0], sizes = [256, 32], strides = [1, 1]} : vector<256x128xf32> to vector<256x32xf32>
    %33 = arith.addf %31, %32 : vector<256x32xf32>
    %34 = vector.extract_strided_slice %29 {offsets = [0, 0], sizes = [256, 32], strides = [1, 1]} : vector<256x128xf32> to vector<256x32xf32>
    %35 = arith.addf %33, %34 : vector<256x32xf32>
    %cst_14 = arith.constant 0.000000e+00 : f32
    %36 = vector.broadcast %cst_14 : f32 to vector<256x32xf32>
    %37 = arith.maximumf %35, %36 : vector<256x32xf32>
    %38 = arith.truncf %37 : vector<256x32xf32> to vector<256x32xbf16>
    %c0_15 = arith.constant 0 : index
    %c0_16 = arith.constant 0 : index
    %39 = vector.load %arg9[%c0_15, %c0_16] : memref<128x128xbf16, #tpu.memory_space<vmem>>, vector<32x128xbf16>
    %cst_17 = arith.constant dense<0.000000e+00> : vector<256x128xf32>
    %40 = tpu.matmul %38, %39, %cst_17 {dimension_numbers = #tpu.dot_dimension_numbers<[1], [0], [0], [1], [0, 0, 1, 1], [], []>} : vector<256x32xbf16>, vector<32x128xbf16>, vector<256x128xf32> -> vector<256x128xf32>
    %c0_18 = arith.constant 0 : index
    %c0_19 = arith.constant 0 : index
    %41 = vector.load %arg10[%c0_18, %c0_19] : memref<1x128xf32, #tpu.memory_space<vmem>>, vector<1x128xf32>
    %42 = vector.broadcast %41 : vector<1x128xf32> to vector<256x128xf32>
    %43 = arith.addf %40, %42 : vector<256x128xf32>
    %cst_20 = arith.constant 0.000000e+00 : f32
    %44 = vector.broadcast %cst_20 : f32 to vector<256x128xf32>
    %45 = arith.maximumf %43, %44 : vector<256x128xf32>
    %46 = arith.truncf %45 : vector<256x128xf32> to vector<256x128xbf16>
    %c0_21 = arith.constant 0 : index
    %c0_22 = arith.constant 0 : index
    %47 = vector.load %arg11[%c0_21, %c0_22] : memref<128x128xbf16, #tpu.memory_space<vmem>>, vector<128x128xbf16>
    %cst_23 = arith.constant dense<0.000000e+00> : vector<256x128xf32>
    %48 = tpu.matmul %46, %47, %cst_23 {dimension_numbers = #tpu.dot_dimension_numbers<[1], [0], [0], [1], [0, 0, 1, 1], [], []>} : vector<256x128xbf16>, vector<128x128xbf16>, vector<256x128xf32> -> vector<256x128xf32>
    %c0_24 = arith.constant 0 : index
    %c0_25 = arith.constant 0 : index
    %49 = vector.load %arg12[%c0_24, %c0_25] : memref<1x128xf32, #tpu.memory_space<vmem>>, vector<1x128xf32>
    %50 = vector.broadcast %49 : vector<1x128xf32> to vector<256x128xf32>
    %51 = arith.addf %48, %50 : vector<256x128xf32>
    %cst_26 = arith.constant 0.000000e+00 : f32
    %52 = vector.broadcast %cst_26 : f32 to vector<256x128xf32>
    %53 = arith.maximumf %51, %52 : vector<256x128xf32>
    %54 = arith.truncf %53 : vector<256x128xf32> to vector<256x128xbf16>
    %c0_27 = arith.constant 0 : index
    %c0_28 = arith.constant 0 : index
    %55 = vector.load %arg13[%c0_27, %c0_28] : memref<128x128xbf16, #tpu.memory_space<vmem>>, vector<128x128xbf16>
    %cst_29 = arith.constant dense<0.000000e+00> : vector<256x128xf32>
    %56 = tpu.matmul %54, %55, %cst_29 {dimension_numbers = #tpu.dot_dimension_numbers<[1], [0], [0], [1], [0, 0, 1, 1], [], []>} : vector<256x128xbf16>, vector<128x128xbf16>, vector<256x128xf32> -> vector<256x128xf32>
    %c0_30 = arith.constant 0 : index
    %c0_31 = arith.constant 0 : index
    %57 = vector.load %arg14[%c0_30, %c0_31] : memref<1x128xf32, #tpu.memory_space<vmem>>, vector<1x128xf32>
    %58 = vector.broadcast %57 : vector<1x128xf32> to vector<256x128xf32>
    %59 = arith.addf %56, %58 : vector<256x128xf32>
    %60 = arith.mulf %26, %59 : vector<256x128xf32>
    %61 = arith.truncf %60 : vector<256x128xf32> to vector<256x128xbf16>
    %c0_32 = arith.constant 0 : index
    %c0_33 = arith.constant 0 : index
    %c0_34 = arith.constant 0 : index
    %62 = vector.load %arg15[%c0_32, %c0_33, %c0_34] : memref<1x128x128xf32, #tpu.memory_space<vmem>>, vector<1x128x128xf32>
    %63 = vector.shape_cast %62 : vector<1x128x128xf32> to vector<128x128xf32>
    %cst_35 = arith.constant dense<0.000000e+00> : vector<128x128xf32>
    %64 = tpu.matmul %23, %61, %cst_35 {dimension_numbers = #tpu.dot_dimension_numbers<[1], [0], [0], [1], [0, 0, 1, 1], [], []>} : vector<128x256xbf16>, vector<256x128xbf16>, vector<128x128xf32> -> vector<128x128xf32>
    %65 = arith.addf %63, %64 : vector<128x128xf32>
    %c0_36 = arith.constant 0 : index
    %c0_37 = arith.constant 0 : index
    %c0_38 = arith.constant 0 : index
    %66 = vector.load %arg15[%c0_36, %c0_37, %c0_38] : memref<1x128x128xf32, #tpu.memory_space<vmem>>, vector<1x128x128xf32>
    %67 = vector.shape_cast %66 : vector<1x128x128xf32> to vector<128x128xf32>
    %68 = vector.shape_cast %65 : vector<128x128xf32> to vector<1x128x128xf32>
    tpu.vector_store %arg15[%c0_36, %c0_37, %c0_38], %68 {strides = array<i32>} : memref<1x128x128xf32, #tpu.memory_space<vmem>>, vector<1x128x128xf32>,
    return
  }
  func.func @transform_0(%arg0: i32, %arg1: i32) -> (i32, i32) {
    %c2_i32 = arith.constant 2 : i32
    %0 = arith.muli %arg0, %c2_i32 : i32
    %1 = arith.addi %0, %arg1 : i32
    %c0_i32 = arith.constant 0 : i32
    %c0_i32_0 = arith.constant 0 : i32
    return %1, %c0_i32 : i32, i32
  }
  func.func @transform_1(%arg0: i32, %arg1: i32) -> (i32, i32) {
    %c2_i32 = arith.constant 2 : i32
    %0 = arith.muli %arg0, %c2_i32 : i32
    %1 = arith.addi %0, %arg1 : i32
    %c0_i32 = arith.constant 0 : i32
    %c0_i32_0 = arith.constant 0 : i32
    return %1, %c0_i32 : i32, i32
  }
  func.func @transform_2(%arg0: i32, %arg1: i32) -> (i32, i32, i32) {
    %c2_i32 = arith.constant 2 : i32
    %0 = arith.muli %arg0, %c2_i32 : i32
    %1 = arith.addi %0, %arg1 : i32
    %c0_i32 = arith.constant 0 : i32
    %c0_i32_0 = arith.constant 0 : i32
    %c0_i32_1 = arith.constant 0 : i32
    return %1, %c0_i32, %c0_i32_0 : i32, i32, i32
  }
  func.func @transform_3(%arg0: i32, %arg1: i32) -> (i32, i32) {
    %c2_i32 = arith.constant 2 : i32
    %0 = arith.muli %arg0, %c2_i32 : i32
    %1 = arith.addi %0, %arg1 : i32
    %c0_i32 = arith.constant 0 : i32
    %c0_i32_0 = arith.constant 0 : i32
    return %1, %c0_i32 : i32, i32
  }
  func.func @transform_4(%arg0: i32, %arg1: i32) -> (i32, i32) {
    %c0_i32 = arith.constant 0 : i32
    %c0_i32_0 = arith.constant 0 : i32
    %c0_i32_1 = arith.constant 0 : i32
    return %c0_i32, %c0_i32_0 : i32, i32
  }
  func.func @transform_5(%arg0: i32, %arg1: i32) -> (i32, i32) {
    %c0_i32 = arith.constant 0 : i32
    %c0_i32_0 = arith.constant 0 : i32
    %c0_i32_1 = arith.constant 0 : i32
    return %c0_i32, %c0_i32_0 : i32, i32
  }
  func.func @transform_6(%arg0: i32, %arg1: i32) -> (i32, i32) {
    %c0_i32 = arith.constant 0 : i32
    %c0_i32_0 = arith.constant 0 : i32
    %c0_i32_1 = arith.constant 0 : i32
    return %c0_i32, %c0_i32_0 : i32, i32
  }
  func.func @transform_7(%arg0: i32, %arg1: i32) -> (i32, i32) {
    %c0_i32 = arith.constant 0 : i32
    %c0_i32_0 = arith.constant 0 : i32
    %c0_i32_1 = arith.constant 0 : i32
    return %c0_i32, %c0_i32_0 : i32, i32
  }
  func.func @transform_8(%arg0: i32, %arg1: i32) -> (i32, i32) {
    %c0_i32 = arith.constant 0 : i32
    %c0_i32_0 = arith.constant 0 : i32
    %c0_i32_1 = arith.constant 0 : i32
    return %c0_i32, %c0_i32_0 : i32, i32
  }
  func.func @transform_9(%arg0: i32, %arg1: i32) -> (i32, i32) {
    %c0_i32 = arith.constant 0 : i32
    %c0_i32_0 = arith.constant 0 : i32
    %c0_i32_1 = arith.constant 0 : i32
    return %c0_i32, %c0_i32_0 : i32, i32
  }
  func.func @transform_10(%arg0: i32, %arg1: i32) -> (i32, i32) {
    %c0_i32 = arith.constant 0 : i32
    %c0_i32_0 = arith.constant 0 : i32
    %c0_i32_1 = arith.constant 0 : i32
    return %c0_i32, %c0_i32_0 : i32, i32
  }
  func.func @transform_11(%arg0: i32, %arg1: i32) -> (i32, i32) {
    %c0_i32 = arith.constant 0 : i32
    %c0_i32_0 = arith.constant 0 : i32
    %c0_i32_1 = arith.constant 0 : i32
    return %c0_i32, %c0_i32_0 : i32, i32
  }
  func.func @transform_12(%arg0: i32, %arg1: i32) -> (i32, i32) {
    %c0_i32 = arith.constant 0 : i32
    %c0_i32_0 = arith.constant 0 : i32
    %c0_i32_1 = arith.constant 0 : i32
    return %c0_i32, %c0_i32_0 : i32, i32
  }
  func.func @transform_13(%arg0: i32, %arg1: i32) -> (i32, i32, i32) {
    %c0_i32 = arith.constant 0 : i32
    %c0_i32_0 = arith.constant 0 : i32
    %c0_i32_1 = arith.constant 0 : i32
    return %arg0, %c0_i32, %c0_i32_0 : i32, i32, i32
  }
}

</mosaic_0001>

<bundles_post_ra>
// kernel: tpu_custom_call.1
= control target key start
LH: loop header
LB: loop body
LE: loop exit
PB: predicated region body
PF: predicated region fallthrough
CT: control target
= control target key end

     0   :  { %s5286_s0 = inlined_call_operand.vmem [shape: s32[1024,1], index: 0, kind: input, shape index: {}]   ;;  %s5287_s1 = inlined_call_operand.vmem [shape: s32[1024,1], index: 1, kind: input, shape index: {}]   ;;  %s5288_s2 = inlined_call_operand.vmem [shape: s32[4,1,256], index: 2, kind: input, shape index: {}]   ;;  %s5289_s3 = inlined_call_operand.vmem [shape: bf16[1024,32], index: 3, kind: input, shape index: {}]   ;;  %s5290_s4 = inlined_call_operand.vmem [shape: bf16[128,128], index: 4, kind: input, shape index: {}]   ;;  %s5291_s5 = inlined_call_operand.vmem [shape: bf16[128,256], index: 5, kind: input, shape index: {}]   ;;  %s5292_s6 = inlined_call_operand.vmem [shape: f32[1,256], index: 6, kind: input, shape index: {}]   ;;  %s5293_s7 = inlined_call_operand.vmem [shape: bf16[128,128], index: 7, kind: input, shape index: {}]   ;;  %s5294_s8 = inlined_call_operand.vmem [shape: f32[1,128], index: 8, kind: input, shape index: {}]   ;;  %s5295_s9 = inlined_call_operand.vmem [shape: bf16[128,128], index: 9, kind: input, shape index: {}]   ;;  %s5296_s10 = inlined_call_operand.vmem [shape: f32[1,128], index: 10, kind: input, shape index: {}]   ;;  %s5297_s11 = inlined_call_operand.vmem [shape: bf16[128,128], index: 11, kind: input, shape index: {}]   ;;  %s5298_s12 = inlined_call_operand.vmem [shape: f32[1,128], index: 12, kind: input, shape index: {}]   ;;  %s5299_s13 = inlined_call_operand.hbm [shape: f32[2,128,128], index: 13, kind: output, shape index: {}]  }
   0x1   :  { %5314 = sst [smem:[#allocation19_spill]] %s5298_s12 }
   0x2   :  { %5315 = sst [smem:[#allocation20_spill]] %s5299_s13 }
   0x3   :  { %18 = vsyncpa [#allocation5], 0 }
   0x4   :  { %20 = vsyncpa [#allocation5 + $0x1], 0  ;;  %s4093_s25 = smov 0   ;;  %s4095_s26 = smov 0  }
   0x5   :  { %s4097_s27 = smov 0   ;;  %s4099_s28 = smov 0  }
   0x6   :  { %s4101_s29 = smov 0   ;;  %s4103_s30 = smov 0  }
   0x7   :  { %s4105_s14 = smov 0   ;;  %s4107_s15 = smov 0  }
   0x8 LB: > { %5316 = sst [smem:[#allocation7_spill]] %s3988_s25  ;;  %s3087_s16 = sadd.s32 4294967295, %s4016_s15   ;;  %s4016_s15 = sphi %s4107_s15, %s26_s15   ;;  %s4012_s14 = sphi %s4105_s14, %s5377_s14   ;;  %s4008_s30 = sphi %s4103_s30, %s5376_s30   ;;  %s4004_s29 = sphi %s4101_s29, %s5375_s29   ;;  %s4000_s28 = sphi %s4099_s28, %s5374_s28   ;;  %s3996_s27 = sphi %s4097_s27, %s5373_s27   ;;  %s3992_s26 = sphi %s4095_s26, %s5372_s26   ;;  %s3988_s25 = sphi %s4093_s25, %s5371_s25  }
   0x9   : > { %5317 = sst [smem:[#allocation8_spill]] %s3992_s26  ;;  %s3088_s17 = sadd.s32 4294967294, %s4016_s15  }
   0xa   : > { %5318 = sst [smem:[#allocation9_spill]] %s3996_s27  ;;  %s35_s18 = sadd.s32 1, %s4008_s30 }
   0xb   : > { %5319 = sst [smem:[#allocation10_spill]] %s4004_s29  ;;  %p36_p0 = scmp.ge.s32.totalorder %s35_s18, 2 }
   0xc   : > { %5320 = sst [smem:[#allocation11_spill]] %s4008_s30  ;;  %s38_s19 = sadd.s32 1, %s4012_s14 }
   0xd   : > { %5321 = sst [smem:[#allocation12_spill]] %s4012_s14  ;;  %p364_p1 = scmp.ne.s32.totalorder %s3996_s27, %s3992_s26 }
   0xe   : > { %5322 = sst [smem:[#allocation13_spill]] %s4016_s15  ;;  %p365_p2 = scmp.eq.s32.totalorder %s3087_s16, 3 }
   0xf   : > { %s5379_s18 = smov (%p36_p0, %s35_s18), 0  ;;  %s5381_s19 = smov (!%p36_p0, %s38_s19), %s4012_s14 }
  0x10   : > { %5323 = sst [smem:[#allocation14_spill]] %s5379_s18  ;;  %p4142_p3 = por %p365_p2, %p364_p1 }
  0x11   : > { %p370_p4 = scmp.ne.s32.totalorder %s3992_s26, %s3988_s25  ;;  %p40_p5 = scmp.ge.s32.totalorder %s5381_s19, 2 }
  0x12   : > { %s5324_s20 = scalar_select %p4142_p3, 1, 0 }
  0x13   : > { %p371_p6 = scmp.eq.s32.totalorder %s3088_s17, 3  ;;  %p3099_p7 = scmp.ge.s32.totalorder %s4016_s15, 1 }
  0x14   : > { %5325 = sst [smem:[#allocation15_spill]] %s5324_s20  ;;  %p466_p8 = scmp.lt.s32.totalorder %s4016_s15, 5 }
  0x15   : > { %s5383_s19 = smov (%p40_p5, %s5381_s19), 0  ;;  %p4152_p9 = por %p371_p6, %p370_p4 }
  0x16   : > { %5326 = sst [smem:[#allocation16_spill]] %s5383_s19  ;;  %p467_p10 = pnand %p3099_p7, %p466_p8 }
  0x17   : > { %s5327_s21 = scalar_select %p4152_p9, 1, 0 }
  0x18   : > { %s351_s22 = ssub.s32 %s4012_s14, %s5383_s19  ;;  %s354_s23 = sadd.s32 1, %s3996_s27 }
  0x19   : > { %5328 = sst [smem:[#allocation17_spill]] %s5327_s21  ;;  %p352_p11 = scmp.eq.s32.totalorder %s351_s22, 0 }
  0x1a   : > { %470 = sbr.rel (%p467_p10) target bundleno = 1680 (0x690), region = 72  ;;  %s5310_s16 = sand.u32 (!%p467_p10), 1, %s3992_s26  }
  0x1b   : > { %s4160_s24 = scalar_select %p352_p11, %s3996_s27, %s354_s23  }
  0x1c   : > { %s3101_s17 = sshll.u32 (!%p467_p10), %s4004_s29, 1  ;;  %s3100_s18 = sshll.u32 (!%p467_p10), %s5310_s16, 7 }
  0x1d   : > { %5329 = sst [smem:[#allocation18_spill]] %s4160_s24  ;;  %s533_s30 = sadd.s32 (!%p467_p10), %s4000_s28, %s3101_s17 }
  0x1e   : > { %s3102_s25 = sshll.u32 (!%p467_p10), %s533_s30, 5  ;;  %p554_p13 = scmp.lt.s32.totalorder (!%p467_p10), %s533_s30, 3 }
  0x1f   : > { %p535_p12 = scmp.lt.s32.totalorder %s3102_s25, 127  ;;  %s4187_s12 = scalar_lea.vmem [#allocation4], %s3100_s18 }
  0x20   : > { %s5387_s30 = smov (!%p554_p13, %s533_s30), 3  ;;  %p3112_p0 = scmp.ne.s32.totalorder %s4000_s28, 0 }
  0x21   : > { %s5385_s25 = smov (!%p535_p12, %s3102_s25), 127  ;;  %s3108_s20 = sshll.u32 %s5387_s30, 1 }
  0x22   : > { %s3103_s19 = sshll.u32 %s5385_s25, 3  ;;  %s3111_s14 = sshll.u32 %s5385_s25, 2 }
  0x23   : > { %s4170_s24 = scalar_lea.vmem %s5286_s0, %s3103_s19  ;;  %s4175_s15 = scalar_lea.vmem %s5287_s1, %s3103_s19 }
  0x24   : > { %s4180_s13 = scalar_lea.vmem %s5289_s3, %s3111_s14  ;;  %s4185_s25 = scalar_lea.vmem %s5288_s2, %s3108_s20 }
  0x25   : > { %574 = sbr.rel (%p3112_p0) target bundleno = 273 (0x111), region = 76 }
  0x2a   : > { %v3171_v0 = vld [vmem:[%s5291_s5 + $0x70] sm:$0xf]  ;;  %v3605_v1 = vld [vmem:[%s5291_s5 + $0x74] sm:$0xf0]  ;;  %v4018_v2 = vmov 0.0   ;;  %v3650_v49 = vld [vmem:[%s5290_s4] sm:$0xff]  }
  0x2b   : > { %575 = vst [vmem:[%s4187_s12] sm:$0xff] %v4018_v2  ;;  %v3172_v3 = vor.u32 %v3605_v1, %v3171_v0  ;;  %v3604_v4 = vld [vmem:[%s5291_s5 + $0x74] sm:$0xf]  ;;  %v3173_v5 = vld [vmem:[%s5291_s5 + $0x78] sm:$0xf0]  ;;  %v3163_v6 = vld [vmem:[%s5291_s5 + $0x60] sm:$0xf]  ;;  %v3651_v62 = vunpack.c.l.b16 %v3650_v49 }
  0x2c   : > { %576 = vst [vmem:[%s4187_s12 + $0x8] sm:$0xff] %v4018_v2  ;;  %v3176_v7 = vor.u32 %v3604_v4, %v3173_v5  ;;  %v3603_v8 = vld [vmem:[%s5291_s5 + $0x64] sm:$0xf0]  ;;  %v3602_v9 = vld [vmem:[%s5291_s5 + $0x64] sm:$0xf]  ;;  %v4329_v53 = vld [vmem:[%s5290_s4 + $0x10] sm:$0xff]  }
  0x2d   : > { %577 = vst [vmem:[%s4187_s12 + $0x10] sm:$0xff] %v4018_v2  ;;  %757 = vmatpush.bf16.msra.mxu0 %v3172_v3  ;;  %3814 = vmatpush.bf16.msra.mxu2 %v3172_v3  ;;  %v3164_v10 = vor.u32 %v3603_v8, %v3163_v6  ;;  %v3165_v11 = vld [vmem:[%s5291_s5 + $0x68] sm:$0xf0]  ;;  %v3155_v13 = vld [vmem:[%s5291_s5 + $0x50] sm:$0xf]  ;;  %v4308_v50 = vld [vmem:[%s5290_s4 + $0x20] sm:$0xff]  }
  0x2e   : > { %578 = vst [vmem:[%s4187_s12 + $0x18] sm:$0xff] %v4018_v2  ;;  %3822 = vmatpush.bf16.msra.mxu3 %v3176_v7  ;;  %806 = vmatpush.bf16.msra.mxu1 %v3176_v7  ;;  %v3168_v12 = vor.u32 %v3602_v9, %v3165_v11  ;;  %v3601_v14 = vld [vmem:[%s5291_s5 + $0x54] sm:$0xf0]  ;;  %v3600_v15 = vld [vmem:[%s5291_s5 + $0x54] sm:$0xf]  ;;  %v4315_v51 = vld [vmem:[%s5290_s4 + $0x8] sm:$0xff]   ;;  %v3667_v8 = vunpack.c.l.b16 %v4308_v50 }
  0x2f   : > { %579 = vst [vmem:[%s4187_s12 + $0x20] sm:$0xff] %v4018_v2  ;;  %v3157_v16 = vld [vmem:[%s5291_s5 + $0x58] sm:$0xf0]  ;;  %v3156_v17 = vor.u32 %v3601_v14, %v3155_v13  ;;  %v3147_v19 = vld [vmem:[%s5291_s5 + $0x40] sm:$0xf]  ;;  %v4320_v52 = vld [vmem:[%s5290_s4 + $0x28] sm:$0xff]   ;;  %v3652_v14 = vunpack.c.h.b16 %v3650_v49 }
  0x30   : > { %580 = vst [vmem:[%s4187_s12 + $0x28] sm:$0xff] %v4018_v2  ;;  %v3160_v18 = vor.u32 %v3600_v15, %v3157_v16  ;;  %v3599_v20 = vld [vmem:[%s5291_s5 + $0x44] sm:$0xf0]  ;;  %v3598_v21 = vld [vmem:[%s5291_s5 + $0x44] sm:$0xf]  ;;  %v4334_v54 = vld [vmem:[%s5290_s4 + $0x30] sm:$0xff]  }
  0x31   : > { %581 = vst [vmem:[%s4187_s12 + $0x30] sm:$0xff] %v4018_v2  ;;  %758 = vmatpush.bf16.msra.mxu0 %v3164_v10  ;;  %3815 = vmatpush.bf16.msra.mxu2 %v3164_v10  ;;  %v3149_v22 = vld [vmem:[%s5291_s5 + $0x48] sm:$0xf0]  ;;  %v3148_v23 = vor.u32 %v3599_v20, %v3147_v19  ;;  %v3139_v25 = vld [vmem:[%s5291_s5 + $0x30] sm:$0xf]  ;;  %v4343_v55 = vld [vmem:[%s5290_s4 + $0x18] sm:$0xff]  }
  0x32   : > { %582 = vst [vmem:[%s4187_s12 + $0x38] sm:$0xff] %v4018_v2  ;;  %3823 = vmatpush.bf16.msra.mxu3 %v3168_v12  ;;  %807 = vmatpush.bf16.msra.mxu1 %v3168_v12  ;;  %v3152_v24 = vor.u32 %v3598_v21, %v3149_v22  ;;  %v3597_v26 = vld [vmem:[%s5291_s5 + $0x34] sm:$0xf0]  ;;  %v3596_v27 = vld [vmem:[%s5291_s5 + $0x34] sm:$0xf] }
  0x33   : > { %583 = vst [vmem:[%s4187_s12 + $0x40] sm:$0xff] %v4018_v2  ;;  %v3141_v28 = vld [vmem:[%s5291_s5 + $0x38] sm:$0xf0]  ;;  %v3140_v29 = vor.u32 %v3597_v26, %v3139_v25  ;;  %v3131_v31 = vld [vmem:[%s5291_s5 + $0x20] sm:$0xf]  ;;  %v3668_v26 = vunpack.c.h.b16 %v4308_v50 }
  0x34   : > { %584 = vst [vmem:[%s4187_s12 + $0x48] sm:$0xff] %v4018_v2  ;;  %v3144_v30 = vor.u32 %v3596_v27, %v3141_v28  ;;  %v3595_v32 = vld [vmem:[%s5291_s5 + $0x24] sm:$0xf0]  ;;  %v3594_v33 = vld [vmem:[%s5291_s5 + $0x24] sm:$0xf]  ;;  %v4348_v56 = vld [vmem:[%s5290_s4 + $0x38] sm:$0xff]  }
  0x35   : > { %585 = vst [vmem:[%s4187_s12 + $0x50] sm:$0xff] %v4018_v2  ;;  %759 = vmatpush.bf16.msra.mxu0 %v3156_v17  ;;  %3816 = vmatpush.bf16.msra.mxu2 %v3156_v17  ;;  %v3133_v34 = vld [vmem:[%s5291_s5 + $0x28] sm:$0xf0]  ;;  %v3132_v35 = vor.u32 %v3595_v32, %v3131_v31  ;;  %v3123_v37 = vld [vmem:[%s5291_s5 + $0x10] sm:$0xf]  ;;  %v3655_v32 = vunpack.c.l.b16 %v4315_v51 }
  0x36   : > { %586 = vst [vmem:[%s4187_s12 + $0x58] sm:$0xff] %v4018_v2  ;;  %3824 = vmatpush.bf16.msra.mxu3 %v3160_v18  ;;  %808 = vmatpush.bf16.msra.mxu1 %v3160_v18  ;;  %v3136_v36 = vor.u32 %v3594_v33, %v3133_v34  ;;  %v3593_v38 = vld [vmem:[%s5291_s5 + $0x14] sm:$0xf0]  ;;  %v3592_v39 = vld [vmem:[%s5291_s5 + $0x14] sm:$0xf] }
  0x37   : > { %587 = vst [vmem:[%s4187_s12 + $0x60] sm:$0xff] %v4018_v2  ;;  %v3125_v40 = vld [vmem:[%s5291_s5 + $0x18] sm:$0xf0]  ;;  %v3124_v41 = vor.u32 %v3593_v38, %v3123_v37  ;;  %v3115_v43 = vld [vmem:[%s5291_s5] sm:$0xf] }
  0x38   : > { %588 = vst [vmem:[%s4187_s12 + $0x68] sm:$0xff] %v4018_v2  ;;  %v3128_v42 = vor.u32 %v3592_v39, %v3125_v40  ;;  %v3591_v44 = vld [vmem:[%s5291_s5 + $0x4] sm:$0xf0]  ;;  %v3590_v45 = vld [vmem:[%s5291_s5 + $0x4] sm:$0xf] }
  0x39   : > { %589 = vst [vmem:[%s4187_s12 + $0x70] sm:$0xff] %v4018_v2  ;;  %760 = vmatpush.bf16.msra.mxu0 %v3148_v23  ;;  %3817 = vmatpush.bf16.msra.mxu2 %v3148_v23  ;;  %v3117_v46 = vld [vmem:[%s5291_s5 + $0x8] sm:$0xf0]  ;;  %v3116_v47 = vor.u32 %v3591_v44, %v3115_v43  ;;  %v623_v57 = vld [vmem:[%s5292_s6] sm:$0x3] }
  0x3a   : > { %590 = vst [vmem:[%s4187_s12 + $0x78] sm:$0xff] %v4018_v2  ;;  %3825 = vmatpush.bf16.msra.mxu3 %v3152_v24  ;;  %809 = vmatpush.bf16.msra.mxu1 %v3152_v24  ;;  %v3120_v48 = vor.u32 %v3590_v45, %v3117_v46  ;;  %v4357_v58 = vperm.slane %v623_v57, 0  ;;  %v4360_v0 = vperm.slane %v623_v57, 1 }
  0x3d   : > { %761 = vmatpush.bf16.msra.mxu0 %v3140_v29  ;;  %3818 = vmatpush.bf16.msra.mxu2 %v3140_v29 }
  0x3e   : > { %3826 = vmatpush.bf16.msra.mxu3 %v3144_v30  ;;  %810 = vmatpush.bf16.msra.mxu1 %v3144_v30 }
  0x41   : > { %762 = vmatpush.bf16.msra.mxu0 %v3132_v35  ;;  %3819 = vmatpush.bf16.msra.mxu2 %v3132_v35 }
  0x42   : > { %3827 = vmatpush.bf16.msra.mxu3 %v3136_v36  ;;  %811 = vmatpush.bf16.msra.mxu1 %v3136_v36 }
  0x45   : > { %763 = vmatpush.bf16.msra.mxu0 %v3124_v41  ;;  %3820 = vmatpush.bf16.msra.mxu2 %v3124_v41 }
  0x46   : > { %3828 = vmatpush.bf16.msra.mxu3 %v3128_v42  ;;  %812 = vmatpush.bf16.msra.mxu1 %v3128_v42  ;;  %v3671_v42 = vunpack.c.l.b16 %v4320_v52 }
  0x49   : > { %764 = vmatpush.bf16.msra.mxu0 %v3116_v47  ;;  %3821 = vmatpush.bf16.msra.mxu2 %v3116_v47 }
  0x4a   : > { %3829 = vmatpush.bf16.msra.mxu3 %v3120_v48  ;;  %813 = vmatpush.bf16.msra.mxu1 %v3120_v48  ;;  %v3656_v48 = vunpack.c.h.b16 %v4315_v51 }
  0x4c   : > { %765 = vmatmul.bf16.vlgmr.msra.gmra.mxu0 %v3650_v49  ;;  %785 = vmatmul.bf16.vlgmr.msra.gmra.mxu2 %v4308_v50 }
  0x4d   : > { %834 = vmatmul.bf16.vlgmr.msra.gmra.mxu3 %v4308_v50  ;;  %814 = vmatmul.bf16.vlgmr.msra.gmra.mxu1 %v3650_v49 }
  0x5c   : > { %770 = vmatmul.bf16.gmra.mxu0 %v4315_v51  ;;  %790 = vmatmul.bf16.gmra.mxu2 %v4320_v52 }
  0x5d   : > { %839 = vmatmul.bf16.gmra.mxu3 %v4320_v52  ;;  %819 = vmatmul.bf16.gmra.mxu1 %v4315_v51 }
  0x6c   : > { %775 = vmatmul.bf16.gmra.mxu0 %v4329_v53  ;;  %795 = vmatmul.bf16.gmra.mxu2 %v4334_v54 }
  0x6d   : > { %844 = vmatmul.bf16.gmra.mxu3 %v4334_v54  ;;  %824 = vmatmul.bf16.gmra.mxu1 %v4329_v53 }
  0x7c   : > { %780 = vmatmul.bf16.gmra.mxu0 %v4343_v55  ;;  %800 = vmatmul.bf16.gmra.mxu2 %v4348_v56 }
  0x7d   : > { %849 = vmatmul.bf16.gmra.mxu3 %v4348_v56  ;;  %829 = vmatmul.bf16.gmra.mxu1 %v4343_v55 }
  0xc9   : > { %v766_v59 = vpop.f32.mrf.mxu0 }
  0xca   : > { %v767_v60 = vadd.f32 %v766_v59, %v4357_v58  ;;  %v815_v61 = vpop.f32.mrf.mxu1 }
  0xcb   : > { %v816_v6 = vadd.f32 %v815_v61, %v4360_v0 }
  0xcc   : > { %v855_v63 = vpack.c.bf16 %v767_v60, %v767_v60 }
  0xce   : > { %v887_v1 = vunpack.c.l.b16 %v855_v63 }
  0xcf   : > { %v786_v2 = vpop.f32.mrf.mxu2 }
  0xd0   : > { %v903_v3 = vpack.c.b16 %v887_v1, %v3651_v62  ;;  %v787_v4 = vadd.f32 %v786_v2, %v4357_v58  ;;  %v835_v5 = vpop.f32.mrf.mxu3 }
  0xd1   : > { %v768_v7 = vpop.f32.mrf.mxu0  ;;  %v836_v23 = vadd.f32 %v835_v5, %v4360_v0 }
  0xd2   : > { %935 = vst [vmem:[#allocation2] sm:$0xff] %v903_v3  ;;  %v863_v9 = vpack.c.bf16 %v787_v4, %v787_v4  ;;  %v769_v10 = vadd.f32 %v768_v7, %v4357_v58  ;;  %v817_v11 = vpop.f32.mrf.mxu1  ;;  %v3672_v4 = vunpack.c.h.b16 %v4320_v52 }
  0xd3   : > { %v818_v12 = vadd.f32 %v817_v11, %v4360_v0 }
  0xd4   : > { %v895_v13 = vunpack.c.l.b16 %v863_v9  ;;  %v856_v15 = vpack.c.bf16 %v769_v10, %v769_v10  ;;  %v3659_v9 = vunpack.c.l.b16 %v4329_v53 }
  0xd5   : > { %v3684_v16 = vpack.c.bf16 %v818_v12, %v816_v6 }
  0xd6   : > { %v911_v17 = vpack.c.b16 %v895_v13, %v3667_v8  ;;  %v888_v18 = vunpack.c.l.b16 %v856_v15 }
  0xd7   : > { %3685 = vst [vmem:[#allocation3 + $0x30] sm:$0xff] %v3684_v16   ;;  %v788_v19 = vpop.f32.mrf.mxu2 }
  0xd8   : > { %943 = vst [vmem:[#allocation2 + $0x40] sm:$0xff] %v911_v17  ;;  %v904_v20 = vpack.c.b16 %v888_v18, %v3652_v14  ;;  %v789_v21 = vadd.f32 %v788_v19, %v4357_v58  ;;  %v837_v22 = vpop.f32.mrf.mxu3  ;;  %v3675_v18 = vunpack.c.l.b16 %v4334_v54 }
  0xd9   : > { %v838_v24 = vadd.f32 %v837_v22, %v4360_v0  ;;  %v771_v25 = vpop.f32.mrf.mxu0 }
  0xda   : > { %936 = vst [vmem:[#allocation2 + $0x8] sm:$0xff] %v904_v20  ;;  %v864_v27 = vpack.c.bf16 %v789_v21, %v789_v21  ;;  %v772_v28 = vadd.f32 %v771_v25, %v4357_v58  ;;  %v820_v29 = vpop.f32.mrf.mxu1 }
  0xdb   : > { %v3704_v30 = vpack.c.bf16 %v838_v24, %v836_v23  ;;  %v821_v40 = vadd.f32 %v820_v29, %v4360_v0  ;;  %v3660_v24 = vunpack.c.h.b16 %v4329_v53 }
  0xdc   : > { %v896_v31 = vunpack.c.l.b16 %v864_v27  ;;  %v857_v33 = vpack.c.bf16 %v772_v28, %v772_v28 }
  0xdd   : > { %3795 = vst [vmem:[#allocation3 + $0x8] sm:$0xff] %v3704_v30  }
  0xde   : > { %v912_v34 = vpack.c.b16 %v896_v31, %v3668_v26  ;;  %v889_v35 = vunpack.c.l.b16 %v857_v33 }
  0xdf   : > { %v791_v36 = vpop.f32.mrf.mxu2 }
  0xe0   : > { %944 = vst [vmem:[#allocation2 + $0x48] sm:$0xff] %v912_v34  ;;  %v905_v37 = vpack.c.b16 %v889_v35, %v3655_v32  ;;  %v792_v38 = vadd.f32 %v791_v36, %v4357_v58  ;;  %v840_v39 = vpop.f32.mrf.mxu3  ;;  %v3676_v36 = vunpack.c.h.b16 %v4334_v54 }
  0xe1   : > { %v773_v41 = vpop.f32.mrf.mxu0  ;;  %v841_v1 = vadd.f32 %v840_v39, %v4360_v0 }
  0xe2   : > { %937 = vst [vmem:[#allocation2 + $0x10] sm:$0xff] %v905_v37  ;;  %v865_v43 = vpack.c.bf16 %v792_v38, %v792_v38  ;;  %v774_v44 = vadd.f32 %v773_v41, %v4357_v58  ;;  %v822_v45 = vpop.f32.mrf.mxu1  ;;  %v3663_v41 = vunpack.c.l.b16 %v4343_v55 }
  0xe3   : > { %v823_v46 = vadd.f32 %v822_v45, %v4360_v0 }
  0xe4   : > { %v897_v47 = vunpack.c.l.b16 %v865_v43  ;;  %v858_v49 = vpack.c.bf16 %v774_v44, %v774_v44 }
  0xe5   : > { %v3689_v50 = vpack.c.bf16 %v823_v46, %v821_v40 }
  0xe6   : > { %v913_v57 = vpack.c.b16 %v897_v47, %v3671_v42  ;;  %v890_v59 = vunpack.c.l.b16 %v858_v49 }
  0xe7   : > { %3792 = vst [vmem:[#allocation3] sm:$0xff] %v3689_v50   ;;  %v793_v60 = vpop.f32.mrf.mxu2  ;;  %v3679_v50 = vunpack.c.l.b16 %v4348_v56 }
  0xe8   : > { %945 = vst [vmem:[#allocation2 + $0x50] sm:$0xff] %v913_v57  ;;  %v906_v61 = vpack.c.b16 %v890_v59, %v3656_v48  ;;  %v794_v62 = vadd.f32 %v793_v60, %v4357_v58  ;;  %v842_v63 = vpop.f32.mrf.mxu3 }
  0xe9   : > { %v843_v2 = vadd.f32 %v842_v63, %v4360_v0  ;;  %v776_v3 = vpop.f32.mrf.mxu0  ;;  %v3664_v63 = vunpack.c.h.b16 %v4343_v55 }
  0xea   : > { %938 = vst [vmem:[#allocation2 + $0x18] sm:$0xff] %v906_v61  ;;  %v866_v51 = vpack.c.bf16 %v794_v62, %v794_v62  ;;  %v777_v5 = vadd.f32 %v776_v3, %v4357_v58  ;;  %v825_v6 = vpop.f32.mrf.mxu1 }
  0xeb   : > { %v3709_v7 = vpack.c.bf16 %v843_v2, %v841_v1  ;;  %v826_v52 = vadd.f32 %v825_v6, %v4360_v0 }
  0xec   : > { %v898_v8 = vunpack.c.l.b16 %v866_v51  ;;  %v859_v10 = vpack.c.bf16 %v777_v5, %v777_v5 }
  0xed   : > { %3796 = vst [vmem:[#allocation3 + $0x20] sm:$0xff] %v3709_v7  }
  0xee   : > { %v914_v11 = vpack.c.b16 %v898_v8, %v3672_v4  ;;  %v891_v12 = vunpack.c.l.b16 %v859_v10  ;;  %v3680_v10 = vunpack.c.h.b16 %v4348_v56 }
  0xef   : > { %v796_v13 = vpop.f32.mrf.mxu2 }
  0xf0   : > { %946 = vst [vmem:[#allocation2 + $0x58] sm:$0xff] %v914_v11  ;;  %v907_v14 = vpack.c.b16 %v891_v12, %v3659_v9  ;;  %v797_v15 = vadd.f32 %v796_v13, %v4357_v58  ;;  %v845_v16 = vpop.f32.mrf.mxu3 }
  0xf1   : > { %v778_v17 = vpop.f32.mrf.mxu0  ;;  %v846_v33 = vadd.f32 %v845_v16, %v4360_v0 }
  0xf2   : > { %939 = vst [vmem:[#allocation2 + $0x20] sm:$0xff] %v907_v14  ;;  %v867_v19 = vpack.c.bf16 %v797_v15, %v797_v15  ;;  %v779_v20 = vadd.f32 %v778_v17, %v4357_v58  ;;  %v827_v21 = vpop.f32.mrf.mxu1 }
  0xf3   : > { %v828_v22 = vadd.f32 %v827_v21, %v4360_v0 }
  0xf4   : > { %v899_v23 = vunpack.c.l.b16 %v867_v19  ;;  %v860_v25 = vpack.c.bf16 %v779_v20, %v779_v20 }
  0xf5   : > { %v3694_v26 = vpack.c.bf16 %v828_v22, %v826_v52 }
  0xf6   : > { %v915_v27 = vpack.c.b16 %v899_v23, %v3675_v18  ;;  %v892_v28 = vunpack.c.l.b16 %v860_v25 }
  0xf7   : > { %3793 = vst [vmem:[#allocation3 + $0x18] sm:$0xff] %v3694_v26   ;;  %v798_v29 = vpop.f32.mrf.mxu2 }
  0xf8   : > { %947 = vst [vmem:[#allocation2 + $0x60] sm:$0xff] %v915_v27  ;;  %v908_v30 = vpack.c.b16 %v892_v28, %v3660_v24  ;;  %v799_v31 = vadd.f32 %v798_v29, %v4357_v58  ;;  %v847_v32 = vpop.f32.mrf.mxu3 }
  0xf9   : > { %v848_v34 = vadd.f32 %v847_v32, %v4360_v0  ;;  %v781_v35 = vpop.f32.mrf.mxu0 }
  0xfa   : > { %940 = vst [vmem:[#allocation2 + $0x28] sm:$0xff] %v908_v30  ;;  %v868_v53 = vpack.c.bf16 %v799_v31, %v799_v31  ;;  %v782_v37 = vadd.f32 %v781_v35, %v4357_v58  ;;  %v830_v38 = vpop.f32.mrf.mxu1 }
  0xfb   : > { %v3714_v39 = vpack.c.bf16 %v848_v34, %v846_v33  ;;  %v831_v54 = vadd.f32 %v830_v38, %v4360_v0 }
  0xfc   : > { %v900_v40 = vunpack.c.l.b16 %v868_v53  ;;  %v861_v42 = vpack.c.bf16 %v782_v37, %v782_v37 }
  0xfd   : > { %3797 = vst [vmem:[#allocation3 + $0x28] sm:$0xff] %v3714_v39  }
  0xfe   : > { %v916_v43 = vpack.c.b16 %v900_v40, %v3676_v36  ;;  %v893_v44 = vunpack.c.l.b16 %v861_v42 }
  0xff   : > { %v801_v45 = vpop.f32.mrf.mxu2 }
 0x100   : > { %948 = vst [vmem:[#allocation2 + $0x68] sm:$0xff] %v916_v43  ;;  %v909_v46 = vpack.c.b16 %v893_v44, %v3663_v41  ;;  %v802_v47 = vadd.f32 %v801_v45, %v4357_v58  ;;  %v850_v48 = vpop.f32.mrf.mxu3 }
 0x101   : > { %v783_v49 = vpop.f32.mrf.mxu0  ;;  %v851_v8 = vadd.f32 %v850_v48, %v4360_v0 }
 0x102   : > { %941 = vst [vmem:[#allocation2 + $0x30] sm:$0xff] %v909_v46  ;;  %v869_v57 = vpack.c.bf16 %v802_v47, %v802_v47  ;;  %v784_v59 = vadd.f32 %v783_v49, %v4357_v58  ;;  %v832_v60 = vpop.f32.mrf.mxu1 }
 0x103   : > { %v833_v61 = vadd.f32 %v832_v60, %v4360_v0 }
 0x104   : > { %v901_v62 = vunpack.c.l.b16 %v869_v57  ;;  %v862_v1 = vpack.c.bf16 %v784_v59, %v784_v59 }
 0x105   : > { %v3699_v2 = vpack.c.bf16 %v833_v61, %v831_v54 }
 0x106   : > { %v917_v3 = vpack.c.b16 %v901_v62, %v3679_v50  ;;  %v894_v4 = vunpack.c.l.b16 %v862_v1 }
 0x107   : > { %3794 = vst [vmem:[#allocation3 + $0x10] sm:$0xff] %v3699_v2   ;;  %v803_v51 = vpop.f32.mrf.mxu2 }
 0x108   : > { %949 = vst [vmem:[#allocation2 + $0x70] sm:$0xff] %v917_v3  ;;  %v910_v5 = vpack.c.b16 %v894_v4, %v3664_v63  ;;  %v804_v6 = vadd.f32 %v803_v51, %v4357_v58  ;;  %v852_v7 = vpop.f32.mrf.mxu3 }
 0x109   : > { %v853_v9 = vadd.f32 %v852_v7, %v4360_v0 }
 0x10a   : > { %942 = vst [vmem:[#allocation2 + $0x38] sm:$0xff] %v910_v5  ;;  %v870_v11 = vpack.c.bf16 %v804_v6, %v804_v6 }
 0x10b   : > { %v3719_v55 = vpack.c.bf16 %v853_v9, %v851_v8 }
 0x10c   : > { %v902_v12 = vunpack.c.l.b16 %v870_v11 }
 0x10d   : > { %3798 = vst [vmem:[#allocation3 + $0x38] sm:$0xff] %v3719_v55  }
 0x10e   : > { %v918_v13 = vpack.c.b16 %v902_v12, %v3680_v10 }
 0x110   : > { %950 = vst [vmem:[#allocation2 + $0x78] sm:$0xff] %v918_v13 }
 0x111 PF: > { %v1011_v58 = vld [vmem:[%s4170_s24 + $0xe0] sm:$0xff]  ;;  %v1009_v14 = vld [vmem:[%s4170_s24 + $0xd0] sm:$0xff]  ;;  %v4019_v56 = vmov 0   ;;  %v1012_v15 = vld [vmem:[%s4170_s24 + $0xe8] sm:$0xff]  ;;  %s5362_s26 = sld [smem:[#allocation19_spill]] }
 0x112   : > { %v1007_v0 = vld [vmem:[%s4170_s24 + $0xc0] sm:$0xff]  ;;  %3918 = vset.pattern.permute.xlu2 %v4019_v56  ;;  %3917 = vset.pattern.permute.xlu1 %v4019_v56  ;;  %v1010_v16 = vld [vmem:[%s4170_s24 + $0xd8] sm:$0xff]  ;;  %v1008_v52 = vld [vmem:[%s4170_s24 + $0xc8] sm:$0xff]  ;;  %s5364_s29 = sld [smem:[#allocation8_spill]] }
 0x113   : > { %3916 = vset.pattern.permute.xlu0 %v4019_v56  ;;  %1135 = vperm.xlu2 %3918, %v1011_v58   ;;  %v1015_v17 = vld [vmem:[%s4175_s15] sm:$0xff]  ;;  %v1014_v18 = vld [vmem:[%s4170_s24 + $0xf8] sm:$0xff]  ;;  %v1013_v19 = vld [vmem:[%s4170_s24 + $0xf0] sm:$0xff]  ;;  %s5365_s20 = sld [smem:[#allocation20_spill]] }
 0x114   : > { %1129 = vperm.xlu1 %3917, %v1009_v14   ;;  %1123 = vperm.xlu0 %3916, %v1007_v0   ;;  %v984_v20 = vld [vmem:[%s4170_s24 + $0x8] sm:$0xff]  ;;  %v983_v22 = vld [vmem:[%s4170_s24] sm:$0xff]  ;;  %v985_v23 = vld [vmem:[%s4170_s24 + $0x10] sm:$0xff] }
 0x115   : > { %v1016_v21 = vld [vmem:[%s4175_s15 + $0x8] sm:$0xff]  ;;  %v1017_v24 = vld [vmem:[%s4175_s15 + $0x10] sm:$0xff]  ;;  %v1018_v25 = vld [vmem:[%s4175_s15 + $0x18] sm:$0xff] }
 0x116   : > { %v1020_v26 = vld [vmem:[%s4175_s15 + $0x28] sm:$0xff]  ;;  %v986_v27 = vld [vmem:[%s4170_s24 + $0x18] sm:$0xff]  ;;  %v1019_v28 = vld [vmem:[%s4175_s15 + $0x20] sm:$0xff] }
 0x117   : > { %v1021_v29 = vld [vmem:[%s4175_s15 + $0x30] sm:$0xff]  ;;  %v987_v30 = vld [vmem:[%s4170_s24 + $0x20] sm:$0xff]  ;;  %v988_v31 = vld [vmem:[%s4170_s24 + $0x28] sm:$0xff] }
 0x118   : > { %v990_v32 = vld [vmem:[%s4170_s24 + $0x38] sm:$0xff]  ;;  %v989_v34 = vld [vmem:[%s4170_s24 + $0x30] sm:$0xff]  ;;  %v991_v37 = vld [vmem:[%s4170_s24 + $0x40] sm:$0xff]  ;;  %s5367_s23 = sand.u32 1, %s5364_s29  }
 0x119   : > { %v1022_v33 = vld [vmem:[%s4175_s15 + $0x38] sm:$0xff]  ;;  %v3331_v35 = vld [vmem:[#allocation2 + $0x70] sm:$0xf]  ;;  %v1023_v38 = vld [vmem:[%s4175_s15 + $0x40] sm:$0xff]  ;;  %s2963_s17 = scalar_lea.sflag [#allocation5], %s5367_s23  ;;  %s3942_s14 = scalar_lea.hbm %s5365_s20, 256 }
 0x11a   : > { %v3621_v36 = vld [vmem:[#allocation2 + $0x74] sm:$0xf0]  ;;  %v1024_v39 = vld [vmem:[%s4175_s15 + $0x48] sm:$0xff]  ;;  %v3323_v40 = vld [vmem:[#allocation2 + $0x60] sm:$0xf] }
 0x11b   : > { %1138 = vperm.xlu2 %3918, %v1012_v15   ;;  %v3332_v53 = vor.u32 %v3621_v36, %v3331_v35  ;;  %v3619_v41 = vld [vmem:[#allocation2 + $0x64] sm:$0xf0]  ;;  %v3315_v43 = vld [vmem:[#allocation2 + $0x50] sm:$0xf]  ;;  %v3617_v44 = vld [vmem:[#allocation2 + $0x54] sm:$0xf0] }
 0x11c   : > { %1132 = vperm.xlu1 %3917, %v1010_v16   ;;  %1126 = vperm.xlu0 %3916, %v1008_v52   ;;  %v3324_v42 = vor.u32 %v3619_v41, %v3323_v40  ;;  %v1026_v45 = vld [vmem:[%s4175_s15 + $0x58] sm:$0xff]  ;;  %v3316_v46 = vor.u32 %v3617_v44, %v3315_v43  ;;  %v992_v47 = vld [vmem:[%s4170_s24 + $0x48] sm:$0xff]  ;;  %v1025_v48 = vld [vmem:[%s4175_s15 + $0x50] sm:$0xff]  ;;  %v4020_v41 = vmov 1.0|1.0  }
 0x11d   : > { %3830 = vmatpush.bf16.msra.mxu1 %v3332_v53  ;;  %1693 = vmatpush.bf16.msra.mxu0 %v3332_v53  ;;  %v3307_v54 = vld [vmem:[#allocation2 + $0x40] sm:$0xf]  ;;  %v3615_v49 = vld [vmem:[#allocation2 + $0x44] sm:$0xf0]  ;;  %v3299_v57 = vld [vmem:[#allocation2 + $0x30] sm:$0xf] }
 0x11e   : > { %v3308_v50 = vor.u32 %v3615_v49, %v3307_v54  ;;  %v3613_v59 = vld [vmem:[#allocation2 + $0x34] sm:$0xf0]  ;;  %v1027_v62 = vld [vmem:[%s4175_s15 + $0x60] sm:$0xff]  ;;  %v993_v63 = vld [vmem:[%s4170_s24 + $0x50] sm:$0xff] }
 0x11f   : > { %v3629_v60 = vld [vmem:[#allocation3 + $0x38] sm:$0xff]  ;;  %v3300_v61 = vor.u32 %v3613_v59, %v3299_v57  ;;  %v3291_v2 = vld [vmem:[#allocation2 + $0x20] sm:$0xf]  ;;  %v3611_v3 = vld [vmem:[#allocation2 + $0x24] sm:$0xf0] }
 0x120   : > { %1935 = vmatpush.bf16.msra.mxu2 %v3629_v60  ;;  %v994_v1 = vld [vmem:[%s4170_s24 + $0x58] sm:$0xff]  ;;  %v3628_v4 = vld [vmem:[#allocation3 + $0x28] sm:$0xff]  ;;  %v3292_v51 = vor.u32 %v3611_v3, %v3291_v2  ;;  %v3283_v5 = vld [vmem:[#allocation2 + $0x10] sm:$0xf] }
 0x121   : > { %3831 = vmatpush.bf16.msra.mxu1 %v3324_v42  ;;  %1694 = vmatpush.bf16.msra.mxu0 %v3324_v42  ;;  %v3609_v6 = vld [vmem:[#allocation2 + $0x14] sm:$0xf0]  ;;  %v3627_v7 = vld [vmem:[#allocation3 + $0x20] sm:$0xff]  ;;  %v996_v8 = vld [vmem:[%s4170_s24 + $0x68] sm:$0xff] }
 0x122   : > { %v3284_v9 = vor.u32 %v3609_v6, %v3283_v5  ;;  %v1028_v10 = vld [vmem:[%s4175_s15 + $0x68] sm:$0xff]  ;;  %v995_v11 = vld [vmem:[%s4170_s24 + $0x60] sm:$0xff]  ;;  %v997_v14 = vld [vmem:[%s4170_s24 + $0x70] sm:$0xff] }
 0x123   : > { %1259 = vperm.xlu2 %3918, %v1015_v17   ;;  %v3275_v55 = vld [vmem:[#allocation2] sm:$0xf]  ;;  %v3607_v12 = vld [vmem:[#allocation2 + $0x4] sm:$0xf0]  ;;  %v1029_v0 = vld [vmem:[%s4175_s15 + $0x70] sm:$0xff] }
 0x124   : > { %1144 = vperm.xlu1 %3917, %v1014_v18   ;;  %1141 = vperm.xlu0 %3916, %v1013_v19   ;;  %v3626_v13 = vld [vmem:[#allocation3 + $0x8] sm:$0xff]  ;;  %v3276_v58 = vor.u32 %v3607_v12, %v3275_v55  ;;  %v1030_v56 = vld [vmem:[%s4175_s15 + $0x78] sm:$0xff]  ;;  %v3625_v15 = vld [vmem:[#allocation3 + $0x10] sm:$0xff] }
 0x125   : > { %3832 = vmatpush.bf16.msra.mxu1 %v3316_v46  ;;  %1695 = vmatpush.bf16.msra.mxu0 %v3316_v46  ;;  %v3624_v16 = vld [vmem:[#allocation3 + $0x18] sm:$0xff]  ;;  %v1032_v52 = vld [vmem:[%s4175_s15 + $0x88] sm:$0xff]  ;;  %v3623_v17 = vld [vmem:[#allocation3] sm:$0xff] }
 0x126   : > { %1936 = vmatpush.bf16.msra.mxu2 %v3628_v4  ;;  %v998_v18 = vld [vmem:[%s4170_s24 + $0x78] sm:$0xff]  ;;  %v1031_v19 = vld [vmem:[%s4175_s15 + $0x80] sm:$0xff]  ;;  %v3620_v36 = vld [vmem:[#allocation2 + $0x74] sm:$0xf] }
 0x127   : > { %v1003_v35 = vld [vmem:[%s4170_s24 + $0xa0] sm:$0xff]  ;;  %v3333_v53 = vld [vmem:[#allocation2 + $0x78] sm:$0xf0]  ;;  %v3325_v44 = vld [vmem:[#allocation2 + $0x68] sm:$0xf0] }
 0x128   : > { %v3336_v40 = vor.u32 %v3620_v36, %v3333_v53  ;;  %v3618_v43 = vld [vmem:[#allocation2 + $0x64] sm:$0xf]  ;;  %v3616_v54 = vld [vmem:[#allocation2 + $0x54] sm:$0xf]  ;;  %v3317_v49 = vld [vmem:[#allocation2 + $0x58] sm:$0xf0] }
 0x129   : > { %3833 = vmatpush.bf16.msra.mxu1 %v3308_v50  ;;  %1696 = vmatpush.bf16.msra.mxu0 %v3308_v50  ;;  %v1004_v50 = vld [vmem:[%s4170_s24 + $0xa8] sm:$0xff]  ;;  %v1037_v57 = vld [vmem:[%s4175_s15 + $0xb0] sm:$0xff]  ;;  %v3320_v59 = vor.u32 %v3616_v54, %v3317_v49  ;;  %v3614_v60 = vld [vmem:[#allocation2 + $0x44] sm:$0xf] }
 0x12a   : > { %1937 = vmatpush.bf16.msra.mxu2 %v3627_v7  ;;  %v1039_v4 = vld [vmem:[%s4175_s15 + $0xc0] sm:$0xff]  ;;  %v3301_v5 = vld [vmem:[#allocation2 + $0x38] sm:$0xf0]  ;;  %v1005_v7 = vld [vmem:[%s4170_s24 + $0xb0] sm:$0xff] }
 0x12b   : > { %1054 = vperm.xlu2 %3918, %v984_v20   ;;  %v3622_v20 = vld [vmem:[#allocation3 + $0x30] sm:$0xff] }
 0x12c   : > { %1262 = vperm.xlu0 %3916, %v1016_v21   ;;  %1051 = vperm.xlu1 %3917, %v983_v22   ;;  %v1033_v22 = vld [vmem:[%s4175_s15 + $0x90] sm:$0xff] }
 0x12d   : > { %3834 = vmatpush.bf16.msra.mxu1 %v3300_v61  ;;  %1697 = vmatpush.bf16.msra.mxu0 %v3300_v61  ;;  %v3309_v61 = vld [vmem:[#allocation2 + $0x48] sm:$0xf0] }
 0x12e   : > { %1938 = vmatpush.bf16.msra.mxu2 %v3626_v13 }
 0x131   : > { %3835 = vmatpush.bf16.msra.mxu1 %v3292_v51  ;;  %1698 = vmatpush.bf16.msra.mxu0 %v3292_v51  ;;  %v3612_v51 = vld [vmem:[#allocation2 + $0x34] sm:$0xf] }
 0x132   : > { %1939 = vmatpush.bf16.msra.mxu2 %v3625_v15  ;;  %v1041_v15 = vld [vmem:[%s4175_s15 + $0xd0] sm:$0xff] }
 0x133   : > { %1057 = vperm.xlu2 %3918, %v985_v23   ;;  %v999_v23 = vld [vmem:[%s4170_s24 + $0x80] sm:$0xff] }
 0x134   : > { %1265 = vperm.xlu0 %3916, %v1017_v24   ;;  %1268 = vperm.xlu1 %3917, %v1018_v25   ;;  %v1000_v24 = vld [vmem:[%s4170_s24 + $0x88] sm:$0xff] }
 0x135   : > { %3836 = vmatpush.bf16.msra.mxu1 %v3284_v9  ;;  %1699 = vmatpush.bf16.msra.mxu0 %v3284_v9  ;;  %v3304_v9 = vor.u32 %v3612_v51, %v3301_v5 }
 0x136   : > { %1940 = vmatpush.bf16.msra.mxu2 %v3624_v16 }
 0x139   : > { %3837 = vmatpush.bf16.msra.mxu1 %v3276_v58  ;;  %1700 = vmatpush.bf16.msra.mxu0 %v3276_v58  ;;  %v1042_v58 = vld [vmem:[%s4175_s15 + $0xd8] sm:$0xff] }
 0x13a   : > { %1941 = vmatpush.bf16.msra.mxu2 %v3623_v17  ;;  %v3277_v17 = vld [vmem:[#allocation2 + $0x8] sm:$0xf0] }
 0x13b   : > { %1274 = vperm.xlu2 %3918, %v1020_v26  }
 0x13c   : > { %1060 = vperm.xlu0 %3916, %v986_v27   ;;  %1271 = vperm.xlu1 %3917, %v1019_v28   ;;  %v1048_v27 = vlaneseq  ;;  %v1002_v28 = vld [vmem:[%s4170_s24 + $0x98] sm:$0xff] }
 0x13d   : > { %1782 = vmatpush.bf16.msrb.mxu1 %v3336_v40 }
 0x13e   : > { %1942 = vmatpush.bf16.msra.mxu2 %v3622_v20 }
 0x143   : > { %1277 = vperm.xlu2 %3918, %v1021_v29  }
 0x144   : > { %1063 = vperm.xlu0 %3916, %v987_v30   ;;  %1066 = vperm.xlu1 %3917, %v988_v31   ;;  %v1034_v30 = vld [vmem:[%s4175_s15 + $0x98] sm:$0xff]  ;;  %v1001_v31 = vld [vmem:[%s4170_s24 + $0x90] sm:$0xff] }
 0x14b   : > { %1072 = vperm.xlu2 %3918, %v990_v32   ;;  %v4460_v32 = vand.u32 127, %v1048_v27 }
 0x14c   : > { %1280 = vperm.xlu0 %3916, %v1022_v33   ;;  %1069 = vperm.xlu1 %3917, %v989_v34  }
 0x153   : > { %1075 = vperm.xlu2 %3918, %v991_v37  }
 0x154   : > { %1283 = vperm.xlu0 %3916, %v1023_v38   ;;  %1286 = vperm.xlu1 %3917, %v1024_v39   ;;  %v1035_v38 = vld [vmem:[%s4175_s15 + $0xa0] sm:$0xff]  ;;  %v1036_v39 = vld [vmem:[%s4175_s15 + $0xa8] sm:$0xff] }
 0x15b   : > { %1292 = vperm.xlu2 %3918, %v1026_v45  }
 0x15c   : > { %1078 = vperm.xlu0 %3916, %v992_v47   ;;  %1289 = vperm.xlu1 %3917, %v1025_v48   ;;  %v3328_v47 = vor.u32 %v3618_v43, %v3325_v44  ;;  %v1038_v48 = vld [vmem:[%s4175_s15 + $0xb8] sm:$0xff] }
 0x15e   : > { %1783 = vmatpush.bf16.msrb.mxu1 %v3328_v47 }
 0x162   : > { %1784 = vmatpush.bf16.msrb.mxu1 %v3320_v59 }
 0x163   : > { %1295 = vperm.xlu2 %3918, %v1027_v62  }
 0x164   : > { %1081 = vperm.xlu0 %3916, %v993_v63   ;;  %1084 = vperm.xlu1 %3917, %v994_v1   ;;  %v3312_v63 = vor.u32 %v3614_v60, %v3309_v61 }
 0x166   : > { %1785 = vmatpush.bf16.msrb.mxu1 %v3312_v63 }
 0x16a   : > { %1786 = vmatpush.bf16.msrb.mxu1 %v3304_v9 }
 0x16b   : > { %1090 = vperm.xlu2 %3918, %v996_v8   ;;  %v1006_v8 = vld [vmem:[%s4170_s24 + $0xb8] sm:$0xff] }
 0x16c   : > { %1298 = vperm.xlu0 %3916, %v1028_v10   ;;  %1087 = vperm.xlu1 %3917, %v995_v11   ;;  %v3610_v10 = vld [vmem:[#allocation2 + $0x24] sm:$0xf]  ;;  %v3293_v11 = vld [vmem:[#allocation2 + $0x28] sm:$0xf0] }
 0x16d   : > { %v4449_v21 = vpop.permute.xlu2 %1135  ;;  %v3296_v55 = vor.u32 %v3610_v10, %v3293_v11 }
 0x16e   : > { %vm1174_vm14 = vcmp.eq.s32.totalorder %v4460_v32, %v4449_v21 }
 0x16f   : > { %1787 = vmatpush.bf16.msrb.mxu1 %v3296_v55 }
 0x173   : > { %1093 = vperm.xlu2 %3918, %v997_v14   ;;  %v3608_v14 = vld [vmem:[#allocation2 + $0x14] sm:$0xf] }
 0x174   : > { %1301 = vperm.xlu0 %3916, %v1029_v0   ;;  %1304 = vperm.xlu1 %3917, %v1030_v56   ;;  %v3285_v0 = vld [vmem:[#allocation2 + $0x18] sm:$0xf0]  ;;  %v1040_v56 = vld [vmem:[%s4175_s15 + $0xc8] sm:$0xff] }
 0x175   : > { %v4455_v29 = vpop.permute.xlu2 %1138  ;;  %v3288_v16 = vor.u32 %v3608_v14, %v3285_v0 }
 0x176   : > { %vm1175_vm15 = vcmp.eq.s32.totalorder %v4460_v32, %v4455_v29  ;;  %v1046_v29 = vld [vmem:[%s4175_s15 + $0xf8] sm:$0xff] }
 0x177   : > { %1788 = vmatpush.bf16.msrb.mxu1 %v3288_v16 }
 0x17b   : > { %1310 = vperm.xlu2 %3918, %v1032_v52   ;;  %v3606_v52 = vld [vmem:[#allocation2 + $0x4] sm:$0xf] }
 0x17c   : > { %1096 = vperm.xlu0 %3916, %v998_v18   ;;  %1307 = vperm.xlu1 %3917, %v1031_v19   ;;  %v3280_v18 = vor.u32 %v3606_v52, %v3277_v17 }
 0x17d   : > { %v1260_v42 = vpop.permute.xlu2 %1259 }
 0x17e   : > { %vm1354_vm5 = vcmp.eq.s32.totalorder %v4460_v32, %v1260_v42  ;;  %1789 = vmatpush.bf16.msrb.mxu1 %v3280_v18 }
 0x183   : > { %1313 = vperm.xlu2 %3918, %v1033_v22  }
 0x184   : > { %1099 = vperm.xlu0 %3916, %v999_v23   ;;  %1102 = vperm.xlu1 %3917, %v1000_v24   ;;  %v1045_v23 = vld [vmem:[%s4175_s15 + $0xf0] sm:$0xff] }
 0x185   : > { %v1055_v62 = vpop.permute.xlu2 %1054 }
 0x186   : > { %v1130_v25 = vpop.permute.xlu1 %1129  ;;  %v1124_v26 = vpop.permute.xlu0 %1123  ;;  %vm1147_vm6 = vcmp.eq.s32.totalorder %v4460_v32, %v1055_v62 }
 0x187   : > { %vm1170_vm1 = vcmp.eq.s32.totalorder %v4460_v32, %v1124_v26  ;;  %vm1172_vm3 = vcmp.eq.s32.totalorder %v4460_v32, %v1130_v25  ;;  %v1043_v25 = vld [vmem:[%s4175_s15 + $0xe0] sm:$0xff]  ;;  %v1044_v26 = vld [vmem:[%s4175_s15 + $0xe8] sm:$0xff]  ;;  %s2975_s15 = sshll.u32 %s4187_s12, 4  ;;  %s2976_s15 = int_to_ptr.vmem [resolvable:$true] %s2975_s15 }
 0x18b   : > { %1108 = vperm.xlu2 %3918, %v1002_v28  }
 0x18c   : > { %1316 = vperm.xlu0 %3916, %v1034_v30   ;;  %1105 = vperm.xlu1 %3917, %v1001_v31  }
 0x18d   : > { %v1058_v19 = vpop.permute.xlu2 %1057 }
 0x18e   : > { %v1133_v33 = vpop.permute.xlu1 %1132  ;;  %v1127_v34 = vpop.permute.xlu0 %1126 }
 0x18f   : > { %vm1171_vm0 = vcmp.eq.s32.totalorder %v4460_v32, %v1127_v34  ;;  %vm1173_vm4 = vcmp.eq.s32.totalorder %v4460_v32, %v1133_v33 }
 0x190   : > { %vm4465_vm2 = vmpackc.low %vm1171_vm0, %vm1170_vm1  ;;  %vm1148_vm0 = vcmp.eq.s32.totalorder %v4460_v32, %v1058_v19 }
 0x191   : > { %3362 = vmatmul.msk.bf16.vlgmr.msra.gmra.mxu1 %vm4465_vm2, %v4020_v41  ;;  %vm4485_vm7 = vmpackc.low %vm1173_vm4, %vm1172_vm3 }
 0x193   : > { %1111 = vperm.xlu2 %3918, %v1003_v35  }
 0x194   : > { %1319 = vperm.xlu0 %3916, %v1035_v38   ;;  %1322 = vperm.xlu1 %3917, %v1036_v39  }
 0x195   : > { %v1275_v28 = vpop.permute.xlu2 %1274 }
 0x196   : > { %v4474_v45 = vpop.permute.xlu1 %1144  ;;  %v4476_v46 = vpop.permute.xlu0 %1141 }
 0x19b   : > { %1328 = vperm.xlu2 %3918, %v1038_v48  }
 0x19c   : > { %1114 = vperm.xlu0 %3916, %v1004_v50   ;;  %1325 = vperm.xlu1 %3917, %v1037_v57  }
 0x19d   : > { %v1278_v35 = vpop.permute.xlu2 %1277 }
 0x19e   : > { %v1263_v1 = vpop.permute.xlu0 %1262  ;;  %v1052_v2 = vpop.permute.xlu1 %1051 }
 0x19f   : > { %vm1355_vm8 = vcmp.eq.s32.totalorder %v4460_v32, %v1263_v1  ;;  %vm1146_vm9 = vcmp.eq.s32.totalorder %v4460_v32, %v1052_v2  ;;  %v3631_v1 = vld [vmem:[%s5293_s7 + $0x8] sm:$0xff] }
 0x1a0   : > { %vm3433_vm10 = vmpackc.low %vm1355_vm8, %vm1354_vm5  ;;  %vm1176_vm8 = vcmp.eq.s32.totalorder %v4460_v32, %v4476_v46  ;;  %2275 = vmatpush.bf16.msrb.mxu2 %v3631_v1  ;;  %3838 = vmatpush.bf16.msra.mxu3 %v3631_v1 }
 0x1a1   : > { %vm4492_vm11 = vmpackc.low %vm1147_vm6, %vm1146_vm9  ;;  %3434 = vmatmul.msk.bf16.vlgmr.msra.gmra.mxu2 %vm3433_vm10, %v4020_v41  ;;  %3364 = vmatmul.msk.bf16.gmra.mxu1 %vm4485_vm7, %v4020_v41  ;;  %vm1177_vm6 = vcmp.eq.s32.totalorder %v4460_v32, %v4474_v45 }
 0x1a2   : > { %3338 = vmatmul.msk.bf16.vlgmr.msra.gmra.mxu0 %vm4492_vm11, %v4020_v41  ;;  %vm4521_vm5 = vmpackc.low %vm1175_vm15, %vm1174_vm14  ;;  %vm1359_vm14 = vcmp.eq.s32.totalorder %v4460_v32, %v1275_v28 }
 0x1a3   : > { %1331 = vperm.xlu2 %3918, %v1039_v4  }
 0x1a4   : > { %1117 = vperm.xlu0 %3916, %v1005_v7   ;;  %1120 = vperm.xlu1 %3917, %v1006_v8  }
 0x1a5   : > { %v1073_v38 = vpop.permute.xlu2 %1072 }
 0x1a6   : > { %v1266_v12 = vpop.permute.xlu0 %1265  ;;  %v1269_v13 = vpop.permute.xlu1 %1268 }
 0x1a7   : > { %vm1356_vm12 = vcmp.eq.s32.totalorder %v4460_v32, %v1266_v12  ;;  %vm1357_vm13 = vcmp.eq.s32.totalorder %v4460_v32, %v1269_v13 }
 0x1a8   : > { %vm3435_vm1 = vmpackc.low %vm1357_vm13, %vm1356_vm12 }
 0x1a9   : > { %vm4542_vm13 = vmpackc.low %vm1177_vm6, %vm1176_vm8  ;;  %vm1360_vm6 = vcmp.eq.s32.totalorder %v4460_v32, %v1278_v35  ;;  %vm1153_vm8 = vcmp.eq.s32.totalorder %v4460_v32, %v1073_v38 }
 0x1ab   : > { %1340 = vperm.xlu2 %3918, %v1042_v58  }
 0x1ac   : > { %1334 = vperm.xlu0 %3916, %v1040_v56   ;;  %1337 = vperm.xlu1 %3917, %v1041_v15  }
 0x1ad   : > { %v1076_v44 = vpop.permute.xlu2 %1075 }
 0x1ae   : > { %v1061_v20 = vpop.permute.xlu0 %1060  ;;  %v1272_v21 = vpop.permute.xlu1 %1271 }
 0x1af   : > { %vm1149_vm3 = vcmp.eq.s32.totalorder %v4460_v32, %v1061_v20  ;;  %vm1358_vm9 = vcmp.eq.s32.totalorder %v4460_v32, %v1272_v21 }
 0x1b0   : > { %vm4516_vm4 = vmpackc.low %vm1149_vm3, %vm1148_vm0 }
 0x1b1   : > { %3436 = vmatmul.msk.bf16.gmra.mxu2 %vm3435_vm1, %v4020_v41  ;;  %3366 = vmatmul.msk.bf16.gmra.mxu1 %vm4521_vm5, %v4020_v41  ;;  %vm3437_vm15 = vmpackc.low %vm1359_vm14, %vm1358_vm9 }
 0x1b2   : > { %3340 = vmatmul.msk.bf16.gmra.mxu0 %vm4516_vm4, %v4020_v41 }
 0x1b3   : > { %1349 = vperm.xlu2 %3918, %v1045_v23  }
 0x1b4   : > { %1343 = vperm.xlu0 %3916, %v1043_v25   ;;  %1346 = vperm.xlu1 %3917, %v1044_v26   ;;  %v3801_v26 = vld [vmem:[%s4180_s13 + $0x18] sm:$0xff]  }
 0x1b5   : > { %v1293_v47 = vpop.permute.xlu2 %1292 }
 0x1b6   : > { %v1064_v30 = vpop.permute.xlu0 %1063  ;;  %v1067_v31 = vpop.permute.xlu1 %1066 }
 0x1b7   : > { %vm1150_vm10 = vcmp.eq.s32.totalorder %v4460_v32, %v1064_v30  ;;  %vm1151_vm12 = vcmp.eq.s32.totalorder %v4460_v32, %v1067_v31  ;;  %v3722_v31 = vld [vmem:[%s4180_s13] sm:$0xff]  }
 0x1b8   : > { %vm4547_vm0 = vmpackc.low %vm1151_vm12, %vm1150_vm10  ;;  %v3723_v38 = vunpack.c.l.bf16 %v3722_v31  ;;  %v3724_v45 = vunpack.c.h.bf16 %v3722_v31 }
 0x1bc   : > { %1352 = vperm.xlu0 %3916, %v1046_v29  }
 0x1bd   : > { %v1296_v50 = vpop.permute.xlu2 %1295 }
 0x1be   : > { %v1281_v36 = vpop.permute.xlu0 %1280  ;;  %v1070_v53 = vpop.permute.xlu1 %1069 }
 0x1bf   : > { %vm1361_vm1 = vcmp.eq.s32.totalorder %v4460_v32, %v1281_v36  ;;  %vm1152_vm3 = vcmp.eq.s32.totalorder %v4460_v32, %v1070_v53 }
 0x1c0   : > { %vm3439_vm9 = vmpackc.low %vm1361_vm1, %vm1360_vm6  ;;  %vm1154_vm1 = vcmp.eq.s32.totalorder %v4460_v32, %v1076_v44 }
 0x1c1   : > { %3438 = vmatmul.msk.bf16.gmra.mxu2 %vm3437_vm15, %v4020_v41  ;;  %3368 = vmatmul.msk.bf16.gmra.mxu1 %vm4542_vm13, %v4020_v41  ;;  %vm4562_vm10 = vmpackc.low %vm1153_vm8, %vm1152_vm3 }
 0x1c2   : > { %3342 = vmatmul.msk.bf16.gmra.mxu0 %vm4547_vm0, %v4020_v41 }
 0x1c5   : > { %v1091_v60 = vpop.permute.xlu2 %1090 }
 0x1c6   : > { %v1284_v40 = vpop.permute.xlu0 %1283  ;;  %v1287_v42 = vpop.permute.xlu1 %1286 }
 0x1c7   : > { %vm1362_vm12 = vcmp.eq.s32.totalorder %v4460_v32, %v1284_v40  ;;  %vm1363_vm14 = vcmp.eq.s32.totalorder %v4460_v32, %v1287_v42 }
 0x1c8   : > { %vm3441_vm3 = vmpackc.low %vm1363_vm14, %vm1362_vm12  ;;  %vm1365_vm12 = vcmp.eq.s32.totalorder %v4460_v32, %v1293_v47 }
 0x1cd   : > { %v1094_v4 = vpop.permute.xlu2 %1093 }
 0x1ce   : > { %v1079_v43 = vpop.permute.xlu0 %1078  ;;  %v1290_v46 = vpop.permute.xlu1 %1289 }
 0x1cf   : > { %vm1155_vm15 = vcmp.eq.s32.totalorder %v4460_v32, %v1079_v43 }
 0x1d0   : > { %vm4577_vm6 = vmpackc.low %vm1155_vm15, %vm1154_vm1 }
 0x1d1   : > { %3440 = vmatmul.msk.bf16.gmra.mxu2 %vm3439_vm9, %v4020_v41  ;;  %3370 = vmatmul.msk.bf16.vlgmr.msrb.gmra.mxu1 %vm4492_vm11, %v4020_v41  ;;  %vm1364_vm11 = vcmp.eq.s32.totalorder %v4460_v32, %v1290_v46 }
 0x1d2   : > { %3344 = vmatmul.msk.bf16.gmra.mxu0 %vm4562_vm10, %v4020_v41  ;;  %vm3443_vm14 = vmpackc.low %vm1365_vm12, %vm1364_vm11  ;;  %vm1159_vm11 = vcmp.eq.s32.totalorder %v4460_v32, %v1091_v60 }
 0x1d5   : > { %v1311_v8 = vpop.permute.xlu2 %1310 }
 0x1d6   : > { %v1082_v48 = vpop.permute.xlu0 %1081  ;;  %v1085_v54 = vpop.permute.xlu1 %1084 }
 0x1d7   : > { %vm1156_vm8 = vcmp.eq.s32.totalorder %v4460_v32, %v1082_v48  ;;  %vm1157_vm9 = vcmp.eq.s32.totalorder %v4460_v32, %v1085_v54  ;;  %v3799_v48 = vld [vmem:[%s4180_s13 + $0x8] sm:$0xff]  }
 0x1d8   : > { %vm4592_vm15 = vmpackc.low %vm1157_vm9, %vm1156_vm8 }
 0x1dd   : > { %v1314_v12 = vpop.permute.xlu2 %1313 }
 0x1de   : > { %v1299_v57 = vpop.permute.xlu0 %1298  ;;  %v1088_v59 = vpop.permute.xlu1 %1087 }
 0x1df   : > { %vm1158_vm1 = vcmp.eq.s32.totalorder %v4460_v32, %v1088_v59 }
 0x1e0   : > { %vm4607_vm9 = vmpackc.low %vm1159_vm11, %vm1158_vm1 }
 0x1e1   : > { %3442 = vmatmul.msk.bf16.gmra.mxu2 %vm3441_vm3, %v4020_v41  ;;  %3372 = vmatmul.msk.bf16.gmra.mxu1 %vm4516_vm4, %v4020_v41  ;;  %vm1367_vm4 = vcmp.eq.s32.totalorder %v4460_v32, %v1299_v57  ;;  %vm1366_vm3 = vcmp.eq.s32.totalorder %v4460_v32, %v1296_v50  ;;  %v3630_v50 = vld [vmem:[%s5293_s7] sm:$0xff] }
 0x1e2   : > { %3346 = vmatmul.msk.bf16.gmra.mxu0 %vm4577_vm6, %v4020_v41  ;;  %vm3445_vm8 = vmpackc.low %vm1367_vm4, %vm1366_vm3  ;;  %vm1160_vm4 = vcmp.eq.s32.totalorder %v4460_v32, %v1094_v4  ;;  %3839 = vmatpush.bf16.msra.mxu3 %v3630_v50 }
 0x1e3   : > { %2276 = vmatpush.bf16.msrb.mxu2 %v3630_v50 }
 0x1e5   : > { %v1109_v15 = vpop.permute.xlu2 %1108 }
 0x1e6   : > { %v1302_v62 = vpop.permute.xlu0 %1301  ;;  %v1305_v63 = vpop.permute.xlu1 %1304 }
 0x1e7   : > { %vm1369_vm12 = vcmp.eq.s32.totalorder %v4460_v32, %v1305_v63 }
 0x1ed   : > { %v1112_v21 = vpop.permute.xlu2 %1111 }
 0x1ee   : > { %v1097_v2 = vpop.permute.xlu0 %1096  ;;  %v1308_v6 = vpop.permute.xlu1 %1307 }
 0x1ef   : > { %vm1370_vm3 = vcmp.eq.s32.totalorder %v4460_v32, %v1308_v6  ;;  %v3728_v6 = vunpack.c.h.bf16 %v3799_v48 }
 0x1f1   : > { %3444 = vmatmul.msk.bf16.gmra.mxu2 %vm3443_vm14, %v4020_v41  ;;  %3374 = vmatmul.msk.bf16.gmra.mxu1 %vm4547_vm0, %v4020_v41  ;;  %vm1368_vm0 = vcmp.eq.s32.totalorder %v4460_v32, %v1302_v62  ;;  %vm1161_vm14 = vcmp.eq.s32.totalorder %v4460_v32, %v1097_v2  ;;  %v3727_v62 = vunpack.c.l.bf16 %v3799_v48 }
 0x1f2   : > { %3348 = vmatmul.msk.bf16.gmra.mxu0 %vm4592_vm15, %v4020_v41  ;;  %vm4627_vm1 = vmpackc.low %vm1161_vm14, %vm1160_vm4 }
 0x1f5   : > { %v1329_v36 = vpop.permute.xlu2 %1328 }
 0x1f6   : > { %v1100_v9 = vpop.permute.xlu0 %1099  ;;  %v1103_v10 = vpop.permute.xlu1 %1102 }
 0x1f7   : > { %vm1162_vm11 = vcmp.eq.s32.totalorder %v4460_v32, %v1100_v9 }
 0x1fd   : > { %v1332_v57 = vpop.permute.xlu2 %1331 }
 0x1fe   : > { %v1317_v58 = vpop.permute.xlu0 %1316  ;;  %v1106_v0 = vpop.permute.xlu1 %1105 }
 0x1ff   : > { %vm1164_vm4 = vcmp.eq.s32.totalorder %v4460_v32, %v1106_v0 }
 0x201   : > { %3446 = vmatmul.msk.bf16.gmra.mxu2 %vm3445_vm8, %v4020_v41  ;;  %3376 = vmatmul.msk.bf16.gmra.mxu1 %vm4562_vm10, %v4020_v41  ;;  %vm3447_vm10 = vmpackc.low %vm1369_vm12, %vm1368_vm0  ;;  %vm1163_vm8 = vcmp.eq.s32.totalorder %v4460_v32, %v1103_v10  ;;  %vm1371_vm0 = vcmp.eq.s32.totalorder %v4460_v32, %v1311_v8 }
 0x202   : > { %3350 = vmatmul.msk.bf16.gmra.mxu0 %vm4607_vm9, %v4020_v41  ;;  %vm3449_vm12 = vmpackc.low %vm1371_vm0, %vm1370_vm3  ;;  %vm1165_vm3 = vcmp.eq.s32.totalorder %v4460_v32, %v1109_v15 }
 0x203   : > { %vm4646_vm14 = vmpackc.low %vm1163_vm8, %vm1162_vm11 }
 0x206   : > { %v1320_v17 = vpop.permute.xlu0 %1319  ;;  %v1323_v19 = vpop.permute.xlu1 %1322 }
 0x207   : > { %vm1374_vm8 = vcmp.eq.s32.totalorder %v4460_v32, %v1320_v17  ;;  %vm1375_vm0 = vcmp.eq.s32.totalorder %v4460_v32, %v1323_v19 }
 0x20e   : > { %v4624_v51 = vpop.f32.mrf.mxu1  ;;  %v1115_v22 = vpop.permute.xlu0 %1114 }
 0x20f   : > { %v1326_v28 = vpop.permute.xlu1 %1325 }
 0x211   : > { %3448 = vmatmul.msk.bf16.gmra.mxu2 %vm3447_vm10, %v4020_v41  ;;  %3378 = vmatmul.msk.bf16.gmra.mxu1 %vm4577_vm6, %v4020_v41  ;;  %vm1373_vm6 = vcmp.eq.s32.totalorder %v4460_v32, %v1317_v58  ;;  %vm1372_vm10 = vcmp.eq.s32.totalorder %v4460_v32, %v1314_v12  ;;  %v1341_v12 = vpop.permute.xlu2 %1340 }
 0x212   : > { %3352 = vmatmul.msk.bf16.gmra.mxu0 %vm4627_vm1, %v4020_v41  ;;  %vm3451_vm11 = vmpackc.low %vm1373_vm6, %vm1372_vm10  ;;  %vm1166_vm6 = vcmp.eq.s32.totalorder %v4460_v32, %v1112_v21  ;;  %vm1376_vm10 = vcmp.eq.s32.totalorder %v4460_v32, %v1326_v28 }
 0x216   : > { %v4638_v7 = vpop.f32.mrf.mxu1  ;;  %v1118_v34 = vpop.permute.xlu0 %1117 }
 0x217   : > { %v1121_v35 = vpop.permute.xlu1 %1120 }
 0x21e   : > { %v4644_v11 = vpop.f32.mrf.mxu1  ;;  %v1335_v54 = vpop.permute.xlu0 %1334 }
 0x21f   : > { %v1338_v10 = vpop.permute.xlu1 %1337 }
 0x221   : > { %3450 = vmatmul.msk.bf16.gmra.mxu2 %vm3449_vm12, %v4020_v41  ;;  %3380 = vmatmul.msk.bf16.gmra.mxu1 %vm4592_vm15, %v4020_v41  ;;  %vm4665_vm15 = vmpackc.low %vm1165_vm3, %vm1164_vm4  ;;  %vm1167_vm12 = vcmp.eq.s32.totalorder %v4460_v32, %v1115_v22  ;;  %vm1168_vm3 = vcmp.eq.s32.totalorder %v4460_v32, %v1118_v34 }
 0x222   : > { %3354 = vmatmul.msk.bf16.gmra.mxu0 %vm4646_vm14, %v4020_v41  ;;  %vm3453_vm4 = vmpackc.low %vm1375_vm0, %vm1374_vm8 }
 0x224   : > { %v1944_v13 = vpop.f32.mrf.mxu2 }
 0x226   : > { %v4657_v14 = vpop.f32.mrf.mxu1  ;;  %v1344_v31 = vpop.permute.xlu0 %1343 }
 0x227   : > { %v1347_v34 = vpop.permute.xlu1 %1346 }
 0x22c   : > { %v1946_v56 = vpop.f32.mrf.mxu2 }
 0x22e   : > { %v4662_v16 = vpop.f32.mrf.mxu1 }
 0x231   : > { %3452 = vmatmul.msk.bf16.gmra.mxu2 %vm3451_vm11, %v4020_v41  ;;  %3382 = vmatmul.msk.bf16.gmra.mxu1 %vm4607_vm9, %v4020_v41  ;;  %vm4684_vm9 = vmpackc.low %vm1167_vm12, %vm1166_vm6  ;;  %vm1169_vm11 = vcmp.eq.s32.totalorder %v4460_v32, %v1121_v35  ;;  %vm1379_vm12 = vcmp.eq.s32.totalorder %v4460_v32, %v1335_v54 }
 0x232   : > { %3356 = vmatmul.msk.bf16.gmra.mxu0 %vm4665_vm15, %v4020_v41  ;;  %vm4706_vm0 = vmpackc.low %vm1169_vm11, %vm1168_vm3  ;;  %vm1382_vm3 = vcmp.eq.s32.totalorder %v4460_v32, %v1344_v31  ;;  %vm1383_vm11 = vcmp.eq.s32.totalorder %v4460_v32, %v1347_v34  ;;  %v3804_v34 = vld [vmem:[%s4180_s13 + $0x30] sm:$0xff]  }
 0x234   : > { %v1949_v18 = vpop.f32.mrf.mxu2 }
 0x236   : > { %v4676_v20 = vpop.f32.mrf.mxu1 }
 0x23c   : > { %v1951_v23 = vpop.f32.mrf.mxu2 }
 0x23e   : > { %v4681_v25 = vpop.f32.mrf.mxu1 }
 0x241   : > { %3454 = vmatmul.msk.bf16.gmra.mxu2 %vm3453_vm4, %v4020_v41  ;;  %3384 = vmatmul.msk.bf16.gmra.mxu1 %vm4627_vm1, %v4020_v41  ;;  %vm1377_vm1 = vcmp.eq.s32.totalorder %v4460_v32, %v1329_v36  ;;  %vm1380_vm4 = vcmp.eq.s32.totalorder %v4460_v32, %v1338_v10 }
 0x242   : > { %3358 = vmatmul.msk.bf16.gmra.mxu0 %vm4684_vm9, %v4020_v41  ;;  %vm3455_vm8 = vmpackc.low %vm1377_vm1, %vm1376_vm10  ;;  %vm1381_vm10 = vcmp.eq.s32.totalorder %v4460_v32, %v1341_v12 }
 0x243   : > { %vm3461_vm1 = vmpackc.low %vm1383_vm11, %vm1382_vm3 }
 0x244   : > { %v4695_v29 = vpop.f32.mrf.mxu2 }
 0x246   : > { %v4697_v30 = vpop.f32.mrf.mxu1 }
 0x24c   : > { %v4700_v53 = vpop.f32.mrf.mxu2 }
 0x24e   : > { %v1791_v39 = vpop.f32.mrf.mxu1 }
 0x24f   : > { %v2088_v40 = vadd.f32 %v3723_v38, %v1791_v39 }
 0x251   : > { %3456 = vmatmul.msk.bf16.gmra.mxu2 %vm3455_vm8, %v4020_v41  ;;  %v2120_v43 = vadd.f32 %v2088_v40, %v1944_v13  ;;  %3386 = vmatmul.msk.bf16.gmra.mxu1 %vm4646_vm14, %v4020_v41  ;;  %vm1378_vm14 = vcmp.eq.s32.totalorder %v4460_v32, %v1332_v57  ;;  %v1350_v57 = vpop.permute.xlu2 %1349 }
 0x252   : > { %3360 = vmatmul.msk.bf16.gmra.mxu0 %vm4706_vm0, %v4020_v41  ;;  %vm3457_vm6 = vmpackc.low %vm1379_vm12, %vm1378_vm14  ;;  %vm1384_vm12 = vcmp.eq.s32.totalorder %v4460_v32, %v1350_v57 }
 0x253   : > { %v2152_v59 = vmax.f32 %v2120_v43, 0.0 }
 0x254   : > { %v4717_v44 = vpop.f32.mrf.mxu2 }
 0x256   : > { %v1793_v46 = vpop.f32.mrf.mxu1 }
 0x257   : > { %v2089_v47 = vadd.f32 %v3724_v45, %v1793_v46  ;;  %v3735_v45 = vunpack.c.l.bf16 %v3801_v26  ;;  %v3736_v46 = vunpack.c.h.bf16 %v3801_v26 }
 0x259   : > { %v2121_v49 = vadd.f32 %v2089_v47, %v1946_v56  ;;  %v3800_v56 = vld [vmem:[%s4180_s13 + $0x10] sm:$0xff]  }
 0x25a   : > { %v3731_v17 = vunpack.c.l.bf16 %v3800_v56  ;;  %v3732_v22 = vunpack.c.h.bf16 %v3800_v56 }
 0x25b   : > { %v2153_v60 = vmax.f32 %v2121_v49, 0.0  ;;  %v1353_v49 = vpop.permute.xlu0 %1352 }
 0x25c   : > { %v1961_v61 = vpop.f32.mrf.mxu2  ;;  %vm1385_vm8 = vcmp.eq.s32.totalorder %v4460_v32, %v1353_v49 }
 0x25d   : > { %v4724_v63 = vpack.c.bf16 %v2153_v60, %v2152_v59 }
 0x25e   : > { %v1796_v1 = vpop.f32.mrf.mxu1 }
 0x25f   : > { %v2090_v2 = vadd.f32 %v3727_v62, %v1796_v1  ;;  %v3802_v1 = vld [vmem:[%s4180_s13 + $0x20] sm:$0xff]  }
 0x261   : > { %3458 = vmatmul.msk.bf16.gmra.mxu2 %vm3457_vm6, %v4020_v41  ;;  %v2122_v4 = vadd.f32 %v2090_v2, %v1949_v18  ;;  %3388 = vmatmul.msk.bf16.gmra.mxu1 %vm4665_vm15, %v4020_v41  ;;  %vm3459_vm15 = vmpackc.low %vm1381_vm10, %vm1380_vm4 }
 0x263   : > { %v2154_v13 = vmax.f32 %v2122_v4, 0.0  ;;  %v3739_v4 = vunpack.c.l.bf16 %v3802_v1 }
 0x264   : > { %v4731_v5 = vpop.f32.mrf.mxu2 }
 0x266   : > { %v1798_v8 = vpop.f32.mrf.mxu1 }
 0x267   : > { %v2091_v9 = vadd.f32 %v3728_v6, %v1798_v8  ;;  %v3740_v6 = vunpack.c.h.bf16 %v3802_v1 }
 0x269   : > { %v2123_v55 = vadd.f32 %v2091_v9, %v1951_v23 }
 0x26b   : > { %v2155_v58 = vmax.f32 %v2123_v55, 0.0 }
 0x26c   : > { %v1966_v0 = vpop.f32.mrf.mxu2 }
 0x26d   : > { %v4735_v15 = vpack.c.bf16 %v2155_v58, %v2154_v13  ;;  %v3803_v58 = vld [vmem:[%s4180_s13 + $0x28] sm:$0xff]  }
 0x26e   : > { %v1801_v52 = vpop.f32.mrf.mxu1 }
 0x26f   : > { %v2092_v18 = vadd.f32 %v3731_v17, %v1801_v52  ;;  %v3743_v17 = vunpack.c.l.bf16 %v3803_v58 }
 0x271   : > { %3460 = vmatmul.msk.bf16.gmra.mxu2 %vm3459_vm15, %v4020_v41  ;;  %3390 = vmatmul.msk.bf16.gmra.mxu1 %vm4684_vm9, %v4020_v41  ;;  %v2124_v21 = vadd.f32 %v2092_v18, %v4695_v29  ;;  %vm2220_vm9 = vcmask 261120  }
 0x273   : > { %v2156_v36 = vmax.f32 %v2124_v21, 0.0 }
 0x274   : > { %v4742_v19 = vpop.f32.mrf.mxu2 }
 0x276   : > { %v1803_v23 = vpop.f32.mrf.mxu1 }
 0x277   : > { %v2093_v28 = vadd.f32 %v3732_v22, %v1803_v23 }
 0x279   : > { %v2125_v35 = vadd.f32 %v2093_v28, %v4700_v53 }
 0x27b   : > { %v2157_v38 = vmax.f32 %v2125_v35, 0.0 }
 0x27c   : > { %v1971_v39 = vpop.f32.mrf.mxu2 }
 0x27d   : > { %v2186_v40 = vpack.c.bf16 %v2157_v38, %v2156_v36 }
 0x27e   : > { %v1806_v43 = vpop.f32.mrf.mxu1 }
 0x27f   : > { %3475 = vmatmul.msk.bf16.vlgmr.msra.gmra.mxu3 %vm2220_vm9, %v2186_v40  ;;  %v2094_v29 = vadd.f32 %v3735_v45, %v1806_v43 }
 0x281   : > { %3462 = vmatmul.msk.bf16.gmra.mxu2 %vm3461_vm1, %v4020_v41  ;;  %3392 = vmatmul.msk.bf16.gmra.mxu1 %vm4706_vm0, %v4020_v41  ;;  %v2126_v48 = vadd.f32 %v2094_v29, %v4717_v44  ;;  %vm3463_vm0 = vmpackc.low %vm1385_vm8, %vm1384_vm12 }
 0x283   : > { %v2158_v59 = vmax.f32 %v2126_v48, 0.0  ;;  %v3805_v48 = vld [vmem:[%s4180_s13 + $0x38] sm:$0xff]  }
 0x284   : > { %v1974_v53 = vpop.f32.mrf.mxu2  ;;  %v3751_v24 = vunpack.c.l.bf16 %v3805_v48 }
 0x286   : > { %v1808_v47 = vpop.f32.mrf.mxu1 }
 0x287   : > { %v2095_v54 = vadd.f32 %v3736_v46, %v1808_v47  ;;  %v3639_v47 = vld [vmem:[%s5295_s9 + $0x38] sm:$0xff] }
 0x288   : > { %2474 = vmatpush.bf16.msrb.mxu3 %v3639_v47 }
 0x289   : > { %v2127_v50 = vadd.f32 %v2095_v54, %v1961_v61 }
 0x28b   : > { %v2159_v60 = vmax.f32 %v2127_v50, 0.0  ;;  %v3752_v50 = vunpack.c.h.bf16 %v3805_v48 }
 0x28c   : > { %v1976_v62 = vpop.f32.mrf.mxu2 }
 0x28d   : > { %v2187_v2 = vpack.c.bf16 %v2159_v60, %v2158_v59 }
 0x28e   : > { %v1811_v42 = vpop.f32.mrf.mxu1 }
 0x28f   : > { %3476 = vmatmul.msk.bf16.gmra.mxu3 %vm2220_vm9, %v2187_v2  ;;  %v2096_v44 = vadd.f32 %v3739_v4, %v1811_v42  ;;  %v3806_v4 = vld [vmem:[%s4180_s13 + $0x40] sm:$0xff]  }
 0x290   : > { %v3756_v33 = vunpack.c.h.bf16 %v3806_v4 }
 0x291   : > { %3464 = vmatmul.msk.bf16.gmra.mxu2 %vm3463_vm0, %v4020_v41  ;;  %3394 = vmatmul.msk.bf16.gmra.mxu1 %vm4465_vm2, %v4020_v41  ;;  %v2128_v9 = vadd.f32 %v2096_v44, %v4731_v5  ;;  %v3744_v5 = vunpack.c.h.bf16 %v3803_v58 }
 0x293   : > { %v2160_v55 = vmax.f32 %v2128_v9, 0.0 }
 0x294   : > { %v1979_v61 = vpop.f32.mrf.mxu2 }
 0x296   : > { %v1813_v8 = vpop.f32.mrf.mxu1 }
 0x297   : > { %v2097_v10 = vadd.f32 %v3740_v6, %v1813_v8  ;;  %v3755_v8 = vunpack.c.l.bf16 %v3806_v4 }
 0x299   : > { %v2129_v32 = vadd.f32 %v2097_v10, %v1966_v0 }
 0x29b   : > { %v2161_v12 = vmax.f32 %v2129_v32, 0.0 }
 0x29c   : > { %v1981_v13 = vpop.f32.mrf.mxu2 }
 0x29d   : > { %v2188_v56 = vpack.c.bf16 %v2161_v12, %v2160_v55 }
 0x29e   : > { %v1816_v52 = vpop.f32.mrf.mxu1 }
 0x29f   : > { %3477 = vmatmul.msk.bf16.gmra.mxu3 %vm2220_vm9, %v2188_v56  ;;  %v2098_v37 = vadd.f32 %v3743_v17, %v1816_v52  ;;  %v3807_v52 = vld [vmem:[%s4180_s13 + $0x48] sm:$0xff]  }
 0x2a1   : > { %3473 = vmatmul.msk.bf16.vlgmr.msrb.gmra.mxu2 %vm2220_vm9, %v4724_v63  ;;  %3396 = vmatmul.msk.bf16.gmra.mxu1 %vm4485_vm7, %v4020_v41  ;;  %v2130_v22 = vadd.f32 %v2098_v37, %v4742_v19  ;;  %v3747_v63 = vunpack.c.l.bf16 %v3804_v34  ;;  %v3748_v19 = vunpack.c.h.bf16 %v3804_v34 }
 0x2a3   : > { %v2162_v28 = vmax.f32 %v2130_v22, 0.0 }
 0x2a4   : > { %v1984_v0 = vpop.f32.mrf.mxu2 }
 0x2a6   : > { %v1818_v18 = vpop.f32.mrf.mxu1 }
 0x2a7   : > { %v2099_v23 = vadd.f32 %v3744_v5, %v1818_v18  ;;  %v3759_v5 = vunpack.c.l.bf16 %v3807_v52 }
 0x2a9   : > { %v2131_v21 = vadd.f32 %v2099_v23, %v1971_v39  ;;  %v3760_v23 = vunpack.c.h.bf16 %v3807_v52 }
 0x2ab   : > { %v2163_v31 = vmax.f32 %v2131_v21, 0.0 }
 0x2ac   : > { %v1986_v36 = vpop.f32.mrf.mxu2 }
 0x2ad   : > { %v2189_v35 = vpack.c.bf16 %v2163_v31, %v2162_v28 }
 0x2ae   : > { %v1821_v38 = vpop.f32.mrf.mxu1 }
 0x2af   : > { %3478 = vmatmul.msk.bf16.gmra.mxu3 %vm2220_vm9, %v2189_v35  ;;  %v2100_v3 = vadd.f32 %v3747_v63, %v1821_v38  ;;  %v3808_v38 = vld [vmem:[%s4180_s13 + $0x50] sm:$0xff]  }
 0x2b1   : > { %3474 = vmatmul.msk.bf16.gmra.mxu2 %vm2220_vm9, %v4735_v15  ;;  %3398 = vmatmul.msk.bf16.gmra.mxu1 %vm4521_vm5, %v4020_v41  ;;  %v2132_v26 = vadd.f32 %v2100_v3, %v1974_v53 }
 0x2b3   : > { %v2164_v29 = vmax.f32 %v2132_v26, 0.0  ;;  %v3764_v26 = vunpack.c.h.bf16 %v3808_v38 }
 0x2b4   : > { %v1989_v43 = vpop.f32.mrf.mxu2 }
 0x2b6   : > { %v1823_v39 = vpop.f32.mrf.mxu1 }
 0x2b7   : > { %v2101_v40 = vadd.f32 %v3748_v19, %v1823_v39  ;;  %v3763_v19 = vunpack.c.l.bf16 %v3808_v38 }
 0x2b9   : > { %v2133_v45 = vadd.f32 %v2101_v40, %v1976_v62 }
 0x2bb   : > { %v2165_v46 = vmax.f32 %v2133_v45, 0.0  ;;  %v3637_v45 = vld [vmem:[%s5295_s9 + $0x28] sm:$0xff] }
 0x2bc   : > { %v1991_v53 = vpop.f32.mrf.mxu2 }
 0x2bd   : > { %v2190_v54 = vpack.c.bf16 %v2165_v46, %v2164_v29 }
 0x2be   : > { %v1826_v15 = vpop.f32.mrf.mxu1 }
 0x2bf   : > { %3479 = vmatmul.msk.bf16.gmra.mxu3 %vm2220_vm9, %v2190_v54  ;;  %v2102_v49 = vadd.f32 %v3751_v24, %v1826_v15  ;;  %v3809_v15 = vld [vmem:[%s4180_s13 + $0x58] sm:$0xff]  }
 0x2c1   : > { %3400 = vmatmul.msk.bf16.gmra.mxu1 %vm4542_vm13, %v4020_v41  ;;  %v2134_v59 = vadd.f32 %v2102_v49, %v1979_v61 }
 0x2c3   : > { %v2166_v1 = vmax.f32 %v2134_v59, 0.0 }
 0x2c4   : > { %v1994_v42 = vpop.f32.mrf.mxu2 }
 0x2c6   : > { %v1828_v57 = vpop.f32.mrf.mxu1 }
 0x2c7   : > { %v2103_v60 = vadd.f32 %v3752_v50, %v1828_v57  ;;  %v3767_v50 = vunpack.c.l.bf16 %v3809_v15 }
 0x2c9   : > { %v2135_v62 = vadd.f32 %v2103_v60, %v1981_v13  ;;  %v3638_v13 = vld [vmem:[%s5295_s9 + $0x30] sm:$0xff]  ;;  %v3768_v60 = vunpack.c.h.bf16 %v3809_v15 }
 0x2ca   : > { %2475 = vmatpush.bf16.msrb.mxu3 %v3638_v13 }
 0x2cb   : > { %v2167_v2 = vmax.f32 %v2135_v62, 0.0  ;;  %v4804_v62 = vld [vmem:[%s5294_s8] ss:$0 sm:$0xff] }
 0x2cc   : > { %v1996_v10 = vpop.f32.mrf.mxu2 }
 0x2cd   : > { %v2191_v44 = vpack.c.bf16 %v2167_v2, %v2166_v1 }
 0x2ce   : > { %v1831_v6 = vpop.f32.mrf.mxu1  ;;  %2476 = vmatpush.bf16.msrb.mxu3 %v3637_v45 }
 0x2cf   : > { %3480 = vmatmul.msk.bf16.gmra.mxu3 %vm2220_vm9, %v2191_v44  ;;  %v2104_v9 = vadd.f32 %v3755_v8, %v1831_v6 }
 0x2d1   : > { %v2136_v55 = vadd.f32 %v2104_v9, %v1984_v0 }
 0x2d3   : > { %v2168_v61 = vmax.f32 %v2136_v55, 0.0 }
 0x2d4   : > { %v1999_v18 = vpop.f32.mrf.mxu2 }
 0x2d6   : > { %v1833_v32 = vpop.f32.mrf.mxu1 }
 0x2d7   : > { %v2105_v12 = vadd.f32 %v3756_v33, %v1833_v32  ;;  %v3810_v32 = vld [vmem:[%s4180_s13 + $0x60] sm:$0xff]  }
 0x2d9   : > { %v2137_v58 = vadd.f32 %v2105_v12, %v1986_v36 }
 0x2db   : > { %v2169_v56 = vmax.f32 %v2137_v58, 0.0 }
 0x2dc   : > { %v2001_v34 = vpop.f32.mrf.mxu2 }
 0x2dd   : > { %v2192_v17 = vpack.c.bf16 %v2169_v56, %v2168_v61  ;;  %v3771_v56 = vunpack.c.l.bf16 %v3810_v32 }
 0x2de   : > { %v1836_v37 = vpop.f32.mrf.mxu1 }
 0x2df   : > { %3481 = vmatmul.msk.bf16.gmra.mxu3 %vm2220_vm9, %v2192_v17  ;;  %v2106_v22 = vadd.f32 %v3759_v5, %v1836_v37  ;;  %v3772_v5 = vunpack.c.h.bf16 %v3810_v32 }
 0x2e1   : > { %v2138_v21 = vadd.f32 %v2106_v22, %v1989_v43 }
 0x2e3   : > { %v2170_v35 = vmax.f32 %v2138_v21, 0.0 }
 0x2e4   : > { %v2004_v40 = vpop.f32.mrf.mxu2 }
 0x2e6   : > { %v1838_v0 = vpop.f32.mrf.mxu1 }
 0x2e7   : > { %v2107_v28 = vadd.f32 %v3760_v23, %v1838_v0 }
 0x2e9   : > { %v2139_v31 = vadd.f32 %v2107_v28, %v1991_v53 }
 0x2eb   : > { %v2171_v36 = vmax.f32 %v2139_v31, 0.0 }
 0x2ec   : > { %v2006_v53 = vpop.f32.mrf.mxu2 }
 0x2ed   : > { %v2193_v63 = vpack.c.bf16 %v2171_v36, %v2170_v35 }
 0x2ee   : > { %v1841_v3 = vpop.f32.mrf.mxu1 }
 0x2ef   : > { %3482 = vmatmul.msk.bf16.gmra.mxu3 %vm2220_vm9, %v2193_v63  ;;  %v2108_v39 = vadd.f32 %v3763_v19, %v1841_v3  ;;  %v3811_v63 = vld [vmem:[%s4180_s13 + $0x68] sm:$0xff]  }
 0x2f0   : > { %v3775_v45 = vunpack.c.l.bf16 %v3811_v63 }
 0x2f1   : > { %v2140_v29 = vadd.f32 %v2108_v39, %v1994_v42 }
 0x2f3   : > { %v2172_v48 = vmax.f32 %v2140_v29, 0.0 }
 0x2f4   : > { %v2009_v4 = vpop.f32.mrf.mxu2 }
 0x2f6   : > { %v1843_v43 = vpop.f32.mrf.mxu1 }
 0x2f7   : > { %v2109_v46 = vadd.f32 %v3764_v26, %v1843_v43 }
 0x2f9   : > { %v2141_v47 = vadd.f32 %v2109_v46, %v1996_v10  ;;  %v3776_v46 = vunpack.c.h.bf16 %v3811_v63 }
 0x2fb   : > { %v2173_v54 = vmax.f32 %v2141_v47, 0.0 }
 0x2fc   : > { %v2011_v52 = vpop.f32.mrf.mxu2 }
 0x2fd   : > { %v2194_v24 = vpack.c.bf16 %v2173_v54, %v2172_v48 }
 0x2fe   : > { %v1846_v49 = vpop.f32.mrf.mxu1 }
 0x2ff   : > { %3483 = vmatmul.msk.bf16.gmra.mxu3 %vm2220_vm9, %v2194_v24  ;;  %v2110_v59 = vadd.f32 %v3767_v50, %v1846_v49 }
 0x301   : > { %v2142_v2 = vadd.f32 %v2110_v59, %v1999_v18  ;;  %v3636_v18 = vld [vmem:[%s5295_s9 + $0x20] sm:$0xff] }
 0x302   : > { %v2288_v57 = vpop.f32.mrf.mxu3  ;;  %2477 = vmatpush.bf16.msrb.mxu3 %v3636_v18  ;;  %v3632_v18 = vld [vmem:[%s5295_s9] sm:$0xff] }
 0x303   : > { %v2289_v44 = vadd.f32 %v4804_v62, %v2288_v57  ;;  %v2174_v9 = vmax.f32 %v2142_v2, 0.0 }
 0x304   : > { %v2014_v38 = vpop.f32.mrf.mxu2 }
 0x305   : > { %v2362_v55 = vmax.f32 %v2289_v44, 0.0  ;;  %v3635_v44 = vld [vmem:[%s5295_s9 + $0x18] sm:$0xff] }
 0x306   : > { %v1848_v1 = vpop.f32.mrf.mxu1  ;;  %2478 = vmatpush.bf16.msrb.mxu3 %v3635_v44 }
 0x307   : > { %v2111_v42 = vadd.f32 %v3768_v60, %v1848_v1  ;;  %v3812_v60 = vld [vmem:[%s4180_s13 + $0x70] sm:$0xff]  }
 0x309   : > { %v2143_v6 = vadd.f32 %v2111_v42, %v2001_v34 }
 0x30a   : > { %v2290_v8 = vpop.f32.mrf.mxu3 }
 0x30b   : > { %v2175_v33 = vmax.f32 %v2143_v6, 0.0  ;;  %v2291_v10 = vadd.f32 %v4804_v62, %v2290_v8  ;;  %v3779_v8 = vunpack.c.l.bf16 %v3812_v60 }
 0x30c   : > { %v2016_v47 = vpop.f32.mrf.mxu2 }
 0x30d   : > { %v2363_v12 = vmax.f32 %v2291_v10, 0.0  ;;  %v2195_v58 = vpack.c.bf16 %v2175_v33, %v2174_v9  ;;  %v3634_v10 = vld [vmem:[%s5295_s9 + $0x10] sm:$0xff] }
 0x30e   : > { %v1851_v61 = vpop.f32.mrf.mxu1  ;;  %2479 = vmatpush.bf16.msrb.mxu3 %v3634_v10 }
 0x30f   : > { %3484 = vmatmul.msk.bf16.gmra.mxu3 %vm2220_vm9, %v2195_v58  ;;  %v4810_v13 = vpack.c.bf16 %v2363_v12, %v2362_v55  ;;  %v2112_v37 = vadd.f32 %v3771_v56, %v1851_v61  ;;  %v3780_v55 = vunpack.c.h.bf16 %v3812_v60  ;;  %v3633_v12 = vld [vmem:[%s5295_s9 + $0x8] sm:$0xff] }
 0x311   : > { %v2144_v23 = vadd.f32 %v2112_v37, %v2004_v40 }
 0x312   : > { %v2293_v17 = vpop.f32.mrf.mxu3  ;;  %2480 = vmatpush.bf16.msrb.mxu3 %v3633_v12 }
 0x313   : > { %v2294_v21 = vadd.f32 %v4804_v62, %v2293_v17  ;;  %v2176_v34 = vmax.f32 %v2144_v23, 0.0 }
 0x314   : > { %v2019_v9 = vpop.f32.mrf.mxu2 }
 0x315   : > { %v2364_v3 = vmax.f32 %v2294_v21, 0.0  ;;  %v3813_v21 = vld [vmem:[%s4180_s13 + $0x78] sm:$0xff]  }
 0x316   : > { %v1853_v22 = vpop.f32.mrf.mxu1  ;;  %2481 = vmatpush.bf16.msrb.mxu3 %v3632_v18 }
 0x317   : > { %v2113_v0 = vadd.f32 %v3772_v5, %v1853_v22 }
 0x319   : > { %v2145_v28 = vadd.f32 %v2113_v0, %v2006_v53 }
 0x31a   : > { %v2295_v31 = vpop.f32.mrf.mxu3 }
 0x31b   : > { %v2177_v35 = vmax.f32 %v2145_v28, 0.0  ;;  %v2296_v36 = vadd.f32 %v4804_v62, %v2295_v31 }
 0x31c   : > { %v2021_v37 = vpop.f32.mrf.mxu2 }
 0x31d   : > { %v2365_v19 = vmax.f32 %v2296_v36, 0.0  ;;  %v2196_v39 = vpack.c.bf16 %v2177_v35, %v2176_v34  ;;  %v3783_v36 = vunpack.c.l.bf16 %v3813_v21 }
 0x31e   : > { %v1856_v26 = vpop.f32.mrf.mxu1 }
 0x31f   : > { %3485 = vmatmul.msk.bf16.gmra.mxu3 %vm2220_vm9, %v2196_v39  ;;  %v4819_v40 = vpack.c.bf16 %v2365_v19, %v2364_v3  ;;  %v2114_v29 = vadd.f32 %v3775_v45, %v1856_v26  ;;  %v3784_v19 = vunpack.c.h.bf16 %v3813_v21  ;;  %v3647_v21 = vld [vmem:[%s5297_s11 + $0x38] sm:$0xff] }
 0x320   : > { %2679 = vmatpush.bf16.msrb.mxu0 %v3647_v21  ;;  %v3641_v21 = vld [vmem:[%s5297_s11 + $0x8] sm:$0xff] }
 0x321   : > { %v2146_v54 = vadd.f32 %v2114_v29, %v2009_v4 }
 0x322   : > { %v2298_v43 = vpop.f32.mrf.mxu3 }
 0x323   : > { %v2299_v24 = vadd.f32 %v4804_v62, %v2298_v43  ;;  %v2178_v50 = vmax.f32 %v2146_v54, 0.0 }
 0x324   : > { %v2278_v39 = vpop.f32.mrf.mxu2 }
 0x325   : > { %v2366_v1 = vmax.f32 %v2299_v24, 0.0 }
 0x326   : > { %v1858_v48 = vpop.f32.mrf.mxu1 }
 0x327   : > { %v2115_v15 = vadd.f32 %v3776_v46, %v1858_v48 }
 0x329   : > { %v2147_v53 = vadd.f32 %v2115_v15, %v2011_v52 }
 0x32a   : > { %v2300_v49 = vpop.f32.mrf.mxu3 }
 0x32b   : > { %v2179_v57 = vmax.f32 %v2147_v53, 0.0  ;;  %v2301_v59 = vadd.f32 %v4804_v62, %v2300_v49 }
 0x32d   : > { %v2367_v2 = vmax.f32 %v2301_v59, 0.0  ;;  %v2197_v42 = vpack.c.bf16 %v2179_v57, %v2178_v50  ;;  %v2280_v50 = vpop.f32.mrf.mxu2 }
 0x32e   : > { %v1861_v6 = vpop.f32.mrf.mxu1  ;;  %v2281_v60 = vadd.f32 %v4804_v62, %v2280_v50 }
 0x32f   : > { %3486 = vmatmul.msk.bf16.gmra.mxu3 %vm2220_vm9, %v2197_v42  ;;  %v4828_v4 = vpack.c.bf16 %v2367_v2, %v2366_v1  ;;  %v2116_v32 = vadd.f32 %v3779_v8, %v1861_v6  ;;  %v2279_v1 = vadd.f32 %v4804_v62, %v2278_v39  ;;  %v4870_v39 = vpop.f32.mrf.mxu0 }
 0x330   : > { %v2359_v42 = vmax.f32 %v2281_v60, 0.0 }
 0x331   : > { %v2148_v61 = vadd.f32 %v2116_v32, %v2014_v38  ;;  %v2358_v8 = vmax.f32 %v2279_v1, 0.0  ;;  %v3645_v1 = vld [vmem:[%s5297_s11 + $0x28] sm:$0xff] }
 0x332   : > { %v2303_v33 = vpop.f32.mrf.mxu3 }
 0x333   : > { %v2304_v52 = vadd.f32 %v4804_v62, %v2303_v33  ;;  %v2180_v22 = vmax.f32 %v2148_v61, 0.0  ;;  %v2390_v33 = vpack.c.bf16 %v2359_v42, %v2358_v8 }
 0x335   : > { %v2368_v28 = vmax.f32 %v2304_v52, 0.0  ;;  %v2283_v2 = vpop.f32.mrf.mxu2 }
 0x336   : > { %v1863_v58 = vpop.f32.mrf.mxu1 }
 0x337   : > { %v2117_v56 = vadd.f32 %v3780_v55, %v1863_v58 }
 0x339   : > { %v2149_v17 = vadd.f32 %v2117_v56, %v2016_v47  ;;  %v2284_v56 = vadd.f32 %v4804_v62, %v2283_v2 }
 0x33a   : > { %v2305_v5 = vpop.f32.mrf.mxu3 }
 0x33b   : > { %v2181_v23 = vmax.f32 %v2149_v17, 0.0  ;;  %v2306_v0 = vadd.f32 %v4804_v62, %v2305_v5  ;;  %v2360_v5 = vmax.f32 %v2284_v56, 0.0 }
 0x33d   : > { %v2198_v31 = vpack.c.bf16 %v2181_v23, %v2180_v22  ;;  %v2369_v34 = vmax.f32 %v2306_v0, 0.0  ;;  %v2285_v12 = vpop.f32.mrf.mxu2 }
 0x33e   : > { %v1866_v35 = vpop.f32.mrf.mxu1  ;;  %v2286_v61 = vadd.f32 %v4804_v62, %v2285_v12 }
 0x33f   : > { %3487 = vmatmul.msk.bf16.gmra.mxu3 %vm2220_vm9, %v2198_v31  ;;  %v4843_v38 = vpack.c.bf16 %v2369_v34, %v2368_v28  ;;  %v2118_v3 = vadd.f32 %v3783_v36, %v1866_v35 }
 0x340   : > { %v2361_v52 = vmax.f32 %v2286_v61, 0.0 }
 0x341   : > { %v2150_v45 = vadd.f32 %v2118_v3, %v2019_v9 }
 0x342   : > { %v2308_v63 = vpop.f32.mrf.mxu3  ;;  %v2391_v22 = vpack.c.bf16 %v2361_v52, %v2360_v5 }
 0x343   : > { %v2309_v29 = vadd.f32 %v4804_v62, %v2308_v63  ;;  %v2182_v48 = vmax.f32 %v2150_v45, 0.0  ;;  %v3646_v45 = vld [vmem:[%s5297_s11 + $0x30] sm:$0xff] }
 0x344   : > { %2680 = vmatpush.bf16.msrb.mxu0 %v3646_v45 }
 0x345   : > { %v2370_v24 = vmax.f32 %v2309_v29, 0.0  ;;  %v4876_v29 = vpop.f32.mrf.mxu0 }
 0x346   : > { %v1868_v26 = vpop.f32.mrf.mxu1 }
 0x347   : > { %v2119_v43 = vadd.f32 %v3784_v19, %v1868_v26 }
 0x348   : > { %2681 = vmatpush.bf16.msrb.mxu0 %v3645_v1 }
 0x349   : > { %v2151_v46 = vadd.f32 %v2119_v43, %v2021_v37 }
 0x34a   : > { %v2310_v47 = vpop.f32.mrf.mxu3 }
 0x34b   : > { %v2183_v54 = vmax.f32 %v2151_v46, 0.0  ;;  %v2311_v15 = vadd.f32 %v4804_v62, %v2310_v47 }
 0x34d   : > { %v2199_v53 = vpack.c.bf16 %v2183_v54, %v2182_v48  ;;  %v2371_v49 = vmax.f32 %v2311_v15, 0.0 }
 0x34f   : > { %3488 = vmatmul.msk.bf16.gmra.mxu3 %vm2220_vm9, %v2199_v53  ;;  %v4848_v57 = vpack.c.bf16 %v2371_v49, %v2370_v24  ;;  %v4882_v24 = vpop.f32.mrf.mxu0 }
 0x352   : > { %v2313_v59 = vpop.f32.mrf.mxu3 }
 0x353   : > { %v2314_v44 = vadd.f32 %v4804_v62, %v2313_v59 }
 0x355   : > { %v2372_v10 = vmax.f32 %v2314_v44, 0.0 }
 0x357   : > { %v4889_v2 = vpop.f32.mrf.mxu0 }
 0x35a   : > { %v2315_v6 = vpop.f32.mrf.mxu3 }
 0x35b   : > { %v2316_v9 = vadd.f32 %v4804_v62, %v2315_v6 }
 0x35d   : > { %v2373_v32 = vmax.f32 %v2316_v9, 0.0 }
 0x35f   : > { %2482 = vmatmul.bf16.vlgmr.msrb.gmra.mxu3 %v2390_v33  ;;  %v4854_v55 = vpack.c.bf16 %v2373_v32, %v2372_v10  ;;  %v4894_v44 = vpop.f32.mrf.mxu0 }
 0x362   : > { %v2318_v58 = vpop.f32.mrf.mxu3 }
 0x363   : > { %v2319_v17 = vadd.f32 %v4804_v62, %v2318_v58  ;;  %v3644_v58 = vld [vmem:[%s5297_s11 + $0x20] sm:$0xff] }
 0x364   : > { %2682 = vmatpush.bf16.msrb.mxu0 %v3644_v58 }
 0x365   : > { %v2374_v23 = vmax.f32 %v2319_v17, 0.0 }
 0x367   : > { %v4901_v12 = vpop.f32.mrf.mxu0 }
 0x36a   : > { %v2320_v37 = vpop.f32.mrf.mxu3 }
 0x36b   : > { %v2321_v18 = vadd.f32 %v4804_v62, %v2320_v37 }
 0x36d   : > { %v2375_v0 = vmax.f32 %v2321_v18, 0.0  ;;  %v3643_v18 = vld [vmem:[%s5297_s11 + $0x18] sm:$0xff] }
 0x36e   : > { %2683 = vmatpush.bf16.msrb.mxu0 %v3643_v18 }
 0x36f   : > { %2487 = vmatmul.bf16.gmra.mxu3 %v2391_v22  ;;  %v4863_v28 = vpack.c.bf16 %v2375_v0, %v2374_v23  ;;  %v4908_v17 = vpop.f32.mrf.mxu0  ;;  %v3642_v23 = vld [vmem:[%s5297_s11 + $0x10] sm:$0xff] }
 0x372   : > { %v2323_v31 = vpop.f32.mrf.mxu3  ;;  %2684 = vmatpush.bf16.msrb.mxu0 %v3642_v23 }
 0x373   : > { %v2324_v34 = vadd.f32 %v4804_v62, %v2323_v31 }
 0x375   : > { %v2376_v63 = vmax.f32 %v2324_v34, 0.0 }
 0x376   : > { %2685 = vmatpush.bf16.msrb.mxu0 %v3641_v21 }
 0x377   : > { %v4919_v0 = vpop.f32.mrf.mxu0 }
 0x37a   : > { %v2325_v35 = vpop.f32.mrf.mxu3 }
 0x37b   : > { %v2326_v36 = vadd.f32 %v4804_v62, %v2325_v35  ;;  %v3640_v35 = vld [vmem:[%s5297_s11] sm:$0xff] }
 0x37c   : > { %2686 = vmatpush.bf16.msrb.mxu0 %v3640_v35 }
 0x37d   : > { %v2377_v3 = vmax.f32 %v2326_v36, 0.0 }
 0x37f   : > { %2492 = vmatmul.bf16.gmra.mxu3 %v4810_v13  ;;  %v4868_v19 = vpack.c.bf16 %v2377_v3, %v2376_v63 }
 0x382   : > { %v2328_v26 = vpop.f32.mrf.mxu3 }
 0x383   : > { %v2329_v43 = vadd.f32 %v4804_v62, %v2328_v26  ;;  %v4932_v26 = vpop.f32.mrf.mxu0 }
 0x385   : > { %v2378_v48 = vmax.f32 %v2329_v43, 0.0 }
 0x38a   : > { %v2330_v46 = vpop.f32.mrf.mxu3 }
 0x38b   : > { %v2331_v47 = vadd.f32 %v4804_v62, %v2330_v46  ;;  %v4935_v46 = vpop.f32.mrf.mxu0 }
 0x38d   : > { %v2379_v54 = vmax.f32 %v2331_v47, 0.0 }
 0x38f   : > { %2497 = vmatmul.bf16.gmra.mxu3 %v4819_v40  ;;  %v4880_v13 = vpack.c.bf16 %v2379_v54, %v2378_v48 }
 0x392   : > { %v2333_v15 = vpop.f32.mrf.mxu3 }
 0x393   : > { %v2334_v53 = vadd.f32 %v4804_v62, %v2333_v15 }
 0x395   : > { %v2380_v59 = vmax.f32 %v2334_v53, 0.0 }
 0x39a   : > { %v2335_v49 = vpop.f32.mrf.mxu3 }
 0x39b   : > { %v2336_v50 = vadd.f32 %v4804_v62, %v2335_v49 }
 0x39d   : > { %v2381_v60 = vmax.f32 %v2336_v50, 0.0  ;;  %v4946_v50 = vld [vmem:[%s5296_s10] ss:$0 sm:$0xff] }
 0x39f   : > { %2502 = vmatmul.bf16.gmra.mxu3 %v4828_v4  ;;  %v4892_v40 = vpack.c.bf16 %v2381_v60, %v2380_v59 }
 0x3a2   : > { %v2338_v42 = vpop.f32.mrf.mxu3 }
 0x3a3   : > { %v2339_v6 = vadd.f32 %v4804_v62, %v2338_v42 }
 0x3a5   : > { %v2382_v33 = vmax.f32 %v2339_v6, 0.0 }
 0x3aa   : > { %v2340_v8 = vpop.f32.mrf.mxu3 }
 0x3ab   : > { %v2341_v9 = vadd.f32 %v4804_v62, %v2340_v8 }
 0x3ad   : > { %v2383_v10 = vmax.f32 %v2341_v9, 0.0 }
 0x3af   : > { %2507 = vmatmul.bf16.gmra.mxu3 %v4843_v38  ;;  %v4899_v32 = vpack.c.bf16 %v2383_v10, %v2382_v33 }
 0x3b2   : > { %v2343_v4 = vpop.f32.mrf.mxu3 }
 0x3b3   : > { %v2344_v61 = vadd.f32 %v4804_v62, %v2343_v4 }
 0x3b5   : > { %v2384_v37 = vmax.f32 %v2344_v61, 0.0 }
 0x3ba   : > { %v2345_v56 = vpop.f32.mrf.mxu3 }
 0x3bb   : > { %v2346_v52 = vadd.f32 %v4804_v62, %v2345_v56 }
 0x3bd   : > { %v2385_v5 = vmax.f32 %v2346_v52, 0.0 }
 0x3bf   : > { %2512 = vmatmul.bf16.gmra.mxu3 %v4848_v57  ;;  %v4911_v38 = vpack.c.bf16 %v2385_v5, %v2384_v37 }
 0x3c2   : > { %v2348_v22 = vpop.f32.mrf.mxu3 }
 0x3c3   : > { %v2349_v57 = vadd.f32 %v4804_v62, %v2348_v22 }
 0x3c5   : > { %v2386_v36 = vmax.f32 %v2349_v57, 0.0 }
 0x3ca   : > { %v2350_v31 = vpop.f32.mrf.mxu3 }
 0x3cb   : > { %v2351_v34 = vadd.f32 %v4804_v62, %v2350_v31 }
 0x3cd   : > { %v2387_v63 = vmax.f32 %v2351_v34, 0.0 }
 0x3cf   : > { %2517 = vmatmul.bf16.gmra.mxu3 %v4854_v55  ;;  %v4930_v3 = vpack.c.bf16 %v2387_v63, %v2386_v36  ;;  %v4941_v55 = vpop.f32.mrf.mxu0 }
 0x3d2   : > { %v2353_v45 = vpop.f32.mrf.mxu3 }
 0x3d3   : > { %v2354_v43 = vadd.f32 %v4804_v62, %v2353_v45 }
 0x3d5   : > { %v2388_v54 = vmax.f32 %v2354_v43, 0.0 }
 0x3d7   : > { %v4950_v6 = vpop.f32.mrf.mxu0 }
 0x3da   : > { %v2355_v47 = vpop.f32.mrf.mxu3 }
 0x3db   : > { %v2356_v48 = vadd.f32 %v4804_v62, %v2355_v47 }
 0x3dd   : > { %v2389_v15 = vmax.f32 %v2356_v48, 0.0 }
 0x3df   : > { %2522 = vmatmul.bf16.gmra.mxu3 %v4863_v28  ;;  %v4939_v53 = vpack.c.bf16 %v2389_v15, %v2388_v54  ;;  %v4953_v9 = vpop.f32.mrf.mxu0 }
 0x3e2   : > { %v2483_v49 = vpop.f32.mrf.mxu3 }
 0x3e3   : > { %v2484_v59 = vadd.f32 %v4946_v50, %v2483_v49 }
 0x3e5   : > { %v2563_v62 = vmax.f32 %v2484_v59, 0.0 }
 0x3e7   : > { %v4958_v52 = vpop.f32.mrf.mxu0 }
 0x3ea   : > { %v2485_v60 = vpop.f32.mrf.mxu3 }
 0x3eb   : > { %v2486_v1 = vadd.f32 %v4946_v50, %v2485_v60 }
 0x3ed   : > { %v2564_v42 = vmax.f32 %v2486_v1, 0.0 }
 0x3ef   : > { %v2595_v28 = vpack.c.bf16 %v2564_v42, %v2563_v62  ;;  %2527 = vmatmul.bf16.gmra.mxu3 %v4868_v19  ;;  %v4962_v22 = vpop.f32.mrf.mxu0 }
 0x3f1   : > { %2687 = vmatmul.bf16.vlgmr.msrb.gmra.mxu0 %v2595_v28 }
 0x3f2   : > { %v2488_v8 = vpop.f32.mrf.mxu3 }
 0x3f3   : > { %v2489_v33 = vadd.f32 %v4946_v50, %v2488_v8 }
 0x3f5   : > { %v2565_v58 = vmax.f32 %v2489_v33, 0.0 }
 0x3fa   : > { %v2490_v10 = vpop.f32.mrf.mxu3 }
 0x3fb   : > { %v2491_v4 = vadd.f32 %v4946_v50, %v2490_v10 }
 0x3fd   : > { %v2566_v61 = vmax.f32 %v2491_v4, 0.0 }
 0x3ff   : > { %2532 = vmatmul.bf16.gmra.mxu3 %v4880_v13  ;;  %v2596_v56 = vpack.c.bf16 %v2566_v61, %v2565_v58  ;;  %v4965_v13 = vpop.f32.mrf.mxu0 }
 0x401   : > { %2692 = vmatmul.bf16.gmra.mxu0 %v2596_v56 }
 0x402   : > { %v2493_v37 = vpop.f32.mrf.mxu3 }
 0x403   : > { %v2494_v19 = vadd.f32 %v4946_v50, %v2493_v37 }
 0x405   : > { %v2567_v23 = vmax.f32 %v2494_v19, 0.0 }
 0x407   : > { %v4970_v47 = vpop.f32.mrf.mxu0 }
 0x40a   : > { %v2495_v5 = vpop.f32.mrf.mxu3 }
 0x40b   : > { %v2496_v18 = vadd.f32 %v4946_v50, %v2495_v5 }
 0x40d   : > { %v2568_v21 = vmax.f32 %v2496_v18, 0.0 }
 0x40f   : > { %2537 = vmatmul.bf16.gmra.mxu3 %v4892_v40  ;;  %v2597_v57 = vpack.c.bf16 %v2568_v21, %v2567_v23  ;;  %v4973_v54 = vpop.f32.mrf.mxu0 }
 0x411   : > { %2697 = vmatmul.bf16.gmra.mxu0 %v2597_v57 }
 0x412   : > { %v2498_v31 = vpop.f32.mrf.mxu3 }
 0x413   : > { %v2499_v34 = vadd.f32 %v4946_v50, %v2498_v31 }
 0x415   : > { %v2569_v63 = vmax.f32 %v2499_v34, 0.0 }
 0x41a   : > { %v2500_v35 = vpop.f32.mrf.mxu3 }
 0x41b   : > { %v2501_v36 = vadd.f32 %v4946_v50, %v2500_v35 }
 0x41d   : > { %v2570_v45 = vmax.f32 %v2501_v36, 0.0 }
 0x41f   : > { %2542 = vmatmul.bf16.gmra.mxu3 %v4899_v32  ;;  %v2598_v43 = vpack.c.bf16 %v2570_v45, %v2569_v63  ;;  %v4977_v32 = vpop.f32.mrf.mxu0 }
 0x421   : > { %2702 = vmatmul.bf16.gmra.mxu0 %v2598_v43 }
 0x422   : > { %v2503_v48 = vpop.f32.mrf.mxu3 }
 0x423   : > { %v2504_v40 = vadd.f32 %v4946_v50, %v2503_v48 }
 0x425   : > { %v2571_v59 = vmax.f32 %v2504_v40, 0.0 }
 0x427   : > { %v4981_v4 = vpop.f32.mrf.mxu0 }
 0x42a   : > { %v2505_v15 = vpop.f32.mrf.mxu3 }
 0x42b   : > { %v2506_v49 = vadd.f32 %v4946_v50, %v2505_v15 }
 0x42d   : > { %v2572_v60 = vmax.f32 %v2506_v49, 0.0 }
 0x42f   : > { %v2599_v1 = vpack.c.bf16 %v2572_v60, %v2571_v59  ;;  %2547 = vmatmul.bf16.gmra.mxu3 %v4911_v38  ;;  %v4984_v56 = vpop.f32.mrf.mxu0 }
 0x431   : > { %2707 = vmatmul.bf16.gmra.mxu0 %v2599_v1 }
 0x432   : > { %v2508_v62 = vpop.f32.mrf.mxu3 }
 0x433   : > { %v2509_v42 = vadd.f32 %v4946_v50, %v2508_v62  ;;  %v5002_v62 = vld [vmem:[%s5362_s26] ss:$0 sm:$0xff] }
 0x435   : > { %v2573_v33 = vmax.f32 %v2509_v42, 0.0 }
 0x437   : > { %v4989_v21 = vpop.f32.mrf.mxu0 }
 0x43a   : > { %v2510_v28 = vpop.f32.mrf.mxu3 }
 0x43b   : > { %v2511_v8 = vadd.f32 %v4946_v50, %v2510_v28 }
 0x43d   : > { %v2574_v10 = vmax.f32 %v2511_v8, 0.0 }
 0x43f   : > { %v2600_v58 = vpack.c.bf16 %v2574_v10, %v2573_v33  ;;  %2552 = vmatmul.bf16.gmra.mxu3 %v4930_v3  ;;  %v4993_v35 = vpop.f32.mrf.mxu0 }
 0x441   : > { %2712 = vmatmul.bf16.gmra.mxu0 %v2600_v58 }
 0x442   : > { %v2513_v61 = vpop.f32.mrf.mxu3 }
 0x443   : > { %v2514_v38 = vadd.f32 %v4946_v50, %v2513_v61 }
 0x445   : > { %v2575_v5 = vmax.f32 %v2514_v38, 0.0 }
 0x447   : > { %v4995_v48 = vpop.f32.mrf.mxu0 }
 0x44a   : > { %v2515_v37 = vpop.f32.mrf.mxu3 }
 0x44b   : > { %v2516_v19 = vadd.f32 %v4946_v50, %v2515_v37 }
 0x44d   : > { %v2576_v18 = vmax.f32 %v2516_v19, 0.0 }
 0x44f   : > { %v2601_v23 = vpack.c.bf16 %v2576_v18, %v2575_v5  ;;  %2557 = vmatmul.bf16.gmra.mxu3 %v4939_v53 }
 0x451   : > { %2717 = vmatmul.bf16.gmra.mxu0 %v2601_v23 }
 0x452   : > { %v2518_v57 = vpop.f32.mrf.mxu3 }
 0x453   : > { %v2519_v3 = vadd.f32 %v4946_v50, %v2518_v57 }
 0x455   : > { %v2577_v36 = vmax.f32 %v2519_v3, 0.0 }
 0x45a   : > { %v2520_v31 = vpop.f32.mrf.mxu3 }
 0x45b   : > { %v2521_v34 = vadd.f32 %v4946_v50, %v2520_v31 }
 0x45d   : > { %v2578_v63 = vmax.f32 %v2521_v34, 0.0 }
 0x45f   : > { %v2602_v45 = vpack.c.bf16 %v2578_v63, %v2577_v36 }
 0x461   : > { %2722 = vmatmul.bf16.gmra.mxu0 %v2602_v45 }
 0x462   : > { %v2523_v43 = vpop.f32.mrf.mxu3 }
 0x463   : > { %v2524_v53 = vadd.f32 %v4946_v50, %v2523_v43 }
 0x465   : > { %v2579_v49 = vmax.f32 %v2524_v53, 0.0 }
 0x46a   : > { %v2525_v40 = vpop.f32.mrf.mxu3 }
 0x46b   : > { %v2526_v15 = vadd.f32 %v4946_v50, %v2525_v40 }
 0x46d   : > { %v2580_v59 = vmax.f32 %v2526_v15, 0.0 }
 0x46e   : > { %v2688_v60 = vpop.f32.mrf.mxu0 }
 0x46f   : > { %v2603_v1 = vpack.c.bf16 %v2580_v59, %v2579_v49  ;;  %v2689_v28 = vadd.f32 %v5002_v62, %v2688_v60 }
 0x471   : > { %2727 = vmatmul.bf16.gmra.mxu0 %v2603_v1  ;;  %v5007_v10 = vmul.f32 %v2689_v28, %v4870_v39 }
 0x472   : > { %v2528_v42 = vpop.f32.mrf.mxu3 }
 0x473   : > { %v2529_v58 = vadd.f32 %v4946_v50, %v2528_v42 }
 0x475   : > { %v2581_v5 = vmax.f32 %v2529_v58, 0.0 }
 0x476   : > { %v2690_v8 = vpop.f32.mrf.mxu0 }
 0x477   : > { %v2691_v33 = vadd.f32 %v5002_v62, %v2690_v8 }
 0x479   : > { %v5011_v61 = vmul.f32 %v2691_v33, %v4876_v29 }
 0x47a   : > { %v2530_v38 = vpop.f32.mrf.mxu3 }
 0x47b   : > { %v2531_v37 = vadd.f32 %v4946_v50, %v2530_v38  ;;  %v2800_v19 = vpack.c.bf16 %v5011_v61, %v5007_v10 }
 0x47d   : > { %v2582_v18 = vmax.f32 %v2531_v37, 0.0 }
 0x47e   : > { %v2693_v23 = vpop.f32.mrf.mxu0 }
 0x47f   : > { %v2604_v57 = vpack.c.bf16 %v2582_v18, %v2581_v5  ;;  %v2694_v39 = vadd.f32 %v5002_v62, %v2693_v23 }
 0x481   : > { %2732 = vmatmul.bf16.gmra.mxu0 %v2604_v57  ;;  %v5019_v29 = vmul.f32 %v2694_v39, %v4882_v24 }
 0x482   : > { %v2533_v3 = vpop.f32.mrf.mxu3 }
 0x483   : > { %v2534_v36 = vadd.f32 %v4946_v50, %v2533_v3 }
 0x485   : > { %v2583_v40 = vmax.f32 %v2534_v36, 0.0 }
 0x486   : > { %v2695_v31 = vpop.f32.mrf.mxu0 }
 0x487   : > { %v2696_v34 = vadd.f32 %v5002_v62, %v2695_v31 }
 0x489   : > { %v5023_v63 = vmul.f32 %v2696_v34, %v4889_v2 }
 0x48a   : > { %v2535_v45 = vpop.f32.mrf.mxu3 }
 0x48b   : > { %v2536_v43 = vadd.f32 %v4946_v50, %v2535_v45  ;;  %v2801_v53 = vpack.c.bf16 %v5023_v63, %v5019_v29 }
 0x48d   : > { %v2584_v15 = vmax.f32 %v2536_v43, 0.0 }
 0x48e   : > { %v2698_v49 = vpop.f32.mrf.mxu0 }
 0x48f   : > { %v2605_v59 = vpack.c.bf16 %v2584_v15, %v2583_v40  ;;  %v2699_v24 = vadd.f32 %v5002_v62, %v2698_v49 }
 0x491   : > { %2737 = vmatmul.bf16.gmra.mxu0 %v2605_v59  ;;  %v5031_v2 = vmul.f32 %v2699_v24, %v4894_v44 }
 0x492   : > { %v2538_v60 = vpop.f32.mrf.mxu3 }
 0x493   : > { %v2539_v28 = vadd.f32 %v4946_v50, %v2538_v60 }
 0x495   : > { %v2585_v37 = vmax.f32 %v2539_v28, 0.0 }
 0x496   : > { %v2700_v1 = vpop.f32.mrf.mxu0 }
 0x497   : > { %v2701_v42 = vadd.f32 %v5002_v62, %v2700_v1 }
 0x499   : > { %v5035_v8 = vmul.f32 %v2701_v42, %v4901_v12 }
 0x49a   : > { %v2540_v33 = vpop.f32.mrf.mxu3 }
 0x49b   : > { %v2541_v58 = vadd.f32 %v4946_v50, %v2540_v33  ;;  %v2802_v38 = vpack.c.bf16 %v5035_v8, %v5031_v2 }
 0x49d   : > { %v2586_v5 = vmax.f32 %v2541_v58, 0.0 }
 0x49e   : > { %v2703_v18 = vpop.f32.mrf.mxu0 }
 0x49f   : > { %v2606_v23 = vpack.c.bf16 %v2586_v5, %v2585_v37  ;;  %v2704_v44 = vadd.f32 %v5002_v62, %v2703_v18 }
 0x4a1   : > { %2742 = vmatmul.bf16.gmra.mxu0 %v2606_v23  ;;  %v5043_v12 = vmul.f32 %v2704_v44, %v4908_v17 }
 0x4a2   : > { %v2543_v57 = vpop.f32.mrf.mxu3 }
 0x4a3   : > { %v2544_v31 = vadd.f32 %v4946_v50, %v2543_v57 }
 0x4a5   : > { %v2587_v40 = vmax.f32 %v2544_v31, 0.0 }
 0x4a6   : > { %v2705_v3 = vpop.f32.mrf.mxu0 }
 0x4a7   : > { %v2706_v39 = vadd.f32 %v5002_v62, %v2705_v3 }
 0x4a9   : > { %v5047_v34 = vmul.f32 %v2706_v39, %v4919_v0 }
 0x4aa   : > { %v2545_v36 = vpop.f32.mrf.mxu3 }
 0x4ab   : > { %v2546_v45 = vadd.f32 %v4946_v50, %v2545_v36  ;;  %v2803_v43 = vpack.c.bf16 %v5047_v34, %v5043_v12 }
 0x4ad   : > { %v2588_v15 = vmax.f32 %v2546_v45, 0.0 }
 0x4ae   : > { %v2708_v49 = vpop.f32.mrf.mxu0 }
 0x4af   : > { %v2607_v59 = vpack.c.bf16 %v2588_v15, %v2587_v40 }
 0x4b1   : > { %2747 = vmatmul.bf16.gmra.mxu0 %v2607_v59 }
 0x4b2   : > { %v2548_v60 = vpop.f32.mrf.mxu3 }
 0x4b3   : > { %v2549_v17 = vadd.f32 %v4946_v50, %v2548_v60 }
 0x4b5   : > { %v2589_v0 = vmax.f32 %v2549_v17, 0.0 }
 0x4b6   : > { %v2710_v24 = vpop.f32.mrf.mxu0 }
 0x4ba   : > { %v2550_v1 = vpop.f32.mrf.mxu3 }
 0x4bb   : > { %v2551_v42 = vadd.f32 %v4946_v50, %v2550_v1 }
 0x4bd   : > { %v2590_v28 = vmax.f32 %v2551_v42, 0.0 }
 0x4be   : > { %v2713_v33 = vpop.f32.mrf.mxu0 }
 0x4bf   : > { %v2608_v58 = vpack.c.bf16 %v2590_v28, %v2589_v0 }
 0x4c1   : > { %2752 = vmatmul.bf16.gmra.mxu0 %v2608_v58 }
 0x4c2   : > { %v2553_v37 = vpop.f32.mrf.mxu3 }
 0x4c3   : > { %v2554_v18 = vadd.f32 %v4946_v50, %v2553_v37 }
 0x4c5   : > { %v2591_v44 = vmax.f32 %v2554_v18, 0.0 }
 0x4c6   : > { %v2715_v5 = vpop.f32.mrf.mxu0 }
 0x4ca   : > { %v2555_v23 = vpop.f32.mrf.mxu3 }
 0x4cb   : > { %v2556_v57 = vadd.f32 %v4946_v50, %v2555_v23 }
 0x4cd   : > { %v2592_v3 = vmax.f32 %v2556_v57, 0.0 }
 0x4ce   : > { %v2718_v39 = vpop.f32.mrf.mxu0 }
 0x4cf   : > { %v2609_v31 = vpack.c.bf16 %v2592_v3, %v2591_v44  ;;  %v2719_v18 = vadd.f32 %v5002_v62, %v2718_v39 }
 0x4d1   : > { %2757 = vmatmul.bf16.gmra.mxu0 %v2609_v31  ;;  %v2714_v31 = vadd.f32 %v5002_v62, %v2713_v33 }
 0x4d2   : > { %v2558_v36 = vpop.f32.mrf.mxu3 }
 0x4d3   : > { %v2559_v40 = vadd.f32 %v4946_v50, %v2558_v36  ;;  %v2780_v36 = vmul.f32 %v2719_v18, %v4953_v9 }
 0x4d5   : > { %v2593_v60 = vmax.f32 %v2559_v40, 0.0 }
 0x4d6   : > { %v2720_v45 = vpop.f32.mrf.mxu0 }
 0x4d7   : > { %v2721_v58 = vadd.f32 %v5002_v62, %v2720_v45  ;;  %v2711_v45 = vadd.f32 %v5002_v62, %v2710_v24 }
 0x4d9   : > { %v2781_v44 = vmul.f32 %v2721_v58, %v4958_v52 }
 0x4da   : > { %v2560_v15 = vpop.f32.mrf.mxu3 }
 0x4db   : > { %v2561_v59 = vadd.f32 %v4946_v50, %v2560_v15  ;;  %v2716_v50 = vadd.f32 %v5002_v62, %v2715_v5  ;;  %v2806_v39 = vpack.c.bf16 %v2781_v44, %v2780_v36  ;;  %v2777_v5 = vmul.f32 %v2711_v45, %v4935_v46 }
 0x4dd   : > { %v2594_v17 = vmax.f32 %v2561_v59, 0.0  ;;  %v2779_v15 = vmul.f32 %v2716_v50, %v4950_v6  ;;  %v1047_v50 = vld [vmem:[%s4185_s25] sm:$0x3]  ;;  %s5363_s25 = sld [smem:[#allocation10_spill]] }
 0x4de   : > { %v2723_v1 = vpop.f32.mrf.mxu0 }
 0x4df   : > { %v2610_v42 = vpack.c.bf16 %v2594_v17, %v2593_v60  ;;  %v2724_v0 = vadd.f32 %v5002_v62, %v2723_v1 }
 0x4e1   : > { %2762 = vmatmul.bf16.gmra.mxu0 %v2610_v42  ;;  %v2782_v23 = vmul.f32 %v2724_v0, %v4962_v22  ;;  %v2709_v22 = vadd.f32 %v5002_v62, %v2708_v49 }
 0x4e3   : > { %v2776_v59 = vmul.f32 %v2709_v22, %v4932_v26  ;;  %s3648_s28 = sshll.u32 %s5363_s25, 7 }
 0x4e4   : > { %s2974_s21 = scalar_lea.hbm %s5365_s20, %s3648_s28 }
 0x4e5   : > { %v2804_v24 = vpack.c.bf16 %v2777_v5, %v2776_v59  ;;  %s2977_s24 = sshll.u32 %s2974_s21, 4  ;;  %s2978_s24 = int_to_ptr.hbm [resolvable:$true] %s2977_s24 }
 0x4e6   : > { %v2725_v28 = vpop.f32.mrf.mxu0  ;;  %s3936_s22 = sshra.s32 %s2978_s24, 4  ;;  %s3937_s22 = int_to_ptr.hbm [resolvable:$true] %s3936_s22 }
 0x4e7   : > { %v2726_v37 = vadd.f32 %v5002_v62, %v2725_v28  ;;  %s3938_s27 = scalar_lea.hbm %s3937_s22, 128  ;;  %p3943_p5 = scmp.lt.s32.totalorder %s3937_s22, %s5365_s20 }
 0x4e8   : > { %p3939_p1 = scmp.ne.s32.totalorder %s3937_s22, %s3938_s27  ;;  %p3944_p6 = scmp.lt.s32.totalorder %s3942_s14, %s3938_s27 }
 0x4e9   : > { %v2783_v57 = vmul.f32 %v2726_v37, %v4965_v13  ;;  %v2778_v13 = vmul.f32 %v2714_v31, %v4941_v55 }
 0x4ea   : > { %p3940_p2 = pnand %p3939_p1, %p4142_p3  ;;  %p3945_p7 = por %p3944_p6, %p3943_p5 }
 0x4eb   : > { %v2807_v3 = vpack.c.bf16 %v2783_v57, %v2782_v23  ;;  %v2805_v52 = vpack.c.bf16 %v2779_v15, %v2778_v13  ;;  %v5115_v23 = vshrl.u32 %v1048_v27, 7 }
 0x4ec   : > { %p3941_p4 = pneg %p3940_p2 }
 0x4ed   : > { %2832 = vmatpush.bf16.msra.mxu1 %v2807_v3  ;;  %v1468_v3 = vadd.s32 8, %v5115_v23 }
 0x4ee   : > { %v2728_v40 = vpop.f32.mrf.mxu0  ;;  %p3946_p8 = pnand %p3945_p7, %p3941_p4 }
 0x4ef   : > { %v2729_v33 = vadd.f32 %v5002_v62, %v2728_v40 }
 0x4f1   : > { %2833 = vmatpush.bf16.msra.mxu1 %v2806_v39  ;;  %v5077_v6 = vmul.f32 %v2729_v33, %v4970_v47 }
 0x4f5   : > { %2834 = vmatpush.bf16.msra.mxu1 %v2805_v52 }
 0x4f6   : > { %v2730_v9 = vpop.f32.mrf.mxu0 }
 0x4f7   : > { %v2731_v60 = vadd.f32 %v5002_v62, %v2730_v9 }
 0x4f9   : > { %v5080_v49 = vmul.f32 %v2731_v60, %v4973_v54  ;;  %2835 = vmatpush.bf16.msra.mxu1 %v2804_v24  ;;  %v1470_v60 = vadd.s32 24, %v5115_v23 }
 0x4fb   : > { %v2808_v46 = vpack.c.bf16 %v5080_v49, %v5077_v6  ;;  %v1475_v6 = vadd.s32 64, %v5115_v23  ;;  %v1476_v49 = vadd.s32 72, %v5115_v23 }
 0x4fd   : > { %2836 = vmatpush.bf16.msra.mxu1 %v2803_v43 }
 0x4fe   : > { %v2733_v26 = vpop.f32.mrf.mxu0 }
 0x4ff   : > { %v2734_v55 = vadd.f32 %v5002_v62, %v2733_v26  ;;  %v1478_v26 = vadd.s32 88, %v5115_v23 }
 0x501   : > { %2837 = vmatpush.bf16.msra.mxu1 %v2802_v38  ;;  %v5096_v17 = vmul.f32 %v2734_v55, %v4977_v32  ;;  %v1479_v55 = vadd.s32 96, %v5115_v23 }
 0x505   : > { %2838 = vmatpush.bf16.msra.mxu1 %v2801_v53 }
 0x506   : > { %v2735_v47 = vpop.f32.mrf.mxu0 }
 0x507   : > { %v2736_v54 = vadd.f32 %v5002_v62, %v2735_v47  ;;  %v1480_v47 = vadd.s32 104, %v5115_v23 }
 0x509   : > { %v5099_v12 = vmul.f32 %v2736_v54, %v4981_v4  ;;  %2839 = vmatpush.bf16.msra.mxu1 %v2800_v19  ;;  %v1481_v54 = vadd.s32 112, %v5115_v23 }
 0x50b   : > { %v2809_v2 = vpack.c.bf16 %v5099_v12, %v5096_v17  ;;  %v1482_v17 = vadd.s32 120, %v5115_v23 }
 0x50e   : > { %v2738_v8 = vpop.f32.mrf.mxu0 }
 0x50f   : > { %v2739_v29 = vadd.f32 %v5002_v62, %v2738_v8 }
 0x511   : > { %v2788_v38 = vmul.f32 %v2739_v29, %v4984_v56  ;;  %v2816_v29 = vld [vmem:[%s4187_s12] sm:$0xff] }
 0x516   : > { %v2740_v63 = vpop.f32.mrf.mxu0 }
 0x517   : > { %v2741_v53 = vadd.f32 %v5002_v62, %v2740_v63 }
 0x519   : > { %v2789_v32 = vmul.f32 %v2741_v53, %v4989_v21 }
 0x51b   : > { %v2810_v34 = vpack.c.bf16 %v2789_v32, %v2788_v38 }
 0x51e   : > { %v2743_v4 = vpop.f32.mrf.mxu0 }
 0x51f   : > { %v2744_v43 = vadd.f32 %v5002_v62, %v2743_v4 }
 0x521   : > { %v2790_v19 = vmul.f32 %v2744_v43, %v4993_v35  ;;  %v5120_v35 = vperm.slane %v1047_v50, 0 }
 0x523   : > { %vm1485_vm2 = vcmp.eq.s32.totalorder %v5115_v23, %v5120_v35  ;;  %vm1487_vm7 = vcmp.eq.s32.totalorder %v1468_v3, %v5120_v35  ;;  %vm1491_vm14 = vcmp.eq.s32.totalorder %v1470_v60, %v5120_v35 }
 0x524   : > { %vm3553_vm5 = vmpackc.low %vm1487_vm7, %vm1485_vm2 }
 0x525   : > { %3554 = vmatmul.msk.bf16.vlgmr.msra.gmra.mxu1 %vm3553_vm5, %v4020_v41 }
 0x526   : > { %v2745_v10 = vpop.f32.mrf.mxu0 }
 0x527   : > { %v2746_v61 = vadd.f32 %v5002_v62, %v2745_v10 }
 0x529   : > { %v2791_v1 = vmul.f32 %v2746_v61, %v4995_v48 }
 0x52b   : > { %v2811_v42 = vpack.c.bf16 %v2791_v1, %v2790_v19  ;;  %v2818_v19 = vld [vmem:[%s4187_s12 + $0x10] sm:$0xff] }
 0x52e   : > { %v2748_v0 = vpop.f32.mrf.mxu0 }
 0x536   : > { %v2750_v28 = vpop.f32.mrf.mxu0 }
 0x537   : > { %v2751_v5 = vadd.f32 %v5002_v62, %v2750_v28  ;;  %v2819_v28 = vld [vmem:[%s4187_s12 + $0x18] sm:$0xff] }
 0x539   : > { %v2793_v33 = vmul.f32 %v2751_v5, %v4638_v7  ;;  %v5146_v7 = vperm.slane %v1047_v50, 1 }
 0x53b   : > { %vm1486_vm4 = vcmp.eq.s32.totalorder %v5115_v23, %v5146_v7  ;;  %vm1488_vm10 = vcmp.eq.s32.totalorder %v1468_v3, %v5146_v7  ;;  %vm1492_vm8 = vcmp.eq.s32.totalorder %v1470_v60, %v5146_v7 }
 0x53c   : > { %vm3569_vm15 = vmpackc.low %vm1488_vm10, %vm1486_vm4  ;;  %vm1503_vm4 = vcmp.eq.s32.totalorder %v1476_v49, %v5120_v35 }
 0x53e   : > { %v2753_v58 = vpop.f32.mrf.mxu0 }
 0x53f   : > { %v2754_v22 = vadd.f32 %v5002_v62, %v2753_v58 }
 0x541   : > { %v2794_v59 = vmul.f32 %v2754_v22, %v4644_v11  ;;  %v1471_v11 = vadd.s32 32, %v5115_v23 }
 0x543   : > { %vm1493_vm3 = vcmp.eq.s32.totalorder %v1471_v11, %v5120_v35  ;;  %vm1494_vm5 = vcmp.eq.s32.totalorder %v1471_v11, %v5146_v7 }
 0x546   : > { %v2755_v37 = vpop.f32.mrf.mxu0 }
 0x547   : > { %v2756_v45 = vadd.f32 %v5002_v62, %v2755_v37 }
 0x549   : > { %v2795_v52 = vmul.f32 %v2756_v45, %v4657_v14  ;;  %v1472_v14 = vadd.s32 40, %v5115_v23 }
 0x54b   : > { %v2813_v9 = vpack.c.bf16 %v2795_v52, %v2794_v59  ;;  %vm1495_vm11 = vcmp.eq.s32.totalorder %v1472_v14, %v5120_v35 }
 0x54c   : > { %vm3557_vm9 = vmpackc.low %vm1495_vm11, %vm1493_vm3 }
 0x54e   : > { %v2758_v56 = vpop.f32.mrf.mxu0 }
 0x54f   : > { %v2759_v27 = vadd.f32 %v5002_v62, %v2758_v56 }
 0x551   : > { %v2796_v13 = vmul.f32 %v2759_v27, %v4662_v16  ;;  %v2822_v27 = vld [vmem:[%s4187_s12 + $0x30] sm:$0xff] }
 0x556   : > { %v2760_v18 = vpop.f32.mrf.mxu0 }
 0x557   : > { %v2761_v48 = vadd.f32 %v5002_v62, %v2760_v18 }
 0x559   : > { %v2797_v15 = vmul.f32 %v2761_v48, %v4676_v20  ;;  %v1469_v20 = vadd.s32 16, %v5115_v23 }
 0x55b   : > { %vm1489_vm13 = vcmp.eq.s32.totalorder %v1469_v20, %v5120_v35  ;;  %vm1490_vm1 = vcmp.eq.s32.totalorder %v1469_v20, %v5146_v7  ;;  %v2825_v20 = vld [vmem:[%s4187_s12 + $0x48] sm:$0xff] }
 0x55c   : > { %vm3555_vm6 = vmpackc.low %vm1491_vm14, %vm1489_vm13  ;;  %vm1496_vm13 = vcmp.eq.s32.totalorder %v1472_v14, %v5146_v7 }
 0x55d   : > { %3556 = vmatmul.msk.bf16.gmra.mxu1 %vm3555_vm6, %v4020_v41  ;;  %vm3571_vm12 = vmpackc.low %vm1492_vm8, %vm1490_vm1  ;;  %vm1501_vm6 = vcmp.eq.s32.totalorder %v1475_v6, %v5120_v35  ;;  %vm1507_vm1 = vcmp.eq.s32.totalorder %v1478_v26, %v5120_v35 }
 0x55e   : > { %v2763_v21 = vpop.f32.mrf.mxu0  ;;  %vm3573_vm14 = vmpackc.low %vm1496_vm13, %vm1494_vm5  ;;  %vm1511_vm5 = vcmp.eq.s32.totalorder %v1480_v47, %v5120_v35 }
 0x55f   : > { %v2764_v57 = vadd.f32 %v5002_v62, %v2763_v21  ;;  %vm3561_vm10 = vmpackc.low %vm1503_vm4, %vm1501_vm6  ;;  %vm1508_vm6 = vcmp.eq.s32.totalorder %v1478_v26, %v5146_v7  ;;  %v2820_v21 = vld [vmem:[%s4187_s12 + $0x20] sm:$0xff] }
 0x561   : > { %v2798_v36 = vmul.f32 %v2764_v57, %v4681_v25  ;;  %v2814_v25 = vpack.c.bf16 %v2797_v15, %v2796_v13 }
 0x566   : > { %v2765_v44 = vpop.f32.mrf.mxu0 }
 0x567   : > { %v2766_v31 = vadd.f32 %v5002_v62, %v2765_v44  ;;  %v2821_v44 = vld [vmem:[%s4187_s12 + $0x28] sm:$0xff] }
 0x569   : > { %v2799_v40 = vmul.f32 %v2766_v31, %v4697_v30  ;;  %v2749_v30 = vadd.f32 %v5002_v62, %v2748_v0  ;;  %v1474_v62 = vadd.s32 56, %v5115_v23 }
 0x56b   : > { %v2815_v39 = vpack.c.bf16 %v2799_v40, %v2798_v36  ;;  %v2792_v16 = vmul.f32 %v2749_v30, %v4624_v51  ;;  %v1473_v51 = vadd.s32 48, %v5115_v23  ;;  %vm1499_vm2 = vcmp.eq.s32.totalorder %v1474_v62, %v5120_v35 }
 0x56c   : > { %vm1500_vm3 = vcmp.eq.s32.totalorder %v1474_v62, %v5146_v7 }
 0x56d   : > { %2881 = vmatpush.bf16.msra.mxu2 %v2815_v39  ;;  %v2812_v24 = vpack.c.bf16 %v2793_v33, %v2792_v16  ;;  %3558 = vmatmul.msk.bf16.gmra.mxu1 %vm3557_vm9, %v4020_v41  ;;  %vm1497_vm0 = vcmp.eq.s32.totalorder %v1473_v51, %v5120_v35  ;;  %v2823_v39 = vld [vmem:[%s4187_s12 + $0x38] sm:$0xff] }
 0x56e   : > { %vm3559_vm7 = vmpackc.low %vm1499_vm2, %vm1497_vm0  ;;  %vm1504_vm0 = vcmp.eq.s32.totalorder %v1476_v49, %v5146_v7 }
 0x571   : > { %2882 = vmatpush.bf16.msra.mxu2 %v2814_v25  ;;  %v2824_v25 = vld [vmem:[%s4187_s12 + $0x40] sm:$0xff] }
 0x575   : > { %2883 = vmatpush.bf16.msra.mxu2 %v2813_v9 }
 0x579   : > { %2884 = vmatpush.bf16.msra.mxu2 %v2812_v24 }
 0x57d   : > { %2885 = vmatpush.bf16.msra.mxu2 %v2811_v42  ;;  %3560 = vmatmul.msk.bf16.gmra.mxu1 %vm3559_vm7, %v4020_v41  ;;  %vm1509_vm7 = vcmp.eq.s32.totalorder %v1479_v55, %v5120_v35 }
 0x57e   : > { %vm3565_vm13 = vmpackc.low %vm1511_vm5, %vm1509_vm7 }
 0x581   : > { %2886 = vmatpush.bf16.msra.mxu2 %v2810_v34  ;;  %v2817_v34 = vld [vmem:[%s4187_s12 + $0x8] sm:$0xff] }
 0x585   : > { %2887 = vmatpush.bf16.msra.mxu2 %v2809_v2 }
 0x589   : > { %2888 = vmatpush.bf16.msra.mxu2 %v2808_v46  ;;  %v1477_v46 = vadd.s32 80, %v5115_v23 }
 0x58b   : > { %vm1505_vm9 = vcmp.eq.s32.totalorder %v1477_v46, %v5120_v35 }
 0x58c   : > { %3570 = vmatmul.msk.bf16.vlgmr.msra.gmra.mxu2 %vm3569_vm15, %v4020_v41  ;;  %vm1498_vm15 = vcmp.eq.s32.totalorder %v1473_v51, %v5146_v7  ;;  %vm3563_vm8 = vmpackc.low %vm1507_vm1, %vm1505_vm9  ;;  %vm1512_vm9 = vcmp.eq.s32.totalorder %v1480_v47, %v5146_v7  ;;  %v2828_v47 = vld [vmem:[%s4187_s12 + $0x60] sm:$0xff] }
 0x58d   : > { %3562 = vmatmul.msk.bf16.gmra.mxu1 %vm3561_vm10, %v4020_v41  ;;  %vm3575_vm11 = vmpackc.low %vm1500_vm3, %vm1498_vm15  ;;  %vm1513_vm10 = vcmp.eq.s32.totalorder %v1481_v54, %v5120_v35  ;;  %vm1515_vm15 = vcmp.eq.s32.totalorder %v1482_v17, %v5120_v35 }
 0x58e   : > { %vm3567_vm3 = vmpackc.low %vm1515_vm15, %vm1513_vm10 }
 0x59c   : > { %3572 = vmatmul.msk.bf16.gmra.mxu2 %vm3571_vm12, %v4020_v41  ;;  %vm1502_vm12 = vcmp.eq.s32.totalorder %v1475_v6, %v5146_v7  ;;  %v2827_v6 = vld [vmem:[%s4187_s12 + $0x58] sm:$0xff] }
 0x59d   : > { %3564 = vmatmul.msk.bf16.gmra.mxu1 %vm3563_vm8, %v4020_v41  ;;  %vm3577_vm2 = vmpackc.low %vm1504_vm0, %vm1502_vm12  ;;  %vm1514_vm8 = vcmp.eq.s32.totalorder %v1481_v54, %v5146_v7  ;;  %vm1516_vm12 = vcmp.eq.s32.totalorder %v1482_v17, %v5146_v7 }
 0x59e   : > { %vm3583_vm0 = vmpackc.low %vm1516_vm12, %vm1514_vm8 }
 0x5a2   : > { %v2841_v12 = vpop.f32.mrf.mxu1 }
 0x5aa   : > { %v2843_v2 = vpop.f32.mrf.mxu1 }
 0x5ac   : > { %3574 = vmatmul.msk.bf16.gmra.mxu2 %vm3573_vm14, %v4020_v41  ;;  %vm1506_vm14 = vcmp.eq.s32.totalorder %v1477_v46, %v5146_v7 }
 0x5ad   : > { %3566 = vmatmul.msk.bf16.gmra.mxu1 %vm3565_vm13, %v4020_v41  ;;  %vm3579_vm4 = vmpackc.low %vm1508_vm6, %vm1506_vm14 }
 0x5bc   : > { %3576 = vmatmul.msk.bf16.gmra.mxu2 %vm3575_vm11, %v4020_v41  ;;  %vm1510_vm11 = vcmp.eq.s32.totalorder %v1479_v55, %v5146_v7  ;;  %v2826_v7 = vld [vmem:[%s4187_s12 + $0x50] sm:$0xff] }
 0x5bd   : > { %3568 = vmatmul.msk.bf16.gmra.mxu1 %vm3567_vm3, %v4020_v41  ;;  %vm3581_vm1 = vmpackc.low %vm1512_vm9, %vm1510_vm11 }
 0x5cc   : > { %3578 = vmatmul.msk.bf16.gmra.mxu2 %vm3577_vm2, %v4020_v41 }
 0x5da   : > { %v2846_v8 = vpop.f32.mrf.mxu1 }
 0x5dc   : > { %3580 = vmatmul.msk.bf16.gmra.mxu2 %vm3579_vm4, %v4020_v41 }
 0x5e2   : > { %v2848_v53 = vpop.f32.mrf.mxu1 }
 0x5ea   : > { %v2851_v10 = vpop.f32.mrf.mxu1 }
 0x5ec   : > { %3582 = vmatmul.msk.bf16.gmra.mxu2 %vm3581_vm1, %v4020_v41 }
 0x5f2   : > { %v2853_v0 = vpop.f32.mrf.mxu1 }
 0x5fa   : > { %v2856_v18 = vpop.f32.mrf.mxu1 }
 0x5fc   : > { %3584 = vmatmul.msk.bf16.gmra.mxu2 %vm3583_vm0, %v4020_v41 }
 0x602   : > { %v2858_v35 = vpop.f32.mrf.mxu1 }
 0x60a   : > { %v2861_v45 = vpop.f32.mrf.mxu1 }
 0x60f   : > { %v2890_v63 = vpop.f32.mrf.mxu2 }
 0x610   : > { %v2891_v38 = vadd.f32 %v2890_v63, %v2841_v12 }
 0x612   : > { %v2930_v32 = vadd.f32 %v2891_v38, %v2816_v29  ;;  %v2863_v52 = vpop.f32.mrf.mxu1 }
 0x614   : > { %2946 = vst [vmem:[%s4187_s12] sm:$0xff] %v2930_v32  ;;  %v2830_v32 = vld [vmem:[%s4187_s12 + $0x70] sm:$0xff] }
 0x617   : > { %v2892_v4 = vpop.f32.mrf.mxu2 }
 0x618   : > { %v2893_v43 = vadd.f32 %v2892_v4, %v2843_v2 }
 0x61a   : > { %v2931_v61 = vadd.f32 %v2893_v43, %v2817_v34  ;;  %v2866_v9 = vpop.f32.mrf.mxu1 }
 0x61c   : > { %2947 = vst [vmem:[%s4187_s12 + $0x8] sm:$0xff] %v2931_v61  ;;  %v2831_v61 = vld [vmem:[%s4187_s12 + $0x78] sm:$0xff] }
 0x61f   : > { %v2895_v41 = vpop.f32.mrf.mxu2 }
 0x620   : > { %v2896_v1 = vadd.f32 %v2895_v41, %v2846_v8  ;;  %v2829_v8 = vld [vmem:[%s4187_s12 + $0x68] sm:$0xff] }
 0x622   : > { %v2932_v42 = vadd.f32 %v2896_v1, %v2818_v19  ;;  %v2868_v14 = vpop.f32.mrf.mxu1 }
 0x624   : > { %2948 = vst [vmem:[%s4187_s12 + $0x10] sm:$0xff] %v2932_v42 }
 0x627   : > { %v2897_v58 = vpop.f32.mrf.mxu2 }
 0x628   : > { %v2898_v37 = vadd.f32 %v2897_v58, %v2848_v53 }
 0x62a   : > { %v2933_v56 = vadd.f32 %v2898_v37, %v2819_v28  ;;  %v2871_v26 = vpop.f32.mrf.mxu1 }
 0x62c   : > { %2949 = vst [vmem:[%s4187_s12 + $0x18] sm:$0xff] %v2933_v56 }
 0x62f   : > { %v2900_v23 = vpop.f32.mrf.mxu2 }
 0x630   : > { %v2901_v57 = vadd.f32 %v2900_v23, %v2851_v10 }
 0x632   : > { %v2934_v50 = vadd.f32 %v2901_v57, %v2820_v21  ;;  %v2873_v2 = vpop.f32.mrf.mxu1 }
 0x634   : > { %2950 = vst [vmem:[%s4187_s12 + $0x20] sm:$0xff] %v2934_v50 }
 0x637   : > { %v2902_v3 = vpop.f32.mrf.mxu2 }
 0x638   : > { %v2903_v48 = vadd.f32 %v2902_v3, %v2853_v0 }
 0x63a   : > { %v2935_v31 = vadd.f32 %v2903_v48, %v2821_v44  ;;  %v2876_v38 = vpop.f32.mrf.mxu1 }
 0x63c   : > { %2951 = vst [vmem:[%s4187_s12 + $0x28] sm:$0xff] %v2935_v31 }
 0x63f   : > { %v2905_v36 = vpop.f32.mrf.mxu2 }
 0x640   : > { %v2906_v40 = vadd.f32 %v2905_v36, %v2856_v18 }
 0x642   : > { %v2936_v15 = vadd.f32 %v2906_v40, %v2822_v27  ;;  %v2878_v10 = vpop.f32.mrf.mxu1 }
 0x644   : > { %2952 = vst [vmem:[%s4187_s12 + $0x30] sm:$0xff] %v2936_v15 }
 0x647   : > { %v2907_v22 = vpop.f32.mrf.mxu2 }
 0x648   : > { %v2908_v13 = vadd.f32 %v2907_v22, %v2858_v35 }
 0x64a   : > { %v2937_v5 = vadd.f32 %v2908_v13, %v2823_v39 }
 0x64c   : > { %2953 = vst [vmem:[%s4187_s12 + $0x38] sm:$0xff] %v2937_v5 }
 0x64f   : > { %v2910_v30 = vpop.f32.mrf.mxu2 }
 0x650   : > { %v2911_v59 = vadd.f32 %v2910_v30, %v2861_v45 }
 0x652   : > { %v2938_v33 = vadd.f32 %v2911_v59, %v2824_v25 }
 0x654   : > { %2954 = vst [vmem:[%s4187_s12 + $0x40] sm:$0xff] %v2938_v33 }
 0x657   : > { %v2912_v60 = vpop.f32.mrf.mxu2 }
 0x658   : > { %v2913_v16 = vadd.f32 %v2912_v60, %v2863_v52 }
 0x65a   : > { %v2939_v24 = vadd.f32 %v2913_v16, %v2825_v20 }
 0x65c   : > { %2955 = vst [vmem:[%s4187_s12 + $0x48] sm:$0xff] %v2939_v24 }
 0x65f   : > { %v2915_v11 = vpop.f32.mrf.mxu2 }
 0x660   : > { %v2916_v51 = vadd.f32 %v2915_v11, %v2866_v9 }
 0x662   : > { %v2940_v62 = vadd.f32 %v2916_v51, %v2826_v7 }
 0x664   : > { %2956 = vst [vmem:[%s4187_s12 + $0x50] sm:$0xff] %v2940_v62 }
 0x667   : > { %v2917_v49 = vpop.f32.mrf.mxu2 }
 0x668   : > { %v2918_v46 = vadd.f32 %v2917_v49, %v2868_v14 }
 0x66a   : > { %v2941_v55 = vadd.f32 %v2918_v46, %v2827_v6 }
 0x66c   : > { %2957 = vst [vmem:[%s4187_s12 + $0x58] sm:$0xff] %v2941_v55 }
 0x66f   : > { %v2920_v54 = vpop.f32.mrf.mxu2 }
 0x670   : > { %v2921_v17 = vadd.f32 %v2920_v54, %v2871_v26 }
 0x672   : > { %v2942_v12 = vadd.f32 %v2921_v17, %v2828_v47 }
 0x674   : > { %2958 = vst [vmem:[%s4187_s12 + $0x60] sm:$0xff] %v2942_v12 }
 0x677   : > { %v2922_v29 = vpop.f32.mrf.mxu2 }
 0x678   : > { %v2923_v63 = vadd.f32 %v2922_v29, %v2873_v2 }
 0x67a   : > { %v2943_v53 = vadd.f32 %v2923_v63, %v2829_v8 }
 0x67c   : > { %2959 = vst [vmem:[%s4187_s12 + $0x68] sm:$0xff] %v2943_v53 }
 0x67f   : > { %v2925_v34 = vpop.f32.mrf.mxu2 }
 0x680   : > { %v2926_v4 = vadd.f32 %v2925_v34, %v2876_v38 }
 0x682   : > { %v2944_v43 = vadd.f32 %v2926_v4, %v2830_v32 }
 0x684   : > { %2960 = vst [vmem:[%s4187_s12 + $0x70] sm:$0xff] %v2944_v43 }
 0x687   : > { %v2927_v19 = vpop.f32.mrf.mxu2 }
 0x688   : > { %v2928_v41 = vadd.f32 %v2927_v19, %v2878_v10 }
 0x68a   : > { %v2945_v1 = vadd.f32 %v2928_v41, %v2831_v61 }
 0x68c   : > { %2961 = vst [vmem:[%s4187_s12 + $0x78] sm:$0xff] %v2945_v1 }
 0x68d   : > { %3949 = shalt.err (!%p3946_p8)
}
 0x68e   : > { %s4021_s12 = smov 128   ;;  %s4022_s29 = smov 8  }
 0x68f   : > { %3840 = dma.vmem_to_hbm [thread:$0]  (%p4142_p3), %s2976_s15, 2048, %s2978_s24, %s2963_s17, %s4021_s12, %s4021_s12, %s4022_s29  }
 0x690 PF: > { %s5368_s28 = sld [smem:[#allocation13_spill]] }
 0x691   : > { %s5369_s18 = sld [smem:[#allocation7_spill]] }
 0x696   : > { %p3846_p10 = scmp.ge.s32.totalorder %s5368_s28, 2 }
 0x697   : > { %s2992_s21 = sand.u32 1, %s5369_s18  }
 0x698   : > { %p3843_p11 = pnand %p3846_p10, %p4152_p9  ;;  %s2993_s23 = scalar_lea.sflag [#allocation5], %s2992_s21 }
 0x69a   : > { %p3844_p12 = pneg %p3843_p11 }
 0x69c   : > { %3983 = dma.done.wait (%p3844_p12), %s2993_s23, 2048  }
 0x69d   : > { %3985 = vsyncadd (%p3844_p12), %s2993_s23, 4294965248  ;;  %s26_s15 = sadd.s32 1, %s5368_s28   ;;  %s5371_s25 = sld [smem:[#allocation8_spill]] }
 0x69e   : > { %p23_p13 = scmp.ge.s32.totalorder %s26_s15, 6   ;;  %s5372_s26 = sld [smem:[#allocation9_spill]] }
 0x69f   : > { %s5373_s27 = sld [smem:[#allocation18_spill]] }
 0x6a0   : > { %s5374_s28 = sld [smem:[#allocation11_spill]]  ;;  %25 = sbr.rel (!%p23_p13) target bundleno = 8 (0x8), region = 120 }
 0x6a1   : > { %s5375_s29 = sld [smem:[#allocation12_spill]] }
 0x6a2   : > { %s5376_s30 = sld [smem:[#allocation14_spill]] }
 0x6a3   : > { %s5377_s14 = sld [smem:[#allocation16_spill]] }
 0x6a5   :  { %2999 = vsyncpa [#allocation5], 1 }
 0x6a6   :  { %3001 = vsyncpa [#allocation5 + $0x1], 1 }

</bundles_post_ra>
